<compile_context>
chip_gen: v7x
topology: tpu7x:2x2x1
jax: 0.10.0
libtpu: 0.0.40
codegen_flags: <defaults>
</compile_context>

<pallas_src>
import functools
import math

import jax
import jax.numpy as jnp
from jax.experimental import pallas as pl
from jax.experimental.pallas import tpu as pltpu

IMAGENET_MEAN = jnp.array([0.485, 0.456, 0.406], jnp.float32)
IMAGENET_STD = jnp.array([0.229, 0.224, 0.225], jnp.float32)


# --------------------------- Pallas kernel ----------------------------------

def _dual_conv_kernel(px_ref, pg_ref, w_ref, shift_ref, *rest,
                      relu_cols, has_residual, store_act, compute_huber):
    """im2col conv for the x-half and gt-half patch tiles in one grid step.

    Two bf16 MXU matmuls (fp32 accumulation) against the shared BN-folded
    weights, + shift (+ residual) (+ ReLU — optionally only on the first
    `relu_cols` columns for the fused 1x1-downsample layer), optional bf16
    activation stores, and an optional fused Huber(delta=1) partial sum
    written as a lane-dense (8, 128) block with the scalar partial at [0, 0].
    """
    i = 0
    if has_residual:
        rx_ref, rg_ref = rest[0], rest[1]
        i = 2
    if store_act:
        ox_ref, og_ref = rest[i], rest[i + 1]
        i += 2
    if compute_huber:
        hub_ref = rest[i]

    w = w_ref[...]
    shift = shift_ref[...]
    yx = jnp.dot(px_ref[...], w, preferred_element_type=jnp.float32) + shift
    yg = jnp.dot(pg_ref[...], w, preferred_element_type=jnp.float32) + shift
    if has_residual:
        yx = yx + rx_ref[...].astype(jnp.float32)
        yg = yg + rg_ref[...].astype(jnp.float32)
    if relu_cols is None:
        yx = jnp.maximum(yx, 0.0)
        yg = jnp.maximum(yg, 0.0)
    else:
        col = jax.lax.broadcasted_iota(jnp.int32, yx.shape, 1)
        keep = col < relu_cols
        yx = jnp.where(keep, jnp.maximum(yx, 0.0), yx)
        yg = jnp.where(keep, jnp.maximum(yg, 0.0), yg)

    if store_act:
        # TODO(synk): present the activation store lane-dense (cout<128 means
        # masked vst); needs an in-kernel (tm,cout)->(tm*cout/128,128) reshape
        # whose Mosaic lowering is a relayout hazard — skipped to keep lowering
        # safe; HBM-side the (tm,cout) DMA block is already contiguous.
        ox_ref[...] = yx.astype(ox_ref.dtype)
        og_ref[...] = yg.astype(og_ref.dtype)

    if compute_huber:
        d = yx - yg
        ad = jnp.abs(d)
        h = jnp.where(ad <= 1.0, 0.5 * d * d, ad - 0.5)
        partial = jnp.sum(h)
        r = jax.lax.broadcasted_iota(jnp.int32, (8, 128), 0)
        c = jax.lax.broadcasted_iota(jnp.int32, (8, 128), 1)
        hub_ref[...] = jnp.where((r == 0) & (c == 0), partial, 0.0)


# --------------------------- wrappers (glue) ---------------------------------

def _round_up(x, m):
    return ((x + m - 1) // m) * m


def _choose_row_tile(mx):
    """Patch-matrix row tile: multiple of 16 (bf16 sublane packing), 128..1024
    rows, targeting >=8 grid steps at production sizes so both v7x TensorCores
    pipeline several tiles each.  Per-step VMEM stays ~1-3 MiB."""
    if mx <= 256:
        return _round_up(mx, 16)
    return max(128, min(1024, _round_up(mx // 8, 16)))


def _im2col(x, k, stride, pad):
    """x: (N, H, W, C) bf16 -> bf16 patches (N*Ho*Wo, k*k*C), order (kh,kw,cin).

    TODO(synk): at production image sizes, fuse im2col into the conv kernel
    (haloed NHWC BlockSpec + in-VMEM shifted views) to remove the k*k HBM read
    amplification of the materialized patch matrix.
    """
    if pad > 0:
        x = jnp.pad(x, ((0, 0), (pad, pad), (pad, pad), (0, 0)))
    n, hp, wp, c = x.shape
    ho = (hp - k) // stride + 1
    wo = (wp - k) // stride + 1
    cols = []
    for di in range(k):
        for dj in range(k):
            cols.append(
                x[:, di:di + stride * ho:stride, dj:dj + stride * wo:stride, :])
    patches = jnp.concatenate(cols, axis=-1)  # (N, Ho, Wo, k*k*C), bf16
    return patches.reshape(n * ho * wo, k * k * c), (n, ho, wo)


def dual_conv_bn(xa, ga, w, scale, shift, *, stride=1, relu_cols=None,
                 residual=None, compute_huber=False, store_act=True):
    """Conv + folded BN (+ residual) (+ ReLU) for the x-half and gt-half in a
    single pallas_call; optionally fuses this stage's Huber partial sum.

    xa/ga: (N, H, W, Cin) bf16.  residual: optional (res_x, res_g) NHWC bf16.
    Returns (out_x, out_g, huber_sum) — entries are None when not requested.
    """
    kh, kw, cin, cout = w.shape
    pad = (kh - 1) // 2
    px, (n, ho, wo) = _im2col(xa, kh, stride, pad)
    pg, _ = _im2col(ga, kh, stride, pad)
    mx, kdim = px.shape

    tm = _choose_row_tile(mx)
    grid = pl.cdiv(mx, tm)
    mx_pad = grid * tm

    def pad_rows(a):
        return a if mx_pad == mx else jnp.pad(a, ((0, mx_pad - mx), (0, 0)))

    px = pad_rows(px)
    pg = pad_rows(pg)

    # Fold BN scale into weight columns; bf16 MXU operands, fp32 accumulation.
    w2 = (w.reshape(kdim, cout).astype(jnp.float32)
          * scale.reshape(1, cout).astype(jnp.float32)).astype(jnp.bfloat16)
    shift2 = shift.reshape(1, cout).astype(jnp.float32)

    in_specs = [
        pl.BlockSpec((tm, kdim), lambda i: (i, 0)),
        pl.BlockSpec((tm, kdim), lambda i: (i, 0)),
        pl.BlockSpec((kdim, cout), lambda i: (0, 0)),
        pl.BlockSpec((1, cout), lambda i: (0, 0)),
    ]
    args = [px, pg, w2, shift2]

    has_residual = residual is not None
    if has_residual:
        rx, rg = residual
        args.append(pad_rows(rx.reshape(mx, cout).astype(jnp.bfloat16)))
        args.append(pad_rows(rg.reshape(mx, cout).astype(jnp.bfloat16)))
        in_specs += [pl.BlockSpec((tm, cout), lambda i: (i, 0))] * 2

    out_shapes, out_specs = [], []
    if store_act:
        out_shapes += [jax.ShapeDtypeStruct((mx_pad, cout), jnp.bfloat16)] * 2
        out_specs += [pl.BlockSpec((tm, cout), lambda i: (i, 0))] * 2
    if compute_huber:
        out_shapes.append(jax.ShapeDtypeStruct((grid * 8, 128), jnp.float32))
        out_specs.append(pl.BlockSpec((8, 128), lambda i: (i, 0)))

    kernel = functools.partial(
        _dual_conv_kernel, relu_cols=relu_cols, has_residual=has_residual,
        store_act=store_act, compute_huber=compute_huber)

    outs = pl.pallas_call(
        kernel,
        out_shape=tuple(out_shapes),
        grid_spec=pltpu.PrefetchScalarGridSpec(
            num_scalar_prefetch=0,
            grid=(grid,),
            in_specs=in_specs,
            out_specs=tuple(out_specs)),
        compiler_params=pltpu.CompilerParams(
            dimension_semantics=("parallel",),
            vmem_limit_bytes=32 * 1024 * 1024),
    )(*args)

    out_x = out_g = hub_sum = None
    i = 0
    if store_act:
        out_x = outs[0][:mx].reshape(n, ho, wo, cout)
        out_g = outs[1][:mx].reshape(n, ho, wo, cout)
        i = 2
    if compute_huber:
        # Padded rows give identical x/gt epilogues -> zero Huber contribution.
        hub_sum = jnp.sum(outs[i])
    return out_x, out_g, hub_sum


# ---------------------- deterministic "ResNet" params ------------------------

def _conv_block_params(key, kh, kw, cin, cout):
    kw_, kb = jax.random.split(key)
    fan_in = kh * kw * cin
    w = jax.random.normal(kw_, (kh, kw, cin, cout), jnp.float32) / math.sqrt(fan_in)
    # deterministic folded BatchNorm: gamma, beta, running_mean, running_var
    gamma = 1.0 + 0.05 * jax.random.normal(kb, (cout,), jnp.float32)
    beta = jnp.linspace(-0.05, 0.05, cout, dtype=jnp.float32)
    rmean = jnp.linspace(-0.02, 0.02, cout, dtype=jnp.float32)
    rvar = jnp.ones((cout,), jnp.float32)
    eps = 1e-5
    scale = gamma / jnp.sqrt(rvar + eps)
    shift = beta - rmean * scale
    return (w, scale, shift)


def init_resnet_params(key):
    keys = jax.random.split(key, 6)
    return {
        "stem": _conv_block_params(keys[0], 3, 3, 3, 16),     # conv1 + bn1
        "l1c1": _conv_block_params(keys[1], 3, 3, 16, 16),    # layer1 basic block
        "l1c2": _conv_block_params(keys[2], 3, 3, 16, 16),
        "l2c1": _conv_block_params(keys[3], 3, 3, 16, 32),    # layer2 block (stride 2)
        "l2c2": _conv_block_params(keys[4], 3, 3, 32, 32),
        "l2ds": _conv_block_params(keys[5], 1, 1, 16, 32),    # 1x1 downsample shortcut
    }


def _fuse_l2_downsample(params):
    """Fold the 1x1 stride-2 shortcut into l2c1: zero-pad it to a 3x3 center
    tap and concat on cout (32 -> 64); the stride-2 patch matrix is read once
    and the MXU sees one 64-wide matmul instead of two 32-wide ones."""
    w1, s1, b1 = params["l2c1"]
    wd, sd, bd = params["l2ds"]
    wd3 = jnp.zeros((3, 3) + wd.shape[2:], wd.dtype).at[1, 1].set(wd[0, 0])
    return (jnp.concatenate([w1, wd3], axis=-1),
            jnp.concatenate([s1, sd]),
            jnp.concatenate([b1, bd]))


def _preprocess(img_nchw, use_input_norm, range_norm):
    x = jnp.transpose(img_nchw, (0, 2, 3, 1)).astype(jnp.float32)  # NCHW->NHWC
    if range_norm:
        x = (x + 1.0) * 0.5
    if use_input_norm:
        x = (x - IMAGENET_MEAN) / IMAGENET_STD
    return x.astype(jnp.bfloat16)   # bf16 BEFORE im2col: halves patch traffic


# ------------------------------ loss (forward) --------------------------------

def resnet_perceptual_loss(x, gt, params, layer_weights, *, perceptual_weight=1.0,
                           use_input_norm=True, range_norm=False):
    """Forward of ResNetPerceptualLoss (criterion='huber', the module default).

    The x and gt halves run through the frozen extractor inside the SAME
    pallas_calls, and each stage's Huber partial sum is fused into its final
    conv's epilogue (layer2 features never touch HBM).
    """
    # TODO(synk): 'l1', 'l2' and 'fro' criteria not wired; 'huber' only.
    if perceptual_weight <= 0:
        return jnp.float32(0.0)

    xa = _preprocess(x, use_input_norm, range_norm)
    ga = _preprocess(jax.lax.stop_gradient(gt), use_input_norm, range_norm)

    losses = {}

    # stem (feats['conv1']): conv + bn + relu, Huber fused into the epilogue.
    c1x, c1g, hub = dual_conv_bn(xa, ga, *params["stem"], stride=1,
                                 compute_huber=True)
    losses["conv1"] = hub / jnp.float32(c1x.size)

    # layer1: basic residual block 16 -> 16, Huber fused into its last conv.
    a1x, a1g, _ = dual_conv_bn(c1x, c1g, *params["l1c1"], stride=1)
    y1x, y1g, hub = dual_conv_bn(a1x, a1g, *params["l1c2"], stride=1,
                                 residual=(c1x, c1g), compute_huber=True)
    losses["layer1"] = hub / jnp.float32(y1x.size)

    # layer2: basic block 16 -> 32, stride 2, 1x1 shortcut fused into l2c1.
    wf, sf, bf = _fuse_l2_downsample(params)
    fx, fg, _ = dual_conv_bn(y1x, y1g, wf, sf, bf, stride=2, relu_cols=32)
    zx, ix = fx[..., :32], fx[..., 32:]
    zg, ig = fg[..., :32], fg[..., 32:]
    # layer2 feature maps are only consumed by the loss: skip their HBM store.
    _, _, hub = dual_conv_bn(zx, zg, *params["l2c2"], stride=1,
                             residual=(ix, ig), compute_huber=True,
                             store_act=False)
    losses["layer2"] = hub / jnp.float32(zx.size)

    percep = jnp.float32(0.0)
    for k, v in losses.items():
        percep = percep + v * jnp.float32(layer_weights[k])
    return percep * jnp.float32(perceptual_weight)


# -------------------------- fp32 XLA reference --------------------------------

def _conv_bn_ref(t, p, stride=1):
    w, scale, shift = p
    pad = (w.shape[0] - 1) // 2
    y = jax.lax.conv_general_dilated(
        t, w, window_strides=(stride, stride),
        padding=[(pad, pad), (pad, pad)],
        dimension_numbers=("NHWC", "HWIO", "NHWC"))
    return y * scale + shift


def _features_ref(img, params, use_input_norm=True, range_norm=False):
    z = jnp.transpose(img, (0, 2, 3, 1)).astype(jnp.float32)
    if range_norm:
        z = (z + 1.0) * 0.5
    if use_input_norm:
        z = (z - IMAGENET_MEAN) / IMAGENET_STD
    c1 = jax.nn.relu(_conv_bn_ref(z, params["stem"]))
    a = jax.nn.relu(_conv_bn_ref(c1, params["l1c1"]))
    l1 = jax.nn.relu(_conv_bn_ref(a, params["l1c2"]) + c1)
    zz = jax.nn.relu(_conv_bn_ref(l1, params["l2c1"], stride=2))
    idt = _conv_bn_ref(l1, params["l2ds"], stride=2)
    l2 = jax.nn.relu(_conv_bn_ref(zz, params["l2c2"]) + idt)
    return {"conv1": c1, "layer1": l1, "layer2": l2}


def _huber_mean_ref(a, b):
    d = a - b
    ad = jnp.abs(d)
    return jnp.mean(jnp.where(ad <= 1.0, 0.5 * d * d, ad - 0.5))


def resnet_perceptual_loss_ref(x, gt, params, layer_weights, *, perceptual_weight=1.0):
    fx = _features_ref(x, params)
    fg = _features_ref(jax.lax.stop_gradient(gt), params)
    loss = jnp.float32(0.0)
    for k in fx:
        loss = loss + _huber_mean_ref(fx[k], fg[k]) * jnp.float32(layer_weights[k])
    return loss * jnp.float32(perceptual_weight)


# --------------------------------- main ---------------------------------------

if __name__ == "__main__":
    key = jax.random.PRNGKey(0)
    kx, kg, kp = jax.random.split(key, 3)

    # Input: (n, c, h, w) = (2, 3, 16, 16), images in [0, 1]
    x = jax.random.uniform(kx, (2, 3, 16, 16), jnp.float32)
    gt = jax.random.uniform(kg, (2, 3, 16, 16), jnp.float32)

    params = init_resnet_params(kp)
    layer_weights = {"conv1": 0.1, "layer1": 1.0, "layer2": 1.0}

    loss_fn = jax.jit(functools.partial(
        resnet_perceptual_loss, layer_weights=layer_weights,
        perceptual_weight=1.0))
    loss = loss_fn(x, gt, params)
    jax.block_until_ready(loss)
    assert loss.shape == () and bool(jnp.isfinite(loss))

    # fp32 XLA reference: the bf16 MXU operands / bf16 activations are an
    # intentional precision tradeoff; tolerance-check the scalar loss.
    ref = resnet_perceptual_loss_ref(x, gt, params,
                                     layer_weights=layer_weights,
                                     perceptual_weight=1.0)
    rel = abs(float(loss) - float(ref)) / max(abs(float(ref)), 1e-6)
    assert rel < 0.1, f"pallas loss {float(loss)} vs ref {float(ref)}; rel={rel}"

    print("KERNEL_OK")
</pallas_src>

<mosaic_0001>
module attributes {stable_mosaic.version = 11 : i64} {
  func.func @_dual_conv_kernel(%arg0: i32, %arg1: memref<128x27xbf16, #tpu.memory_space<vmem>>, %arg2: memref<128x27xbf16, #tpu.memory_space<vmem>>, %arg3: memref<27x16xbf16, #tpu.memory_space<vmem>>, %arg4: memref<1x16xf32, #tpu.memory_space<vmem>>, %arg5: memref<128x16xbf16, #tpu.memory_space<vmem>>, %arg6: memref<128x16xbf16, #tpu.memory_space<vmem>>, %arg7: memref<8x128xf32, #tpu.memory_space<vmem>>) attributes {dimension_semantics = [#tpu.dimension_semantics<parallel>], iteration_bounds = array<i64: 4>, scalar_prefetch = 0 : i64, scratch_operands = 0 : i64, tpu.core_type = #tpu.core_type<tc>, window_params = [{transform_indices = @transform_0, window_bounds = array<i64: 128, 27>}, {transform_indices = @transform_1, window_bounds = array<i64: 128, 27>}, {pipeline_mode = #tpu.pipeline_mode<synchronous>, transform_indices = @transform_2, window_bounds = array<i64: 27, 16>}, {pipeline_mode = #tpu.pipeline_mode<synchronous>, transform_indices = @transform_3, window_bounds = array<i64: 1, 16>}, {transform_indices = @transform_4, window_bounds = array<i64: 128, 16>}, {transform_indices = @transform_5, window_bounds = array<i64: 128, 16>}, {transform_indices = @transform_6, window_bounds = array<i64: 8, 128>}]} {
    %c0 = arith.constant 0 : index
    %c0_0 = arith.constant 0 : index
    %0 = vector.load %arg3[%c0, %c0_0] : memref<27x16xbf16, #tpu.memory_space<vmem>>, vector<27x16xbf16>
    %c0_1 = arith.constant 0 : index
    %c0_2 = arith.constant 0 : index
    %1 = vector.load %arg4[%c0_1, %c0_2] : memref<1x16xf32, #tpu.memory_space<vmem>>, vector<1x16xf32>
    %c0_3 = arith.constant 0 : index
    %c0_4 = arith.constant 0 : index
    %2 = vector.load %arg1[%c0_3, %c0_4] : memref<128x27xbf16, #tpu.memory_space<vmem>>, vector<128x27xbf16>
    %cst = arith.constant dense<0.000000e+00> : vector<128x16xf32>
    %3 = tpu.matmul %2, %0, %cst {dimension_numbers = #tpu.dot_dimension_numbers<[1], [0], [0], [1], [0, 0, 1, 1], [], []>} : vector<128x27xbf16>, vector<27x16xbf16>, vector<128x16xf32> -> vector<128x16xf32>
    %4 = vector.broadcast %1 : vector<1x16xf32> to vector<128x16xf32>
    %5 = arith.addf %3, %4 : vector<128x16xf32>
    %c0_5 = arith.constant 0 : index
    %c0_6 = arith.constant 0 : index
    %6 = vector.load %arg2[%c0_5, %c0_6] : memref<128x27xbf16, #tpu.memory_space<vmem>>, vector<128x27xbf16>
    %cst_7 = arith.constant dense<0.000000e+00> : vector<128x16xf32>
    %7 = tpu.matmul %6, %0, %cst_7 {dimension_numbers = #tpu.dot_dimension_numbers<[1], [0], [0], [1], [0, 0, 1, 1], [], []>} : vector<128x27xbf16>, vector<27x16xbf16>, vector<128x16xf32> -> vector<128x16xf32>
    %8 = vector.broadcast %1 : vector<1x16xf32> to vector<128x16xf32>
    %9 = arith.addf %7, %8 : vector<128x16xf32>
    %cst_8 = arith.constant 0.000000e+00 : f32
    %10 = vector.broadcast %cst_8 : f32 to vector<128x16xf32>
    %11 = arith.maximumf %5, %10 : vector<128x16xf32>
    %cst_9 = arith.constant 0.000000e+00 : f32
    %12 = vector.broadcast %cst_9 : f32 to vector<128x16xf32>
    %13 = arith.maximumf %9, %12 : vector<128x16xf32>
    %14 = arith.truncf %11 : vector<128x16xf32> to vector<128x16xbf16>
    %c0_10 = arith.constant 0 : index
    %c0_11 = arith.constant 0 : index
    %15 = vector.load %arg5[%c0_10, %c0_11] : memref<128x16xbf16, #tpu.memory_space<vmem>>, vector<128x16xbf16>
    tpu.vector_store %arg5[%c0_10, %c0_11], %14 {strides = array<i32>} : memref<128x16xbf16, #tpu.memory_space<vmem>>, vector<128x16xbf16>,
    %16 = arith.truncf %13 : vector<128x16xf32> to vector<128x16xbf16>
    %c0_12 = arith.constant 0 : index
    %c0_13 = arith.constant 0 : index
    %17 = vector.load %arg6[%c0_12, %c0_13] : memref<128x16xbf16, #tpu.memory_space<vmem>>, vector<128x16xbf16>
    tpu.vector_store %arg6[%c0_12, %c0_13], %16 {strides = array<i32>} : memref<128x16xbf16, #tpu.memory_space<vmem>>, vector<128x16xbf16>,
    %18 = arith.subf %11, %13 : vector<128x16xf32>
    %19 = math.absf %18 : vector<128x16xf32>
    %cst_14 = arith.constant 1.000000e+00 : f32
    %20 = vector.broadcast %cst_14 : f32 to vector<128x16xf32>
    %21 = arith.cmpf ole, %19, %20 : vector<128x16xf32>
    %cst_15 = arith.constant 5.000000e-01 : f32
    %22 = vector.broadcast %cst_15 : f32 to vector<128x16xf32>
    %23 = arith.mulf %22, %18 : vector<128x16xf32>
    %24 = arith.mulf %23, %18 : vector<128x16xf32>
    %cst_16 = arith.constant 5.000000e-01 : f32
    %25 = vector.broadcast %cst_16 : f32 to vector<128x16xf32>
    %26 = arith.subf %19, %25 : vector<128x16xf32>
    %27 = arith.select %21, %24, %26 : vector<128x16xi1>, vector<128x16xf32>
    %28 = vector.shape_cast %27 : vector<128x16xf32> to vector<1x128x16xf32>
    %cst_17 = arith.constant dense<0.000000e+00> : vector<1xf32>
    %29 = vector.multi_reduction <add>, %28, %cst_17 [1, 2] : vector<1x128x16xf32> to vector<1xf32>
    %30 = vector.shape_cast %29 : vector<1xf32> to vector<1x1x1xf32>
    %31 = vector.extract %30[0, 0, 0] : f32 from vector<1x1x1xf32>
    %32 = tpu.iota {dimensions = array<i32: 0>} : vector<8x128xi32>
    %33 = tpu.iota {dimensions = array<i32: 1>} : vector<8x128xi32>
    %c0_i32 = arith.constant 0 : i32
    %34 = vector.broadcast %c0_i32 : i32 to vector<8x128xi32>
    %35 = arith.cmpi eq, %32, %34 : vector<8x128xi32>
    %c0_i32_18 = arith.constant 0 : i32
    %36 = vector.broadcast %c0_i32_18 : i32 to vector<8x128xi32>
    %37 = arith.cmpi eq, %33, %36 : vector<8x128xi32>
    %38 = arith.andi %35, %37 : vector<8x128xi1>
    %cst_19 = arith.constant 0.000000e+00 : f32
    %39 = vector.broadcast %31 : f32 to vector<8x128xf32>
    %40 = vector.broadcast %cst_19 : f32 to vector<8x128xf32>
    %41 = arith.select %38, %39, %40 : vector<8x128xi1>, vector<8x128xf32>
    %c0_20 = arith.constant 0 : index
    %c0_21 = arith.constant 0 : index
    %42 = vector.load %arg7[%c0_20, %c0_21] : memref<8x128xf32, #tpu.memory_space<vmem>>, vector<8x128xf32>
    tpu.vector_store %arg7[%c0_20, %c0_21], %41 {strides = array<i32>} : memref<8x128xf32, #tpu.memory_space<vmem>>, vector<8x128xf32>,
    return
  }
  func.func @transform_0(%arg0: i32) -> (i32, i32) {
    %c0_i32 = arith.constant 0 : i32
    %c0_i32_0 = arith.constant 0 : i32
    return %arg0, %c0_i32 : i32, i32
  }
  func.func @transform_1(%arg0: i32) -> (i32, i32) {
    %c0_i32 = arith.constant 0 : i32
    %c0_i32_0 = arith.constant 0 : i32
    return %arg0, %c0_i32 : i32, i32
  }
  func.func @transform_2(%arg0: i32) -> (i32, i32) {
    %c0_i32 = arith.constant 0 : i32
    %c0_i32_0 = arith.constant 0 : i32
    %c0_i32_1 = arith.constant 0 : i32
    return %c0_i32, %c0_i32_0 : i32, i32
  }
  func.func @transform_3(%arg0: i32) -> (i32, i32) {
    %c0_i32 = arith.constant 0 : i32
    %c0_i32_0 = arith.constant 0 : i32
    %c0_i32_1 = arith.constant 0 : i32
    return %c0_i32, %c0_i32_0 : i32, i32
  }
  func.func @transform_4(%arg0: i32) -> (i32, i32) {
    %c0_i32 = arith.constant 0 : i32
    %c0_i32_0 = arith.constant 0 : i32
    return %arg0, %c0_i32 : i32, i32
  }
  func.func @transform_5(%arg0: i32) -> (i32, i32) {
    %c0_i32 = arith.constant 0 : i32
    %c0_i32_0 = arith.constant 0 : i32
    return %arg0, %c0_i32 : i32, i32
  }
  func.func @transform_6(%arg0: i32) -> (i32, i32) {
    %c0_i32 = arith.constant 0 : i32
    %c0_i32_0 = arith.constant 0 : i32
    return %arg0, %c0_i32 : i32, i32
  }
}

module attributes {stable_mosaic.version = 11 : i64} {
  func.func @_dual_conv_kernel(%arg0: i32, %arg1: memref<128x144xbf16, #tpu.memory_space<vmem>>, %arg2: memref<128x144xbf16, #tpu.memory_space<vmem>>, %arg3: memref<144x16xbf16, #tpu.memory_space<vmem>>, %arg4: memref<1x16xf32, #tpu.memory_space<vmem>>, %arg5: memref<128x16xbf16, #tpu.memory_space<vmem>>, %arg6: memref<128x16xbf16, #tpu.memory_space<vmem>>) attributes {dimension_semantics = [#tpu.dimension_semantics<parallel>], iteration_bounds = array<i64: 4>, scalar_prefetch = 0 : i64, scratch_operands = 0 : i64, tpu.core_type = #tpu.core_type<tc>, window_params = [{transform_indices = @transform_0, window_bounds = array<i64: 128, 144>}, {transform_indices = @transform_1, window_bounds = array<i64: 128, 144>}, {pipeline_mode = #tpu.pipeline_mode<synchronous>, transform_indices = @transform_2, window_bounds = array<i64: 144, 16>}, {pipeline_mode = #tpu.pipeline_mode<synchronous>, transform_indices = @transform_3, window_bounds = array<i64: 1, 16>}, {transform_indices = @transform_4, window_bounds = array<i64: 128, 16>}, {transform_indices = @transform_5, window_bounds = array<i64: 128, 16>}]} {
    %c0 = arith.constant 0 : index
    %c0_0 = arith.constant 0 : index
    %0 = vector.load %arg3[%c0, %c0_0] : memref<144x16xbf16, #tpu.memory_space<vmem>>, vector<144x16xbf16>
    %c0_1 = arith.constant 0 : index
    %c0_2 = arith.constant 0 : index
    %1 = vector.load %arg4[%c0_1, %c0_2] : memref<1x16xf32, #tpu.memory_space<vmem>>, vector<1x16xf32>
    %c0_3 = arith.constant 0 : index
    %c0_4 = arith.constant 0 : index
    %2 = vector.load %arg1[%c0_3, %c0_4] : memref<128x144xbf16, #tpu.memory_space<vmem>>, vector<128x144xbf16>
    %cst = arith.constant dense<0.000000e+00> : vector<128x16xf32>
    %3 = tpu.matmul %2, %0, %cst {dimension_numbers = #tpu.dot_dimension_numbers<[1], [0], [0], [1], [0, 0, 1, 1], [], []>} : vector<128x144xbf16>, vector<144x16xbf16>, vector<128x16xf32> -> vector<128x16xf32>
    %4 = vector.broadcast %1 : vector<1x16xf32> to vector<128x16xf32>
    %5 = arith.addf %3, %4 : vector<128x16xf32>
    %c0_5 = arith.constant 0 : index
    %c0_6 = arith.constant 0 : index
    %6 = vector.load %arg2[%c0_5, %c0_6] : memref<128x144xbf16, #tpu.memory_space<vmem>>, vector<128x144xbf16>
    %cst_7 = arith.constant dense<0.000000e+00> : vector<128x16xf32>
    %7 = tpu.matmul %6, %0, %cst_7 {dimension_numbers = #tpu.dot_dimension_numbers<[1], [0], [0], [1], [0, 0, 1, 1], [], []>} : vector<128x144xbf16>, vector<144x16xbf16>, vector<128x16xf32> -> vector<128x16xf32>
    %8 = vector.broadcast %1 : vector<1x16xf32> to vector<128x16xf32>
    %9 = arith.addf %7, %8 : vector<128x16xf32>
    %cst_8 = arith.constant 0.000000e+00 : f32
    %10 = vector.broadcast %cst_8 : f32 to vector<128x16xf32>
    %11 = arith.maximumf %5, %10 : vector<128x16xf32>
    %cst_9 = arith.constant 0.000000e+00 : f32
    %12 = vector.broadcast %cst_9 : f32 to vector<128x16xf32>
    %13 = arith.maximumf %9, %12 : vector<128x16xf32>
    %14 = arith.truncf %11 : vector<128x16xf32> to vector<128x16xbf16>
    %c0_10 = arith.constant 0 : index
    %c0_11 = arith.constant 0 : index
    %15 = vector.load %arg5[%c0_10, %c0_11] : memref<128x16xbf16, #tpu.memory_space<vmem>>, vector<128x16xbf16>
    tpu.vector_store %arg5[%c0_10, %c0_11], %14 {strides = array<i32>} : memref<128x16xbf16, #tpu.memory_space<vmem>>, vector<128x16xbf16>,
    %16 = arith.truncf %13 : vector<128x16xf32> to vector<128x16xbf16>
    %c0_12 = arith.constant 0 : index
    %c0_13 = arith.constant 0 : index
    %17 = vector.load %arg6[%c0_12, %c0_13] : memref<128x16xbf16, #tpu.memory_space<vmem>>, vector<128x16xbf16>
    tpu.vector_store %arg6[%c0_12, %c0_13], %16 {strides = array<i32>} : memref<128x16xbf16, #tpu.memory_space<vmem>>, vector<128x16xbf16>,
    return
  }
  func.func @transform_0(%arg0: i32) -> (i32, i32) {
    %c0_i32 = arith.constant 0 : i32
    %c0_i32_0 = arith.constant 0 : i32
    return %arg0, %c0_i32 : i32, i32
  }
  func.func @transform_1(%arg0: i32) -> (i32, i32) {
    %c0_i32 = arith.constant 0 : i32
    %c0_i32_0 = arith.constant 0 : i32
    return %arg0, %c0_i32 : i32, i32
  }
  func.func @transform_2(%arg0: i32) -> (i32, i32) {
    %c0_i32 = arith.constant 0 : i32
    %c0_i32_0 = arith.constant 0 : i32
    %c0_i32_1 = arith.constant 0 : i32
    return %c0_i32, %c0_i32_0 : i32, i32
  }
  func.func @transform_3(%arg0: i32) -> (i32, i32) {
    %c0_i32 = arith.constant 0 : i32
    %c0_i32_0 = arith.constant 0 : i32
    %c0_i32_1 = arith.constant 0 : i32
    return %c0_i32, %c0_i32_0 : i32, i32
  }
  func.func @transform_4(%arg0: i32) -> (i32, i32) {
    %c0_i32 = arith.constant 0 : i32
    %c0_i32_0 = arith.constant 0 : i32
    return %arg0, %c0_i32 : i32, i32
  }
  func.func @transform_5(%arg0: i32) -> (i32, i32) {
    %c0_i32 = arith.constant 0 : i32
    %c0_i32_0 = arith.constant 0 : i32
    return %arg0, %c0_i32 : i32, i32
  }
}

module attributes {stable_mosaic.version = 11 : i64} {
  func.func @_dual_conv_kernel(%arg0: i32, %arg1: memref<128x144xbf16, #tpu.memory_space<vmem>>, %arg2: memref<128x144xbf16, #tpu.memory_space<vmem>>, %arg3: memref<144x16xbf16, #tpu.memory_space<vmem>>, %arg4: memref<1x16xf32, #tpu.memory_space<vmem>>, %arg5: memref<128x16xbf16, #tpu.memory_space<vmem>>, %arg6: memref<128x16xbf16, #tpu.memory_space<vmem>>, %arg7: memref<128x16xbf16, #tpu.memory_space<vmem>>, %arg8: memref<128x16xbf16, #tpu.memory_space<vmem>>, %arg9: memref<8x128xf32, #tpu.memory_space<vmem>>) attributes {dimension_semantics = [#tpu.dimension_semantics<parallel>], iteration_bounds = array<i64: 4>, scalar_prefetch = 0 : i64, scratch_operands = 0 : i64, tpu.core_type = #tpu.core_type<tc>, window_params = [{transform_indices = @transform_0, window_bounds = array<i64: 128, 144>}, {transform_indices = @transform_1, window_bounds = array<i64: 128, 144>}, {pipeline_mode = #tpu.pipeline_mode<synchronous>, transform_indices = @transform_2, window_bounds = array<i64: 144, 16>}, {pipeline_mode = #tpu.pipeline_mode<synchronous>, transform_indices = @transform_3, window_bounds = array<i64: 1, 16>}, {transform_indices = @transform_4, window_bounds = array<i64: 128, 16>}, {transform_indices = @transform_5, window_bounds = array<i64: 128, 16>}, {transform_indices = @transform_6, window_bounds = array<i64: 128, 16>}, {transform_indices = @transform_7, window_bounds = array<i64: 128, 16>}, {transform_indices = @transform_8, window_bounds = array<i64: 8, 128>}]} {
    %c0 = arith.constant 0 : index
    %c0_0 = arith.constant 0 : index
    %0 = vector.load %arg3[%c0, %c0_0] : memref<144x16xbf16, #tpu.memory_space<vmem>>, vector<144x16xbf16>
    %c0_1 = arith.constant 0 : index
    %c0_2 = arith.constant 0 : index
    %1 = vector.load %arg4[%c0_1, %c0_2] : memref<1x16xf32, #tpu.memory_space<vmem>>, vector<1x16xf32>
    %c0_3 = arith.constant 0 : index
    %c0_4 = arith.constant 0 : index
    %2 = vector.load %arg1[%c0_3, %c0_4] : memref<128x144xbf16, #tpu.memory_space<vmem>>, vector<128x144xbf16>
    %cst = arith.constant dense<0.000000e+00> : vector<128x16xf32>
    %3 = tpu.matmul %2, %0, %cst {dimension_numbers = #tpu.dot_dimension_numbers<[1], [0], [0], [1], [0, 0, 1, 1], [], []>} : vector<128x144xbf16>, vector<144x16xbf16>, vector<128x16xf32> -> vector<128x16xf32>
    %4 = vector.broadcast %1 : vector<1x16xf32> to vector<128x16xf32>
    %5 = arith.addf %3, %4 : vector<128x16xf32>
    %c0_5 = arith.constant 0 : index
    %c0_6 = arith.constant 0 : index
    %6 = vector.load %arg2[%c0_5, %c0_6] : memref<128x144xbf16, #tpu.memory_space<vmem>>, vector<128x144xbf16>
    %cst_7 = arith.constant dense<0.000000e+00> : vector<128x16xf32>
    %7 = tpu.matmul %6, %0, %cst_7 {dimension_numbers = #tpu.dot_dimension_numbers<[1], [0], [0], [1], [0, 0, 1, 1], [], []>} : vector<128x144xbf16>, vector<144x16xbf16>, vector<128x16xf32> -> vector<128x16xf32>
    %8 = vector.broadcast %1 : vector<1x16xf32> to vector<128x16xf32>
    %9 = arith.addf %7, %8 : vector<128x16xf32>
    %c0_8 = arith.constant 0 : index
    %c0_9 = arith.constant 0 : index
    %10 = vector.load %arg5[%c0_8, %c0_9] : memref<128x16xbf16, #tpu.memory_space<vmem>>, vector<128x16xbf16>
    %11 = arith.extf %10 : vector<128x16xbf16> to vector<128x16xf32>
    %12 = arith.addf %5, %11 : vector<128x16xf32>
    %c0_10 = arith.constant 0 : index
    %c0_11 = arith.constant 0 : index
    %13 = vector.load %arg6[%c0_10, %c0_11] : memref<128x16xbf16, #tpu.memory_space<vmem>>, vector<128x16xbf16>
    %14 = arith.extf %13 : vector<128x16xbf16> to vector<128x16xf32>
    %15 = arith.addf %9, %14 : vector<128x16xf32>
    %cst_12 = arith.constant 0.000000e+00 : f32
    %16 = vector.broadcast %cst_12 : f32 to vector<128x16xf32>
    %17 = arith.maximumf %12, %16 : vector<128x16xf32>
    %cst_13 = arith.constant 0.000000e+00 : f32
    %18 = vector.broadcast %cst_13 : f32 to vector<128x16xf32>
    %19 = arith.maximumf %15, %18 : vector<128x16xf32>
    %20 = arith.truncf %17 : vector<128x16xf32> to vector<128x16xbf16>
    %c0_14 = arith.constant 0 : index
    %c0_15 = arith.constant 0 : index
    %21 = vector.load %arg7[%c0_14, %c0_15] : memref<128x16xbf16, #tpu.memory_space<vmem>>, vector<128x16xbf16>
    tpu.vector_store %arg7[%c0_14, %c0_15], %20 {strides = array<i32>} : memref<128x16xbf16, #tpu.memory_space<vmem>>, vector<128x16xbf16>,
    %22 = arith.truncf %19 : vector<128x16xf32> to vector<128x16xbf16>
    %c0_16 = arith.constant 0 : index
    %c0_17 = arith.constant 0 : index
    %23 = vector.load %arg8[%c0_16, %c0_17] : memref<128x16xbf16, #tpu.memory_space<vmem>>, vector<128x16xbf16>
    tpu.vector_store %arg8[%c0_16, %c0_17], %22 {strides = array<i32>} : memref<128x16xbf16, #tpu.memory_space<vmem>>, vector<128x16xbf16>,
    %24 = arith.subf %17, %19 : vector<128x16xf32>
    %25 = math.absf %24 : vector<128x16xf32>
    %cst_18 = arith.constant 1.000000e+00 : f32
    %26 = vector.broadcast %cst_18 : f32 to vector<128x16xf32>
    %27 = arith.cmpf ole, %25, %26 : vector<128x16xf32>
    %cst_19 = arith.constant 5.000000e-01 : f32
    %28 = vector.broadcast %cst_19 : f32 to vector<128x16xf32>
    %29 = arith.mulf %28, %24 : vector<128x16xf32>
    %30 = arith.mulf %29, %24 : vector<128x16xf32>
    %cst_20 = arith.constant 5.000000e-01 : f32
    %31 = vector.broadcast %cst_20 : f32 to vector<128x16xf32>
    %32 = arith.subf %25, %31 : vector<128x16xf32>
    %33 = arith.select %27, %30, %32 : vector<128x16xi1>, vector<128x16xf32>
    %34 = vector.shape_cast %33 : vector<128x16xf32> to vector<1x128x16xf32>
    %cst_21 = arith.constant dense<0.000000e+00> : vector<1xf32>
    %35 = vector.multi_reduction <add>, %34, %cst_21 [1, 2] : vector<1x128x16xf32> to vector<1xf32>
    %36 = vector.shape_cast %35 : vector<1xf32> to vector<1x1x1xf32>
    %37 = vector.extract %36[0, 0, 0] : f32 from vector<1x1x1xf32>
    %38 = tpu.iota {dimensions = array<i32: 0>} : vector<8x128xi32>
    %39 = tpu.iota {dimensions = array<i32: 1>} : vector<8x128xi32>
    %c0_i32 = arith.constant 0 : i32
    %40 = vector.broadcast %c0_i32 : i32 to vector<8x128xi32>
    %41 = arith.cmpi eq, %38, %40 : vector<8x128xi32>
    %c0_i32_22 = arith.constant 0 : i32
    %42 = vector.broadcast %c0_i32_22 : i32 to vector<8x128xi32>
    %43 = arith.cmpi eq, %39, %42 : vector<8x128xi32>
    %44 = arith.andi %41, %43 : vector<8x128xi1>
    %cst_23 = arith.constant 0.000000e+00 : f32
    %45 = vector.broadcast %37 : f32 to vector<8x128xf32>
    %46 = vector.broadcast %cst_23 : f32 to vector<8x128xf32>
    %47 = arith.select %44, %45, %46 : vector<8x128xi1>, vector<8x128xf32>
    %c0_24 = arith.constant 0 : index
    %c0_25 = arith.constant 0 : index
    %48 = vector.load %arg9[%c0_24, %c0_25] : memref<8x128xf32, #tpu.memory_space<vmem>>, vector<8x128xf32>
    tpu.vector_store %arg9[%c0_24, %c0_25], %47 {strides = array<i32>} : memref<8x128xf32, #tpu.memory_space<vmem>>, vector<8x128xf32>,
    return
  }
  func.func @transform_0(%arg0: i32) -> (i32, i32) {
    %c0_i32 = arith.constant 0 : i32
    %c0_i32_0 = arith.constant 0 : i32
    return %arg0, %c0_i32 : i32, i32
  }
  func.func @transform_1(%arg0: i32) -> (i32, i32) {
    %c0_i32 = arith.constant 0 : i32
    %c0_i32_0 = arith.constant 0 : i32
    return %arg0, %c0_i32 : i32, i32
  }
  func.func @transform_2(%arg0: i32) -> (i32, i32) {
    %c0_i32 = arith.constant 0 : i32
    %c0_i32_0 = arith.constant 0 : i32
    %c0_i32_1 = arith.constant 0 : i32
    return %c0_i32, %c0_i32_0 : i32, i32
  }
  func.func @transform_3(%arg0: i32) -> (i32, i32) {
    %c0_i32 = arith.constant 0 : i32
    %c0_i32_0 = arith.constant 0 : i32
    %c0_i32_1 = arith.constant 0 : i32
    return %c0_i32, %c0_i32_0 : i32, i32
  }
  func.func @transform_4(%arg0: i32) -> (i32, i32) {
    %c0_i32 = arith.constant 0 : i32
    %c0_i32_0 = arith.constant 0 : i32
    return %arg0, %c0_i32 : i32, i32
  }
  func.func @transform_5(%arg0: i32) -> (i32, i32) {
    %c0_i32 = arith.constant 0 : i32
    %c0_i32_0 = arith.constant 0 : i32
    return %arg0, %c0_i32 : i32, i32
  }
  func.func @transform_6(%arg0: i32) -> (i32, i32) {
    %c0_i32 = arith.constant 0 : i32
    %c0_i32_0 = arith.constant 0 : i32
    return %arg0, %c0_i32 : i32, i32
  }
  func.func @transform_7(%arg0: i32) -> (i32, i32) {
    %c0_i32 = arith.constant 0 : i32
    %c0_i32_0 = arith.constant 0 : i32
    return %arg0, %c0_i32 : i32, i32
  }
  func.func @transform_8(%arg0: i32) -> (i32, i32) {
    %c0_i32 = arith.constant 0 : i32
    %c0_i32_0 = arith.constant 0 : i32
    return %arg0, %c0_i32 : i32, i32
  }
}

module attributes {stable_mosaic.version = 11 : i64} {
  func.func @_dual_conv_kernel(%arg0: i32, %arg1: memref<128x144xbf16, #tpu.memory_space<vmem>>, %arg2: memref<128x144xbf16, #tpu.memory_space<vmem>>, %arg3: memref<144x64xbf16, #tpu.memory_space<vmem>>, %arg4: memref<1x64xf32, #tpu.memory_space<vmem>>, %arg5: memref<128x64xbf16, #tpu.memory_space<vmem>>, %arg6: memref<128x64xbf16, #tpu.memory_space<vmem>>) attributes {dimension_semantics = [#tpu.dimension_semantics<parallel>], iteration_bounds = array<i64: 1>, scalar_prefetch = 0 : i64, scratch_operands = 0 : i64, tpu.core_type = #tpu.core_type<tc>, window_params = [{transform_indices = @transform_0, window_bounds = array<i64: 128, 144>}, {transform_indices = @transform_1, window_bounds = array<i64: 128, 144>}, {pipeline_mode = #tpu.pipeline_mode<synchronous>, transform_indices = @transform_2, window_bounds = array<i64: 144, 64>}, {pipeline_mode = #tpu.pipeline_mode<synchronous>, transform_indices = @transform_3, window_bounds = array<i64: 1, 64>}, {transform_indices = @transform_4, window_bounds = array<i64: 128, 64>}, {transform_indices = @transform_5, window_bounds = array<i64: 128, 64>}]} {
    %c0 = arith.constant 0 : index
    %c0_0 = arith.constant 0 : index
    %0 = vector.load %arg3[%c0, %c0_0] : memref<144x64xbf16, #tpu.memory_space<vmem>>, vector<144x64xbf16>
    %c0_1 = arith.constant 0 : index
    %c0_2 = arith.constant 0 : index
    %1 = vector.load %arg4[%c0_1, %c0_2] : memref<1x64xf32, #tpu.memory_space<vmem>>, vector<1x64xf32>
    %c0_3 = arith.constant 0 : index
    %c0_4 = arith.constant 0 : index
    %2 = vector.load %arg1[%c0_3, %c0_4] : memref<128x144xbf16, #tpu.memory_space<vmem>>, vector<128x144xbf16>
    %cst = arith.constant dense<0.000000e+00> : vector<128x64xf32>
    %3 = tpu.matmul %2, %0, %cst {dimension_numbers = #tpu.dot_dimension_numbers<[1], [0], [0], [1], [0, 0, 1, 1], [], []>} : vector<128x144xbf16>, vector<144x64xbf16>, vector<128x64xf32> -> vector<128x64xf32>
    %4 = vector.broadcast %1 : vector<1x64xf32> to vector<128x64xf32>
    %5 = arith.addf %3, %4 : vector<128x64xf32>
    %c0_5 = arith.constant 0 : index
    %c0_6 = arith.constant 0 : index
    %6 = vector.load %arg2[%c0_5, %c0_6] : memref<128x144xbf16, #tpu.memory_space<vmem>>, vector<128x144xbf16>
    %cst_7 = arith.constant dense<0.000000e+00> : vector<128x64xf32>
    %7 = tpu.matmul %6, %0, %cst_7 {dimension_numbers = #tpu.dot_dimension_numbers<[1], [0], [0], [1], [0, 0, 1, 1], [], []>} : vector<128x144xbf16>, vector<144x64xbf16>, vector<128x64xf32> -> vector<128x64xf32>
    %8 = vector.broadcast %1 : vector<1x64xf32> to vector<128x64xf32>
    %9 = arith.addf %7, %8 : vector<128x64xf32>
    %10 = tpu.iota {dimensions = array<i32: 1>} : vector<128x64xi32>
    %c32_i32 = arith.constant 32 : i32
    %11 = vector.broadcast %c32_i32 : i32 to vector<128x64xi32>
    %12 = arith.cmpi slt, %10, %11 : vector<128x64xi32>
    %cst_8 = arith.constant 0.000000e+00 : f32
    %13 = vector.broadcast %cst_8 : f32 to vector<128x64xf32>
    %14 = arith.maximumf %5, %13 : vector<128x64xf32>
    %15 = arith.select %12, %14, %5 : vector<128x64xi1>, vector<128x64xf32>
    %cst_9 = arith.constant 0.000000e+00 : f32
    %16 = vector.broadcast %cst_9 : f32 to vector<128x64xf32>
    %17 = arith.maximumf %9, %16 : vector<128x64xf32>
    %18 = arith.select %12, %17, %9 : vector<128x64xi1>, vector<128x64xf32>
    %19 = arith.truncf %15 : vector<128x64xf32> to vector<128x64xbf16>
    %c0_10 = arith.constant 0 : index
    %c0_11 = arith.constant 0 : index
    %20 = vector.load %arg5[%c0_10, %c0_11] : memref<128x64xbf16, #tpu.memory_space<vmem>>, vector<128x64xbf16>
    tpu.vector_store %arg5[%c0_10, %c0_11], %19 {strides = array<i32>} : memref<128x64xbf16, #tpu.memory_space<vmem>>, vector<128x64xbf16>,
    %21 = arith.truncf %18 : vector<128x64xf32> to vector<128x64xbf16>
    %c0_12 = arith.constant 0 : index
    %c0_13 = arith.constant 0 : index
    %22 = vector.load %arg6[%c0_12, %c0_13] : memref<128x64xbf16, #tpu.memory_space<vmem>>, vector<128x64xbf16>
    tpu.vector_store %arg6[%c0_12, %c0_13], %21 {strides = array<i32>} : memref<128x64xbf16, #tpu.memory_space<vmem>>, vector<128x64xbf16>,
    return
  }
  func.func @transform_0(%arg0: i32) -> (i32, i32) {
    %c0_i32 = arith.constant 0 : i32
    %c0_i32_0 = arith.constant 0 : i32
    return %arg0, %c0_i32 : i32, i32
  }
  func.func @transform_1(%arg0: i32) -> (i32, i32) {
    %c0_i32 = arith.constant 0 : i32
    %c0_i32_0 = arith.constant 0 : i32
    return %arg0, %c0_i32 : i32, i32
  }
  func.func @transform_2(%arg0: i32) -> (i32, i32) {
    %c0_i32 = arith.constant 0 : i32
    %c0_i32_0 = arith.constant 0 : i32
    %c0_i32_1 = arith.constant 0 : i32
    return %c0_i32, %c0_i32_0 : i32, i32
  }
  func.func @transform_3(%arg0: i32) -> (i32, i32) {
    %c0_i32 = arith.constant 0 : i32
    %c0_i32_0 = arith.constant 0 : i32
    %c0_i32_1 = arith.constant 0 : i32
    return %c0_i32, %c0_i32_0 : i32, i32
  }
  func.func @transform_4(%arg0: i32) -> (i32, i32) {
    %c0_i32 = arith.constant 0 : i32
    %c0_i32_0 = arith.constant 0 : i32
    return %arg0, %c0_i32 : i32, i32
  }
  func.func @transform_5(%arg0: i32) -> (i32, i32) {
    %c0_i32 = arith.constant 0 : i32
    %c0_i32_0 = arith.constant 0 : i32
    return %arg0, %c0_i32 : i32, i32
  }
}

module attributes {stable_mosaic.version = 11 : i64} {
  func.func @_dual_conv_kernel(%arg0: i32, %arg1: memref<128x288xbf16, #tpu.memory_space<vmem>>, %arg2: memref<128x288xbf16, #tpu.memory_space<vmem>>, %arg3: memref<288x32xbf16, #tpu.memory_space<vmem>>, %arg4: memref<1x32xf32, #tpu.memory_space<vmem>>, %arg5: memref<128x32xbf16, #tpu.memory_space<vmem>>, %arg6: memref<128x32xbf16, #tpu.memory_space<vmem>>, %arg7: memref<8x128xf32, #tpu.memory_space<vmem>>) attributes {dimension_semantics = [#tpu.dimension_semantics<parallel>], iteration_bounds = array<i64: 1>, scalar_prefetch = 0 : i64, scratch_operands = 0 : i64, tpu.core_type = #tpu.core_type<tc>, window_params = [{transform_indices = @transform_0, window_bounds = array<i64: 128, 288>}, {transform_indices = @transform_1, window_bounds = array<i64: 128, 288>}, {pipeline_mode = #tpu.pipeline_mode<synchronous>, transform_indices = @transform_2, window_bounds = array<i64: 288, 32>}, {pipeline_mode = #tpu.pipeline_mode<synchronous>, transform_indices = @transform_3, window_bounds = array<i64: 1, 32>}, {transform_indices = @transform_4, window_bounds = array<i64: 128, 32>}, {transform_indices = @transform_5, window_bounds = array<i64: 128, 32>}, {transform_indices = @transform_6, window_bounds = array<i64: 8, 128>}]} {
    %c0 = arith.constant 0 : index
    %c0_0 = arith.constant 0 : index
    %0 = vector.load %arg3[%c0, %c0_0] : memref<288x32xbf16, #tpu.memory_space<vmem>>, vector<288x32xbf16>
    %c0_1 = arith.constant 0 : index
    %c0_2 = arith.constant 0 : index
    %1 = vector.load %arg4[%c0_1, %c0_2] : memref<1x32xf32, #tpu.memory_space<vmem>>, vector<1x32xf32>
    %c0_3 = arith.constant 0 : index
    %c0_4 = arith.constant 0 : index
    %2 = vector.load %arg1[%c0_3, %c0_4] : memref<128x288xbf16, #tpu.memory_space<vmem>>, vector<128x288xbf16>
    %cst = arith.constant dense<0.000000e+00> : vector<128x32xf32>
    %3 = tpu.matmul %2, %0, %cst {dimension_numbers = #tpu.dot_dimension_numbers<[1], [0], [0], [1], [0, 0, 1, 1], [], []>} : vector<128x288xbf16>, vector<288x32xbf16>, vector<128x32xf32> -> vector<128x32xf32>
    %4 = vector.broadcast %1 : vector<1x32xf32> to vector<128x32xf32>
    %5 = arith.addf %3, %4 : vector<128x32xf32>
    %c0_5 = arith.constant 0 : index
    %c0_6 = arith.constant 0 : index
    %6 = vector.load %arg2[%c0_5, %c0_6] : memref<128x288xbf16, #tpu.memory_space<vmem>>, vector<128x288xbf16>
    %cst_7 = arith.constant dense<0.000000e+00> : vector<128x32xf32>
    %7 = tpu.matmul %6, %0, %cst_7 {dimension_numbers = #tpu.dot_dimension_numbers<[1], [0], [0], [1], [0, 0, 1, 1], [], []>} : vector<128x288xbf16>, vector<288x32xbf16>, vector<128x32xf32> -> vector<128x32xf32>
    %8 = vector.broadcast %1 : vector<1x32xf32> to vector<128x32xf32>
    %9 = arith.addf %7, %8 : vector<128x32xf32>
    %c0_8 = arith.constant 0 : index
    %c0_9 = arith.constant 0 : index
    %10 = vector.load %arg5[%c0_8, %c0_9] : memref<128x32xbf16, #tpu.memory_space<vmem>>, vector<128x32xbf16>
    %11 = arith.extf %10 : vector<128x32xbf16> to vector<128x32xf32>
    %12 = arith.addf %5, %11 : vector<128x32xf32>
    %c0_10 = arith.constant 0 : index
    %c0_11 = arith.constant 0 : index
    %13 = vector.load %arg6[%c0_10, %c0_11] : memref<128x32xbf16, #tpu.memory_space<vmem>>, vector<128x32xbf16>
    %14 = arith.extf %13 : vector<128x32xbf16> to vector<128x32xf32>
    %15 = arith.addf %9, %14 : vector<128x32xf32>
    %cst_12 = arith.constant 0.000000e+00 : f32
    %16 = vector.broadcast %cst_12 : f32 to vector<128x32xf32>
    %17 = arith.maximumf %12, %16 : vector<128x32xf32>
    %cst_13 = arith.constant 0.000000e+00 : f32
    %18 = vector.broadcast %cst_13 : f32 to vector<128x32xf32>
    %19 = arith.maximumf %15, %18 : vector<128x32xf32>
    %20 = arith.subf %17, %19 : vector<128x32xf32>
    %21 = math.absf %20 : vector<128x32xf32>
    %cst_14 = arith.constant 1.000000e+00 : f32
    %22 = vector.broadcast %cst_14 : f32 to vector<128x32xf32>
    %23 = arith.cmpf ole, %21, %22 : vector<128x32xf32>
    %cst_15 = arith.constant 5.000000e-01 : f32
    %24 = vector.broadcast %cst_15 : f32 to vector<128x32xf32>
    %25 = arith.mulf %24, %20 : vector<128x32xf32>
    %26 = arith.mulf %25, %20 : vector<128x32xf32>
    %cst_16 = arith.constant 5.000000e-01 : f32
    %27 = vector.broadcast %cst_16 : f32 to vector<128x32xf32>
    %28 = arith.subf %21, %27 : vector<128x32xf32>
    %29 = arith.select %23, %26, %28 : vector<128x32xi1>, vector<128x32xf32>
    %30 = vector.shape_cast %29 : vector<128x32xf32> to vector<1x128x32xf32>
    %cst_17 = arith.constant dense<0.000000e+00> : vector<1xf32>
    %31 = vector.multi_reduction <add>, %30, %cst_17 [1, 2] : vector<1x128x32xf32> to vector<1xf32>
    %32 = vector.shape_cast %31 : vector<1xf32> to vector<1x1x1xf32>
    %33 = vector.extract %32[0, 0, 0] : f32 from vector<1x1x1xf32>
    %34 = tpu.iota {dimensions = array<i32: 0>} : vector<8x128xi32>
    %35 = tpu.iota {dimensions = array<i32: 1>} : vector<8x128xi32>
    %c0_i32 = arith.constant 0 : i32
    %36 = vector.broadcast %c0_i32 : i32 to vector<8x128xi32>
    %37 = arith.cmpi eq, %34, %36 : vector<8x128xi32>
    %c0_i32_18 = arith.constant 0 : i32
    %38 = vector.broadcast %c0_i32_18 : i32 to vector<8x128xi32>
    %39 = arith.cmpi eq, %35, %38 : vector<8x128xi32>
    %40 = arith.andi %37, %39 : vector<8x128xi1>
    %cst_19 = arith.constant 0.000000e+00 : f32
    %41 = vector.broadcast %33 : f32 to vector<8x128xf32>
    %42 = vector.broadcast %cst_19 : f32 to vector<8x128xf32>
    %43 = arith.select %40, %41, %42 : vector<8x128xi1>, vector<8x128xf32>
    %c0_20 = arith.constant 0 : index
    %c0_21 = arith.constant 0 : index
    %44 = vector.load %arg7[%c0_20, %c0_21] : memref<8x128xf32, #tpu.memory_space<vmem>>, vector<8x128xf32>
    tpu.vector_store %arg7[%c0_20, %c0_21], %43 {strides = array<i32>} : memref<8x128xf32, #tpu.memory_space<vmem>>, vector<8x128xf32>,
    return
  }
  func.func @transform_0(%arg0: i32) -> (i32, i32) {
    %c0_i32 = arith.constant 0 : i32
    %c0_i32_0 = arith.constant 0 : i32
    return %arg0, %c0_i32 : i32, i32
  }
  func.func @transform_1(%arg0: i32) -> (i32, i32) {
    %c0_i32 = arith.constant 0 : i32
    %c0_i32_0 = arith.constant 0 : i32
    return %arg0, %c0_i32 : i32, i32
  }
  func.func @transform_2(%arg0: i32) -> (i32, i32) {
    %c0_i32 = arith.constant 0 : i32
    %c0_i32_0 = arith.constant 0 : i32
    %c0_i32_1 = arith.constant 0 : i32
    return %c0_i32, %c0_i32_0 : i32, i32
  }
  func.func @transform_3(%arg0: i32) -> (i32, i32) {
    %c0_i32 = arith.constant 0 : i32
    %c0_i32_0 = arith.constant 0 : i32
    %c0_i32_1 = arith.constant 0 : i32
    return %c0_i32, %c0_i32_0 : i32, i32
  }
  func.func @transform_4(%arg0: i32) -> (i32, i32) {
    %c0_i32 = arith.constant 0 : i32
    %c0_i32_0 = arith.constant 0 : i32
    return %arg0, %c0_i32 : i32, i32
  }
  func.func @transform_5(%arg0: i32) -> (i32, i32) {
    %c0_i32 = arith.constant 0 : i32
    %c0_i32_0 = arith.constant 0 : i32
    return %arg0, %c0_i32 : i32, i32
  }
  func.func @transform_6(%arg0: i32) -> (i32, i32) {
    %c0_i32 = arith.constant 0 : i32
    %c0_i32_0 = arith.constant 0 : i32
    return %arg0, %c0_i32 : i32, i32
  }
}

</mosaic_0001>

<bundles_post_ra>
// kernel: resnet_perceptual_loss.5
= control target key start
LH: loop header
LB: loop body
LE: loop exit
PB: predicated region body
PF: predicated region fallthrough
CT: control target
= control target key end

     0   :  { %s1439_s21 = smov 0   ;;  %s1775_s0 = inlined_call_operand.vmem [shape: bf16[512,27], index: 0, kind: input, shape index: {}]   ;;  %s1776_s1 = inlined_call_operand.vmem [shape: bf16[512,27], index: 1, kind: input, shape index: {}]   ;;  %s1777_s2 = inlined_call_operand.vmem [shape: bf16[27,16], index: 2, kind: input, shape index: {}]   ;;  %s1778_s3 = inlined_call_operand.vmem [shape: f32[1,16], index: 3, kind: input, shape index: {}]   ;;  %s1779_s4 = inlined_call_operand.vmem [shape: bf16[512,16], index: 4, kind: output, shape index: {0}]   ;;  %s1780_s5 = inlined_call_operand.vmem [shape: bf16[512,16], index: 5, kind: output, shape index: {1}]   ;;  %s1781_s6 = inlined_call_operand.vmem [shape: f32[32,128], index: 6, kind: output, shape index: {2}]  }
   0x1 LB: > { %s1445_s22 = sadd.s32 4294967295, %s1401_s21   ;;  %p1179_p0 = scmp.ge.s32.totalorder %s1401_s21, 1  ;;  %s1401_s21 = sphi %s1439_s21, %s17_s21  }
   0x2   : > { %p229_p1 = scmp.lt.s32.totalorder %s1401_s21, 5 }
   0x4   : > { %p230_p2 = pnand %p1179_p0, %p229_p1 }
   0x5   : > { %v1377_v0 = vld [vmem:[%s1777_s2] sm:$0xff] (!%p230_p2)   ;;  %vm405_vm0 = vcmask (!%p230_p2), 1044480   ;;  %v1378_v1 = vld [vmem:[%s1777_s2 + $0x8] sm:$0x3f] (!%p230_p2)   ;;  %vm406_vm1 = vcmask (!%p230_p2), 1045504   ;;  %s1180_s27 = sshll.u32 (!%p230_p2), %s1445_s22, 4 }
   0x6   : > { %233 = sbr.rel (%p230_p2) target bundleno = 506 (0x1fa), region = 36  ;;  %1326 = vmatprep.subr.bf16.mxu0 (!%p230_p2), %v1377_v0  ;;  %1346 = vmatprep.subr.bf16.mxu1 (!%p230_p2), %v1377_v0  ;;  %v1403_v2 = vmov (!%p230_p2), 65535   ;;  %p274_p3 = scmp.lt.s32.totalorder (!%p230_p2), %s1180_s27, 63  ;;  %vm380_vm2 = vcmask (!%p230_p2), 220160   ;;  %v1505_v22 = vld [vmem:[%s1778_s3] ss:$0 sm:$0xff] (!%p230_p2) }
   0x7   : > { %1327 = vmatpush3.bf16.msra.mxu0 (!%p230_p2), %v1377_v0  ;;  %1347 = vmatpush3.bf16.msra.mxu1 (!%p230_p2), %v1377_v0  ;;  %v407_v3 = vsel (!%p230_p2), %vm405_vm0, 4294967295, %v1403_v2  ;;  %vm782_vm3 = vcmask (!%p230_p2), 125952   ;;  %vm991_vm6 = vcmask (!%p230_p2), 130048   ;;  %p297_p4 = scmp.lt.s32.totalorder (!%p230_p2), %s1445_s22, 3 }
   0x8   : > { %v408_v4 = vsel (!%p230_p2), %vm406_vm1, %v407_v3, 0 }
   0x9   : > { %v410_v5 = vand.u32 (!%p230_p2), %v1378_v1, %v408_v4 }
   0xb   : > { %1328 = vmatprep.subr.bf16.mxu0 (!%p230_p2), %v410_v5  ;;  %1348 = vmatprep.subr.bf16.mxu1 (!%p230_p2), %v410_v5 }
   0xc   : > { %1329 = vmatpush3.bf16.msra.mxu0 (!%p230_p2), %v410_v5  ;;  %1349 = vmatpush3.bf16.msra.mxu1 (!%p230_p2), %v410_v5 }
   0xd   : > { %s1805_s27 = smov (!%p274_p3, %s1180_s27), 63  ;;  %s1807_s22 = smov (!%p297_p4, %s1445_s22), 3 }
   0xe   : > { %s1456_s28 = sshll.u32 %s1805_s27, 2  ;;  %s1188_s19 = sshll.u32 %s1807_s22, 3 }
   0xf   : > { %s1462_s7 = scalar_lea.vmem %s1775_s0, %s1456_s28  ;;  %s1468_s10 = scalar_lea.vmem %s1776_s1, %s1456_s28 }
  0x10   : > { %v1379_v6 = vld [vmem:[%s1462_s7] sm:$0xff]   ;;  %v1381_v8 = vld [vmem:[%s1462_s7 + $0x8] sm:$0xff]   ;;  %v1383_v10 = vld [vmem:[%s1462_s7 + $0x10] sm:$0xff]   ;;  %s1516_s15 = scalar_lea.vmem %s1779_s4, %s1456_s28  ;;  %s1524_s18 = scalar_lea.vmem %s1780_s5, %s1456_s28 }
  0x11   : > { %v1380_v7 = vld [vmem:[%s1468_s10] sm:$0xff]   ;;  %1330 = vmatprep.mubr.msk.bf16.mxu0 %vm380_vm2, %v1379_v6  ;;  %v1382_v9 = vld [vmem:[%s1468_s10 + $0x8] sm:$0xff]   ;;  %v1384_v11 = vld [vmem:[%s1468_s10 + $0x10] sm:$0xff]   ;;  %s300_s24 = scalar_lea.vmem %s1781_s6, %s1188_s19 }
  0x12   : > { %1350 = vmatprep.mubr.msk.bf16.mxu1 %vm380_vm2, %v1380_v7  ;;  %1331 = vmatmul.mubr.msk.bf16.vlgmr.msra.gmra.mrb[0].mxu0 %vm380_vm2, %v1381_v8  ;;  %v1385_v12 = vld [vmem:[%s1462_s7 + $0x18] sm:$0xff]   ;;  %v1387_v14 = vld [vmem:[%s1462_s7 + $0x20] sm:$0xff]   ;;  %v1389_v16 = vld [vmem:[%s1462_s7 + $0x28] sm:$0xff]  }
  0x13   : > { %1351 = vmatmul.mubr.msk.bf16.vlgmr.msra.gmra.mrb[0].mxu1 %vm380_vm2, %v1382_v9  ;;  %1334 = vmatprep.mubr.msk.bf16.mxu0 %vm380_vm2, %v1383_v10  ;;  %v1386_v13 = vld [vmem:[%s1468_s10 + $0x18] sm:$0xff]   ;;  %v1388_v15 = vld [vmem:[%s1468_s10 + $0x20] sm:$0xff]   ;;  %v1390_v17 = vld [vmem:[%s1468_s10 + $0x28] sm:$0xff]  }
  0x14   : > { %1354 = vmatprep.mubr.msk.bf16.mxu1 %vm380_vm2, %v1384_v11  ;;  %v1391_v18 = vld [vmem:[%s1462_s7 + $0x30] sm:$0xff]   ;;  %v1393_v20 = vld [vmem:[%s1462_s7 + $0x38] sm:$0xff]  }
  0x15   : > { %v1392_v19 = vld [vmem:[%s1468_s10 + $0x30] sm:$0xff]   ;;  %v1394_v21 = vld [vmem:[%s1468_s10 + $0x38] sm:$0xff]  }
  0x1a   : > { %1335 = vmatmul.mubr.msk.bf16.gmra.mrb[4].mxu0 %vm380_vm2, %v1385_v12 }
  0x1b   : > { %1355 = vmatmul.mubr.msk.bf16.gmra.mrb[4].mxu1 %vm380_vm2, %v1386_v13  ;;  %1338 = vmatprep.mubr.msk.bf16.mxu0 %vm380_vm2, %v1387_v14 }
  0x1c   : > { %1358 = vmatprep.mubr.msk.bf16.mxu1 %vm380_vm2, %v1388_v15 }
  0x22   : > { %1339 = vmatmul.mubr.msk.bf16.gmra.mrb[8].mxu0 %vm380_vm2, %v1389_v16 }
  0x23   : > { %1359 = vmatmul.mubr.msk.bf16.gmra.mrb[8].mxu1 %vm380_vm2, %v1390_v17  ;;  %1342 = vmatprep.mubr.msk.bf16.mxu0 %vm380_vm2, %v1391_v18 }
  0x24   : > { %1362 = vmatprep.mubr.msk.bf16.mxu1 %vm380_vm2, %v1392_v19 }
  0x2a   : > { %1343 = vmatmul.mubr.msk.bf16.gmra.mrb[12].mxu0 %vm380_vm2, %v1393_v20 }
  0x2b   : > { %1363 = vmatmul.mubr.msk.bf16.gmra.mrb[12].mxu1 %vm380_vm2, %v1394_v21 }
  0xe5   : > { %v1332_v23 = vpop.f32.mrb[0].mxu0 }
  0xe6   : > { %v455_v24 = vadd.f32 %v1332_v23, %v1505_v22  ;;  %v1352_v25 = vpop.f32.mrb[0].mxu1  ;;  %v446_v26 = vpop.f32.mrb[1].mxu0 }
  0xe7   : > { %v632_v27 = vadd.f32 %v1352_v25, %v1505_v22  ;;  %v447_v28 = vadd.f32 %v1505_v22, %v446_v26  ;;  %v623_v29 = vpop.f32.mrb[1].mxu1  ;;  %v1333_v30 = vpop.f32.mrb[2].mxu0 }
  0xe8   : > { %v688_v31 = vmax.f32 %v455_v24, 0.0  ;;  %v624_v32 = vadd.f32 %v1505_v22, %v623_v29  ;;  %v458_v33 = vadd.f32 %v1333_v30, %v1505_v22  ;;  %v1353_v34 = vpop.f32.mrb[2].mxu1  ;;  %v449_v35 = vpop.f32.mrb[3].mxu0 }
  0xe9   : > { %v704_v36 = vmax.f32 %v632_v27, 0.0  ;;  %v686_v37 = vmax.f32 %v447_v28, 0.0  ;;  %v635_v38 = vadd.f32 %v1353_v34, %v1505_v22  ;;  %v450_v39 = vadd.f32 %v1505_v22, %v449_v35  ;;  %v626_v40 = vpop.f32.mrb[3].mxu1 }
  0xea   : > { %v1276_v41 = vpack.c.bf16 %v688_v31, %v688_v31  ;;  %v702_v42 = vmax.f32 %v624_v32, 0.0  ;;  %v689_v43 = vmax.f32 %v458_v33, 0.0  ;;  %v627_v44 = vadd.f32 %v1505_v22, %v626_v40 }
  0xeb   : > { %v1292_v45 = vpack.c.bf16 %v704_v36, %v704_v36  ;;  %v881_v46 = vsub.f32 %v688_v31, %v704_v36  ;;  %v1274_v47 = vpack.c.bf16 %v686_v37, %v686_v37  ;;  %v705_v48 = vmax.f32 %v635_v38, 0.0 }
  0xec   : > { %785 = vst.msk [vmem:[%s1516_s15 + $0x8] sm:$0xf] %vm782_vm3, %v1276_v41  ;;  %v1290_v49 = vpack.c.bf16 %v702_v42, %v702_v42  ;;  %v879_v50 = vsub.f32 %v686_v37, %v702_v42  ;;  %v1277_v51 = vpack.c.bf16 %v689_v43, %v689_v43  ;;  %v687_v52 = vmax.f32 %v450_v39, 0.0 }
  0xed   : > { %865 = vst.msk [vmem:[%s1524_s18 + $0x8] sm:$0xf] %vm782_vm3, %v1292_v45  ;;  %v897_v53 = vand.u32 2147483647, %v881_v46  ;;  %v929_v54 = vmul.f32 0.5, %v881_v46  ;;  %v1293_v55 = vpack.c.bf16 %v705_v48, %v705_v48  ;;  %v882_v56 = vsub.f32 %v689_v43, %v705_v48  ;;  %v1336_v57 = vpop.f32.mrb[4].mxu0 }
  0xee   : > { %783 = vst.msk [vmem:[%s1516_s15] sm:$0xf] %vm782_vm3, %v1274_v47  ;;  %863 = vst.msk [vmem:[%s1524_s18] sm:$0xf] %vm782_vm3, %v1290_v49  ;;  %v895_v58 = vand.u32 2147483647, %v879_v50  ;;  %v1275_v60 = vpack.c.bf16 %v687_v52, %v687_v52  ;;  %v471_v20 = vadd.f32 %v1336_v57, %v1505_v22 }
  0xef   : > { %v927_v59 = vmul.f32 0.5, %v879_v50  ;;  %786 = vst.msk [vmem:[%s1516_s15 + $0xc] sm:$0xf] %vm782_vm3, %v1277_v51  ;;  %v703_v61 = vmax.f32 %v627_v44, 0.0  ;;  %v1356_v62 = vpop.f32.mrb[4].mxu1  ;;  %v462_v63 = vpop.f32.mrb[5].mxu0  ;;  %v1541_v1 = vmul.f32 %v929_v54, %v881_v46 }
  0xf0   : > { %vm1537_vm4 = vcmp.le.f32.partialorder %v897_v53, 1.0  ;;  %v1543_v2 = vadd.f32 -0.5, %v897_v53  ;;  %866 = vst.msk [vmem:[%s1524_s18 + $0xc] sm:$0xf] %vm782_vm3, %v1293_v55  ;;  %v898_v3 = vand.u32 2147483647, %v882_v56  ;;  %v648_v21 = vadd.f32 %v1356_v62, %v1505_v22 }
  0xf1   : > { %v639_v4 = vpop.f32.mrb[5].mxu1  ;;  %v1337_v5 = vpop.f32.mrb[6].mxu0  ;;  %vm1547_vm5 = vcmp.le.f32.partialorder %v895_v58, 1.0  ;;  %v943_v7 = vmul.f32 %v927_v59, %v879_v50  ;;  %v1256_v8 = vadd.f32 -0.5, %v895_v58  ;;  %v930_v9 = vmul.f32 0.5, %v882_v56 }
  0xf2   : > { %784 = vst.msk [vmem:[%s1516_s15 + $0x4] sm:$0xf] %vm782_vm3, %v1275_v60  ;;  %v1357_v10 = vpop.f32.mrb[6].mxu1  ;;  %v1553_v11 = vpop.f32.mrb[7].mxu0  ;;  %v1259_v12 = vadd.f32 -0.5, %v898_v3  ;;  %v1291_v13 = vpack.c.bf16 %v703_v61, %v703_v61  ;;  %vm1559_vm7 = vcmp.le.f32.partialorder %v898_v3, 1.0  ;;  %v880_v18 = vsub.f32 %v687_v52, %v703_v61 }
  0xf3   : > { %v1555_v14 = vpop.f32.mrb[7].mxu1  ;;  %v975_v15 = vsel %vm1547_vm5, %v943_v7, %v1256_v8  ;;  %v946_v17 = vmul.f32 %v930_v9, %v882_v56  ;;  %v977_v19 = vsel %vm1537_vm4, %v1541_v1, %v1543_v2  ;;  %v463_v23 = vadd.f32 %v1505_v22, %v462_v63 }
  0xf4   : > { %864 = vst.msk [vmem:[%s1524_s18 + $0x4] sm:$0xf] %vm782_vm3, %v1291_v13  ;;  %v992_v24 = vsel %vm991_vm6, %v975_v15, 0.0  ;;  %v896_v25 = vand.u32 2147483647, %v880_v18  ;;  %v928_v26 = vmul.f32 0.5, %v880_v18  ;;  %v640_v27 = vadd.f32 %v1505_v22, %v639_v4 }
  0xf5   : > { %v978_v28 = vsel %vm1559_vm7, %v946_v17, %v1259_v12  ;;  %v692_v29 = vmax.f32 %v471_v20, 0.0  ;;  %v708_v30 = vmax.f32 %v648_v21, 0.0  ;;  %v690_v31 = vmax.f32 %v463_v23, 0.0  ;;  %v1340_v32 = vpop.f32.mrb[8].mxu0 }
  0xf6   : > { %vm1576_vm8 = vcmp.le.f32.partialorder %v896_v25, 1.0  ;;  %v944_v34 = vmul.f32 %v928_v26, %v880_v18  ;;  %v1257_v35 = vadd.f32 -0.5, %v896_v25  ;;  %v706_v36 = vmax.f32 %v640_v27, 0.0  ;;  %v1360_v37 = vpop.f32.mrb[8].mxu1  ;;  %v1580_v38 = vpop.f32.mrb[9].mxu0 }
  0xf7   : > { %v1280_v39 = vpack.c.bf16 %v692_v29, %v692_v29  ;;  %v1296_v40 = vpack.c.bf16 %v708_v30, %v708_v30  ;;  %v885_v41 = vsub.f32 %v692_v29, %v708_v30  ;;  %v1278_v42 = vpack.c.bf16 %v690_v31, %v690_v31  ;;  %v1582_v43 = vpop.f32.mrb[9].mxu1  ;;  %v1584_v44 = vpop.f32.mrb[10].mxu0 }
  0xf8   : > { %v976_v45 = vsel %vm1576_vm8, %v944_v34, %v1257_v35  ;;  %v1294_v46 = vpack.c.bf16 %v706_v36, %v706_v36  ;;  %v883_v47 = vsub.f32 %v690_v31, %v706_v36  ;;  %v474_v48 = vadd.f32 %v1337_v5, %v1505_v22  ;;  %v1589_v49 = vpop.f32.mrb[10].mxu1  ;;  %v1591_v50 = vpop.f32.mrb[11].mxu0 }
  0xf9   : > { %v993_v51 = vsel %vm991_vm6, %v976_v45, 0.0  ;;  %789 = vst.msk [vmem:[%s1516_s15 + $0x18] sm:$0xf] %vm782_vm3, %v1280_v39  ;;  %869 = vst.msk [vmem:[%s1524_s18 + $0x18] sm:$0xf] %vm782_vm3, %v1296_v40  ;;  %v933_v53 = vmul.f32 0.5, %v885_v41  ;;  %v651_v54 = vadd.f32 %v1357_v10, %v1505_v22  ;;  %v466_v12 = vadd.f32 %v1505_v22, %v1553_v11 }
  0xfa   : > { %v901_v52 = vand.u32 2147483647, %v885_v41  ;;  %787 = vst.msk [vmem:[%s1516_s15 + $0x10] sm:$0xf] %vm782_vm3, %v1278_v42  ;;  %v1601_v55 = vpop.f32.mrb[11].mxu1  ;;  %v994_v56 = vadd.f32 %v993_v51, %v992_v24  ;;  %v931_v58 = vmul.f32 0.5, %v883_v47  ;;  %v487_v24 = vadd.f32 %v1340_v32, %v1505_v22 }
  0xfb   : > { %867 = vst.msk [vmem:[%s1524_s18 + $0x10] sm:$0xf] %vm782_vm3, %v1294_v46  ;;  %v899_v57 = vand.u32 2147483647, %v883_v47  ;;  %v693_v59 = vmax.f32 %v474_v48, 0.0  ;;  %v995_v60 = vsel %vm991_vm6, %v977_v19, 0.0  ;;  %v949_v62 = vmul.f32 %v933_v53, %v885_v41 }
  0xfc   : > { %v997_v61 = vsel %vm991_vm6, %v978_v28, 0.0  ;;  %v709_v63 = vmax.f32 %v651_v54, 0.0  ;;  %v996_v0 = vadd.f32 %v995_v60, %v994_v56  ;;  %v947_v1 = vmul.f32 %v931_v58, %v883_v47 }
  0xfd   : > { %vm915_vm9 = vcmp.le.f32.partialorder %v899_v57, 1.0  ;;  %v1260_v2 = vadd.f32 -0.5, %v899_v57  ;;  %v1262_v3 = vadd.f32 -0.5, %v901_v52  ;;  %v1281_v4 = vpack.c.bf16 %v693_v59, %v693_v59  ;;  %v1607_v7 = vpop.f32.mrb[12].mxu0 }
  0xfe   : > { %v1297_v5 = vpack.c.bf16 %v709_v63, %v709_v63  ;;  %v886_v6 = vsub.f32 %v693_v59, %v709_v63  ;;  %vm1609_vm10 = vcmp.le.f32.partialorder %v901_v52, 1.0  ;;  %v998_v10 = vadd.f32 %v997_v61, %v996_v0  ;;  %v1615_v13 = vpop.f32.mrb[12].mxu1  ;;  %v1617_v15 = vpop.f32.mrb[13].mxu0 }
  0xff   : > { %v979_v9 = vsel %vm915_vm9, %v947_v1, %v1260_v2  ;;  %790 = vst.msk [vmem:[%s1516_s15 + $0x1c] sm:$0xf] %vm782_vm3, %v1281_v4  ;;  %v643_v19 = vadd.f32 %v1505_v22, %v1555_v14  ;;  %v1626_v20 = vpop.f32.mrb[13].mxu1  ;;  %v1628_v21 = vpop.f32.mrb[14].mxu0  ;;  %v691_v23 = vmax.f32 %v466_v12, 0.0  ;;  %v664_v25 = vadd.f32 %v1360_v37, %v1505_v22 }
 0x100   : > { %v999_v16 = vsel %vm991_vm6, %v979_v9, 0.0  ;;  %870 = vst.msk [vmem:[%s1524_s18 + $0x1c] sm:$0xf] %vm782_vm3, %v1297_v5  ;;  %v902_v17 = vand.u32 2147483647, %v886_v6  ;;  %v934_v18 = vmul.f32 0.5, %v886_v6  ;;  %v981_v28 = vsel %vm1609_vm10, %v949_v62, %v1262_v3 }
 0x101   : > { %v1000_v11 = vadd.f32 %v999_v16, %v998_v10  ;;  %v1632_v26 = vpop.f32.mrb[14].mxu1  ;;  %v1634_v27 = vpop.f32.mrb[15].mxu0  ;;  %v707_v29 = vmax.f32 %v643_v19, 0.0  ;;  %v1279_v31 = vpack.c.bf16 %v691_v23, %v691_v23  ;;  %v696_v32 = vmax.f32 %v487_v24, 0.0 }
 0x102   : > { %vm1638_vm11 = vcmp.le.f32.partialorder %v902_v17, 1.0  ;;  %v1642_v30 = vpop.f32.mrb[15].mxu1  ;;  %v712_v33 = vmax.f32 %v664_v25, 0.0  ;;  %v479_v34 = vadd.f32 %v1505_v22, %v1580_v38  ;;  %v950_v35 = vmul.f32 %v934_v18, %v886_v6 }
 0x103   : > { %v1295_v36 = vpack.c.bf16 %v707_v29, %v707_v29  ;;  %v884_v37 = vsub.f32 %v691_v23, %v707_v29  ;;  %v656_v39 = vadd.f32 %v1505_v22, %v1582_v43  ;;  %v1263_v40 = vadd.f32 -0.5, %v902_v17  ;;  %788 = vst.msk [vmem:[%s1516_s15 + $0x14] sm:$0xf] %vm782_vm3, %v1279_v31 }
 0x104   : > { %v1284_v41 = vpack.c.bf16 %v696_v32, %v696_v32  ;;  %v1300_v42 = vpack.c.bf16 %v712_v33, %v712_v33  ;;  %v1650_v45 = vsub.f32 %v696_v32, %v712_v33  ;;  %v694_v38 = vmax.f32 %v479_v34, 0.0 }
 0x105   : > { %868 = vst.msk [vmem:[%s1524_s18 + $0x14] sm:$0xf] %vm782_vm3, %v1295_v36  ;;  %v900_v46 = vand.u32 2147483647, %v884_v37  ;;  %v932_v47 = vmul.f32 0.5, %v884_v37  ;;  %v710_v48 = vmax.f32 %v656_v39, 0.0  ;;  %v490_v43 = vadd.f32 %v1584_v44, %v1505_v22 }
 0x106   : > { %793 = vst.msk [vmem:[%s1516_s15 + $0x28] sm:$0xf] %vm782_vm3, %v1284_v41  ;;  %873 = vst.msk [vmem:[%s1524_s18 + $0x28] sm:$0xf] %vm782_vm3, %v1300_v42  ;;  %v667_v51 = vadd.f32 %v1589_v49, %v1505_v22  ;;  %v1282_v54 = vpack.c.bf16 %v694_v38, %v694_v38  ;;  %v1003_v56 = vsel %vm991_vm6, %v981_v28, 0.0  ;;  %v982_v57 = vsel %vm1638_vm11, %v950_v35, %v1263_v40 }
 0x107   : > { %vm916_vm12 = vcmp.le.f32.partialorder %v900_v46, 1.0  ;;  %v948_v52 = vmul.f32 %v932_v47, %v884_v37  ;;  %v1261_v53 = vadd.f32 -0.5, %v900_v46  ;;  %v1298_v58 = vpack.c.bf16 %v710_v48, %v710_v48 }
 0x108   : > { %791 = vst.msk [vmem:[%s1516_s15 + $0x20] sm:$0xf] %vm782_vm3, %v1282_v54  ;;  %v887_v60 = vsub.f32 %v694_v38, %v710_v48  ;;  %v697_v61 = vmax.f32 %v490_v43, 0.0  ;;  %v713_v44 = vmax.f32 %v667_v51, 0.0  ;;  %v937_v49 = vmul.f32 0.5, %v1650_v45 }
 0x109   : > { %v980_v59 = vsel %vm916_vm12, %v948_v52, %v1261_v53  ;;  %871 = vst.msk [vmem:[%s1524_s18 + $0x20] sm:$0xf] %vm782_vm3, %v1298_v58  ;;  %v482_v63 = vadd.f32 %v1505_v22, %v1591_v50  ;;  %v659_v0 = vadd.f32 %v1505_v22, %v1601_v55  ;;  %v1005_v50 = vsel %vm991_vm6, %v982_v57, 0.0 }
 0x10a   : > { %v1001_v62 = vsel %vm991_vm6, %v980_v59, 0.0  ;;  %v903_v2 = vand.u32 2147483647, %v887_v60  ;;  %v935_v3 = vmul.f32 0.5, %v887_v60  ;;  %v1285_v4 = vpack.c.bf16 %v697_v61, %v697_v61 }
 0x10b   : > { %v1002_v1 = vadd.f32 %v1001_v62, %v1000_v11  ;;  %v1301_v5 = vpack.c.bf16 %v713_v44, %v713_v44  ;;  %v1675_v6 = vsub.f32 %v697_v61, %v713_v44  ;;  %v695_v8 = vmax.f32 %v482_v63, 0.0 }
 0x10c   : > { %v711_v9 = vmax.f32 %v659_v0, 0.0  ;;  %vm919_vm13 = vcmp.le.f32.partialorder %v903_v2, 1.0  ;;  %v951_v12 = vmul.f32 %v935_v3, %v887_v60  ;;  %v1264_v16 = vadd.f32 -0.5, %v903_v2  ;;  %794 = vst.msk [vmem:[%s1516_s15 + $0x2c] sm:$0xf] %vm782_vm3, %v1285_v4 }
 0x10d   : > { %v1004_v10 = vadd.f32 %v1003_v56, %v1002_v1  ;;  %v905_v55 = vand.u32 2147483647, %v1650_v45  ;;  %874 = vst.msk [vmem:[%s1524_s18 + $0x2c] sm:$0xf] %vm782_vm3, %v1301_v5  ;;  %v1283_v17 = vpack.c.bf16 %v695_v8, %v695_v8  ;;  %v503_v24 = vadd.f32 %v1607_v7, %v1505_v22 }
 0x10e   : > { %v1299_v18 = vpack.c.bf16 %v711_v9, %v711_v9  ;;  %v983_v19 = vsel %vm919_vm13, %v951_v12, %v1264_v16  ;;  %v888_v23 = vsub.f32 %v695_v8, %v711_v9  ;;  %v1686_v25 = vmul.f32 %v937_v49, %v1650_v45 }
 0x10f   : > { %v1006_v11 = vadd.f32 %v1005_v50, %v1004_v10  ;;  %v1007_v28 = vsel %vm991_vm6, %v983_v19, 0.0  ;;  %792 = vst.msk [vmem:[%s1516_s15 + $0x24] sm:$0xf] %vm782_vm3, %v1283_v17  ;;  %v700_v32 = vmax.f32 %v503_v24, 0.0  ;;  %vm1695_vm14 = vcmp.le.f32.partialorder %v905_v55, 1.0 }
 0x110   : > { %872 = vst.msk [vmem:[%s1524_s18 + $0x24] sm:$0xf] %vm782_vm3, %v1299_v18  ;;  %v904_v29 = vand.u32 2147483647, %v888_v23  ;;  %v936_v31 = vmul.f32 0.5, %v888_v23  ;;  %v680_v7 = vadd.f32 %v1615_v13, %v1505_v22  ;;  %v495_v34 = vadd.f32 %v1505_v22, %v1617_v15 }
 0x111   : > { %v1693_v14 = vadd.f32 %v1007_v28, %v1006_v11  ;;  %v672_v35 = vadd.f32 %v1505_v22, %v1626_v20  ;;  %v506_v36 = vadd.f32 %v1628_v21, %v1505_v22  ;;  %v906_v37 = vand.u32 2147483647, %v1675_v6 }
 0x112   : > { %v952_v39 = vmul.f32 %v936_v31, %v888_v23  ;;  %v1265_v40 = vadd.f32 -0.5, %v904_v29  ;;  %v1288_v41 = vpack.c.bf16 %v700_v32, %v700_v32  ;;  %v716_v42 = vmax.f32 %v680_v7, 0.0 }
 0x113   : > { %v698_v45 = vmax.f32 %v495_v34, 0.0  ;;  %v714_v46 = vmax.f32 %v672_v35, 0.0  ;;  %v701_v47 = vmax.f32 %v506_v36, 0.0  ;;  %vm1708_vm15 = vcmp.le.f32.partialorder %v904_v29, 1.0 }
 0x114   : > { %797 = vst.msk [vmem:[%s1516_s15 + $0x38] sm:$0xf] %vm782_vm3, %v1288_v41  ;;  %v683_v15 = vadd.f32 %v1632_v26, %v1505_v22  ;;  %v498_v20 = vadd.f32 %v1505_v22, %v1634_v27  ;;  %v675_v21 = vadd.f32 %v1505_v22, %v1642_v30  ;;  %v938_v38 = vmul.f32 0.5, %v1675_v6 }
 0x115   : > { %v1304_v48 = vpack.c.bf16 %v716_v42, %v716_v42  ;;  %v893_v43 = vsub.f32 %v700_v32, %v716_v42  ;;  %v1286_v51 = vpack.c.bf16 %v698_v45, %v698_v45  ;;  %v1302_v52 = vpack.c.bf16 %v714_v46, %v714_v46 }
 0x116   : > { %v891_v53 = vsub.f32 %v698_v45, %v714_v46  ;;  %v1289_v54 = vpack.c.bf16 %v701_v47, %v701_v47  ;;  %v717_v56 = vmax.f32 %v683_v15, 0.0  ;;  %v1266_v57 = vadd.f32 -0.5, %v905_v55 }
 0x117   : > { %v984_v26 = vsel %vm1708_vm15, %v952_v39, %v1265_v40  ;;  %877 = vst.msk [vmem:[%s1524_s18 + $0x38] sm:$0xf] %vm782_vm3, %v1304_v48  ;;  %795 = vst.msk [vmem:[%s1516_s15 + $0x30] sm:$0xf] %vm782_vm3, %v1286_v51  ;;  %v699_v27 = vmax.f32 %v498_v20, 0.0  ;;  %v715_v22 = vmax.f32 %v675_v21, 0.0  ;;  %v954_v63 = vmul.f32 %v938_v38, %v1675_v6 }
 0x118   : > { %875 = vst.msk [vmem:[%s1524_s18 + $0x30] sm:$0xf] %vm782_vm3, %v1302_v52  ;;  %v907_v30 = vand.u32 2147483647, %v891_v53  ;;  %v939_v58 = vmul.f32 0.5, %v891_v53  ;;  %v1305_v59 = vpack.c.bf16 %v717_v56, %v717_v56  ;;  %v894_v60 = vsub.f32 %v701_v47, %v717_v56 }
 0x119   : > { %798 = vst.msk [vmem:[%s1516_s15 + $0x3c] sm:$0xf] %vm782_vm3, %v1289_v54  ;;  %vm1731_vm0 = vcmp.le.f32.partialorder %v906_v37, 1.0  ;;  %v1287_v44 = vpack.c.bf16 %v699_v27, %v699_v27  ;;  %v1303_v62 = vpack.c.bf16 %v715_v22, %v715_v22  ;;  %v892_v49 = vsub.f32 %v699_v27, %v715_v22 }
 0x11a   : > { %v1267_v0 = vadd.f32 -0.5, %v906_v37  ;;  %v955_v1 = vmul.f32 %v939_v58, %v891_v53  ;;  %v1268_v2 = vadd.f32 -0.5, %v907_v30  ;;  %878 = vst.msk [vmem:[%s1524_s18 + $0x3c] sm:$0xf] %vm782_vm3, %v1305_v59  ;;  %v1009_v3 = vsel %vm991_vm6, %v984_v26, 0.0 }
 0x11b   : > { %vm1739_vm1 = vcmp.le.f32.partialorder %v907_v30, 1.0  ;;  %796 = vst.msk [vmem:[%s1516_s15 + $0x34] sm:$0xf] %vm782_vm3, %v1287_v44  ;;  %876 = vst.msk [vmem:[%s1524_s18 + $0x34] sm:$0xf] %vm782_vm3, %v1303_v62  ;;  %v940_v8 = vmul.f32 0.5, %v892_v49  ;;  %v985_v6 = vsel %vm1695_vm14, %v1686_v25, %v1266_v57  ;;  %v1010_v11 = vadd.f32 %v1009_v3, %v1693_v14 }
 0x11c   : > { %v908_v5 = vand.u32 2147483647, %v892_v49  ;;  %v909_v9 = vand.u32 2147483647, %v893_v43  ;;  %v941_v10 = vmul.f32 0.5, %v893_v43  ;;  %v942_v12 = vmul.f32 0.5, %v894_v60 }
 0x11d   : > { %v956_v16 = vmul.f32 %v940_v8, %v892_v49  ;;  %v910_v17 = vand.u32 2147483647, %v894_v60  ;;  %v986_v18 = vsel %vm1731_vm0, %v954_v63, %v1267_v0  ;;  %v987_v19 = vsel %vm1739_vm1, %v955_v1, %v1268_v2 }
 0x11e   : > { %v1269_v50 = vadd.f32 -0.5, %v908_v5  ;;  %vm1750_vm2 = vcmp.le.f32.partialorder %v908_v5, 1.0  ;;  %v1011_v23 = vsel %vm991_vm6, %v985_v6, 0.0  ;;  %v957_v24 = vmul.f32 %v941_v10, %v893_v43 }
 0x11f   : > { %v1270_v25 = vadd.f32 -0.5, %v909_v9  ;;  %v1012_v29 = vadd.f32 %v1011_v23, %v1010_v11  ;;  %vm925_vm3 = vcmp.le.f32.partialorder %v909_v9, 1.0  ;;  %v1013_v31 = vsel %vm991_vm6, %v986_v18, 0.0 }
 0x120   : > { %v988_v28 = vsel %vm1750_vm2, %v956_v16, %v1269_v50  ;;  %v1015_v32 = vsel %vm991_vm6, %v987_v19, 0.0  ;;  %v958_v33 = vmul.f32 %v942_v12, %v894_v60  ;;  %v1271_v7 = vadd.f32 -0.5, %v910_v17 }
 0x121   : > { %v1014_v34 = vadd.f32 %v1013_v31, %v1012_v29  ;;  %vm926_vm4 = vcmp.le.f32.partialorder %v910_v17, 1.0  ;;  %v1017_v35 = vsel %vm991_vm6, %v988_v28, 0.0  ;;  %v989_v14 = vsel %vm925_vm3, %v957_v24, %v1270_v25 }
 0x122   : > { %v990_v37 = vsel %vm926_vm4, %v958_v33, %v1271_v7  ;;  %v1019_v40 = vsel %vm991_vm6, %v989_v14, 0.0  ;;  %v1032_v48 = vlaneseq }
 0x123   : > { %v1016_v36 = vadd.f32 %v1015_v32, %v1014_v34  ;;  %v1021_v42 = vsel %vm991_vm6, %v990_v37, 0.0 }
 0x124   : > { %v1033_v43 = vshrl.u32 %v1032_v48, 7  ;;  %v1035_v51 = vand.u32 127, %v1032_v48 }
 0x125   : > { %v1018_v39 = vadd.f32 %v1017_v35, %v1016_v36 }
 0x126   : > { %vm1036_vm5 = vcmp.eq.s32.totalorder %v1033_v43, 0  ;;  %vm1037_vm7 = vcmp.eq.s32.totalorder %v1035_v51, 0 }
 0x127   : > { %v1020_v41 = vadd.f32 %v1019_v40, %v1018_v39  ;;  %vm1038_vm8 = vmand %vm1036_vm5, %vm1037_vm7 }
 0x129   : > { %v1022_v45 = vadd.f32 %v1021_v42, %v1020_v41 }
 0x12b   : > { %1023 = vadd.xlane.f32.xlu0 %v1022_v45 }
 0x1b8   : > { %v1024_v46 = vpop.xlane.xlu0 %1023 }
 0x1b9   : > { %v1025_v47 = vrot.slane %v1024_v46, 4 }
 0x1bb   : > { %v1026_v13 = vadd.f32 %v1025_v47, %v1024_v46 }
 0x1bd   : > { %v1027_v15 = vrot.slane %v1026_v13, 2 }
 0x1bf   : > { %v1028_v20 = vadd.f32 %v1027_v15, %v1026_v13 }
 0x1c1   : > { %v1029_v21 = vrot.slane %v1028_v20, 1 }
 0x1c3   : > { %v1030_v38 = vadd.f32 %v1029_v21, %v1028_v20 }
 0x1c5   : > { %1366 = vpush %v1030_v38 }
 0x1f6   : > { %s1367_s25 = spop %1366 }
 0x1f7   : > { %v1039_v52 = vstv %s1367_s25 }
 0x1f8   : > { %v1040_v53 = vsel %vm1038_vm8, %v1039_v52, 0.0 }
 0x1f9   : > { %1041 = vst [vmem:[%s300_s24] sm:$0xff] %v1040_v53 }
 0x1fa PF: > { %s17_s21 = sadd.s32 1, %s1401_s21  }
 0x1fb   : > { %p14_p5 = scmp.ge.s32.totalorder %s17_s21, 6  }
 0x1fd   :  { %16 = sbr.rel (!%p14_p5) target bundleno = 1 (0x1), region = 93 }

// kernel: resnet_perceptual_loss.6
= control target key start
LH: loop header
LB: loop body
LE: loop exit
PB: predicated region body
PF: predicated region fallthrough
CT: control target
= control target key end

     0   :  { %s1310_s18 = smov 0   ;;  %s1521_s0 = inlined_call_operand.vmem [shape: bf16[512,144], index: 0, kind: input, shape index: {}]   ;;  %s1522_s1 = inlined_call_operand.vmem [shape: bf16[512,144], index: 1, kind: input, shape index: {}]   ;;  %s1523_s2 = inlined_call_operand.vmem [shape: bf16[144,16], index: 2, kind: input, shape index: {}]   ;;  %s1524_s3 = inlined_call_operand.vmem [shape: f32[1,16], index: 3, kind: input, shape index: {}]   ;;  %s1525_s4 = inlined_call_operand.vmem [shape: bf16[512,16], index: 4, kind: output, shape index: {0}]   ;;  %s1526_s5 = inlined_call_operand.vmem [shape: bf16[512,16], index: 5, kind: output, shape index: {1}]  }
   0x1 LB: > { %s1064_s19 = sadd.s32 4294967295, %s1277_s18   ;;  %p1068_p0 = scmp.ge.s32.totalorder %s1277_s18, 1  ;;  %s1277_s18 = sphi %s1310_s18, %s16_s18  }
   0x2   : > { %p204_p1 = scmp.lt.s32.totalorder %s1277_s18, 5 }
   0x4   : > { %p205_p2 = pnand %p1068_p0, %p204_p1 }
   0x5   : > { %v1214_v0 = vld [vmem:[%s1523_s2] sm:$0xff] (!%p205_p2)   ;;  %v1279_v1 = vmov (!%p205_p2), 0   ;;  %s1069_s22 = sshll.u32 (!%p205_p2), %s1064_s19, 4  ;;  %v1215_v2 = vld [vmem:[%s1523_s2 + $0x8] sm:$0xff] (!%p205_p2)   ;;  %v1216_v3 = vld [vmem:[%s1523_s2 + $0x10] sm:$0xff] (!%p205_p2)   ;;  %vm438_vm0 = vcmask (!%p205_p2), 130048  }
   0x6   : > { %208 = sbr.rel (%p205_p2) target bundleno = 319 (0x13f), region = 36  ;;  %463 = vmatprep.subr.bf16.mxu0 (!%p205_p2), %v1279_v1  ;;  %672 = vmatprep.subr.bf16.mxu1 (!%p205_p2), %v1279_v1  ;;  %p245_p3 = scmp.lt.s32.totalorder (!%p205_p2), %s1069_s22, 63  ;;  %v1217_v4 = vld [vmem:[%s1523_s2 + $0x18] sm:$0xff] (!%p205_p2)   ;;  %v1218_v7 = vld [vmem:[%s1523_s2 + $0x20] sm:$0xff] (!%p205_p2)   ;;  %v1219_v8 = vld [vmem:[%s1523_s2 + $0x28] sm:$0xff] (!%p205_p2)   ;;  %vm865_vm1 = vcmask (!%p205_p2), 125952  }
   0x7   : > { %464 = vmatpush1.bf16.msra.mxu0 (!%p205_p2), %v1214_v0  ;;  %673 = vmatpush1.bf16.msra.mxu1 (!%p205_p2), %v1214_v0  ;;  %v1220_v9 = vld [vmem:[%s1523_s2 + $0x30] sm:$0xff] (!%p205_p2)   ;;  %v1221_v10 = vld [vmem:[%s1523_s2 + $0x38] sm:$0xff] (!%p205_p2)   ;;  %v1222_v11 = vld [vmem:[%s1523_s2 + $0x40] sm:$0xff] (!%p205_p2)  }
   0x8   : > { %465 = vmatprep.subr.bf16.mxu0 (!%p205_p2), %v1279_v1  ;;  %674 = vmatprep.subr.bf16.mxu1 (!%p205_p2), %v1279_v1  ;;  %v1409_v42 = vld [vmem:[%s1524_s3] ss:$0 sm:$0xff] (!%p205_p2) }
   0xb   : > { %466 = vmatpush1.bf16.msra.mxu0 (!%p205_p2), %v1215_v2  ;;  %675 = vmatpush1.bf16.msra.mxu1 (!%p205_p2), %v1215_v2 }
   0xc   : > { %467 = vmatprep.subr.bf16.mxu0 (!%p205_p2), %v1279_v1  ;;  %676 = vmatprep.subr.bf16.mxu1 (!%p205_p2), %v1279_v1 }
   0xd   : > { %s1528_s22 = smov (!%p245_p3, %s1069_s22), 63 }
   0xe   : > { %s1171_s27 = sshll.u32 %s1528_s22, 3  ;;  %s1076_s25 = sshll.u32 %s1528_s22, 2 }
   0xf   : > { %s1333_s30 = scalar_lea.vmem %s1521_s0, %s1171_s27  ;;  %s1338_s8 = scalar_lea.vmem %s1522_s1, %s1171_s27  ;;  %468 = vmatpush1.bf16.msra.mxu0 %v1216_v3  ;;  %677 = vmatpush1.bf16.msra.mxu1 %v1216_v3 }
  0x10   : > { %v1225_v5 = vld [vmem:[%s1333_s30 + $0x4] ss:$8 sps:$4 sm:$0xff]   ;;  %469 = vmatprep.subr.bf16.mxu0 %v1279_v1  ;;  %678 = vmatprep.subr.bf16.mxu1 %v1279_v1  ;;  %v1223_v12 = vld [vmem:[%s1333_s30] ss:$8 sps:$4 sm:$0xff]   ;;  %v1229_v14 = vld [vmem:[%s1333_s30 + $0x14] ss:$8 sps:$4 sm:$0xff]   ;;  %s1419_s22 = scalar_lea.vmem %s1525_s4, %s1076_s25 }
  0x11   : > { %v1228_v6 = vld [vmem:[%s1338_s8 + $0x4] ss:$8 sps:$4 sm:$0xff]   ;;  %1105 = vmatprep.mubr.msk.bf16.mxu0 %vm438_vm0, %v1225_v5  ;;  %v1226_v13 = vld [vmem:[%s1338_s8] ss:$8 sps:$4 sm:$0xff]   ;;  %v1231_v15 = vld [vmem:[%s1338_s8 + $0x14] ss:$8 sps:$4 sm:$0xff]  }
  0x12   : > { %1129 = vmatprep.mubr.msk.bf16.mxu1 %vm438_vm0, %v1228_v6  ;;  %v1233_v16 = vld [vmem:[%s1333_s30 + $0x10] ss:$8 sps:$4 sm:$0xff]   ;;  %v1235_v18 = vld [vmem:[%s1333_s30 + $0x24] ss:$8 sps:$4 sm:$0xff]   ;;  %v1239_v20 = vld [vmem:[%s1333_s30 + $0x20] ss:$8 sps:$4 sm:$0xff]  }
  0x13   : > { %470 = vmatpush1.bf16.msra.mxu0 %v1217_v4  ;;  %679 = vmatpush1.bf16.msra.mxu1 %v1217_v4  ;;  %v1234_v17 = vld [vmem:[%s1338_s8 + $0x10] ss:$8 sps:$4 sm:$0xff]   ;;  %v1237_v19 = vld [vmem:[%s1338_s8 + $0x24] ss:$8 sps:$4 sm:$0xff]   ;;  %v1240_v21 = vld [vmem:[%s1338_s8 + $0x20] ss:$8 sps:$4 sm:$0xff]  }
  0x14   : > { %471 = vmatprep.subr.bf16.mxu0 %v1279_v1  ;;  %680 = vmatprep.subr.bf16.mxu1 %v1279_v1  ;;  %v1241_v22 = vld [vmem:[%s1333_s30 + $0x34] ss:$8 sps:$4 sm:$0xff]   ;;  %v1245_v24 = vld [vmem:[%s1333_s30 + $0x30] ss:$8 sps:$4 sm:$0xff]   ;;  %v1247_v26 = vld [vmem:[%s1333_s30 + $0x44] ss:$8 sps:$4 sm:$0xff]  }
  0x15   : > { %v1243_v23 = vld [vmem:[%s1338_s8 + $0x34] ss:$8 sps:$4 sm:$0xff]   ;;  %v1246_v25 = vld [vmem:[%s1338_s8 + $0x30] ss:$8 sps:$4 sm:$0xff]   ;;  %v1249_v27 = vld [vmem:[%s1338_s8 + $0x44] ss:$8 sps:$4 sm:$0xff]  }
  0x16   : > { %v1251_v28 = vld [vmem:[%s1333_s30 + $0x40] ss:$8 sps:$4 sm:$0xff]   ;;  %v1253_v30 = vld [vmem:[%s1333_s30 + $0x54] ss:$8 sps:$4 sm:$0xff]   ;;  %v1257_v32 = vld [vmem:[%s1333_s30 + $0x50] ss:$8 sps:$4 sm:$0xff]  }
  0x17   : > { %472 = vmatpush1.bf16.msra.mxu0 %v1218_v7  ;;  %681 = vmatpush1.bf16.msra.mxu1 %v1218_v7  ;;  %v1252_v29 = vld [vmem:[%s1338_s8 + $0x40] ss:$8 sps:$4 sm:$0xff]   ;;  %v1255_v31 = vld [vmem:[%s1338_s8 + $0x54] ss:$8 sps:$4 sm:$0xff]   ;;  %v1258_v33 = vld [vmem:[%s1338_s8 + $0x50] ss:$8 sps:$4 sm:$0xff]  }
  0x18   : > { %473 = vmatprep.subr.bf16.mxu0 %v1279_v1  ;;  %682 = vmatprep.subr.bf16.mxu1 %v1279_v1  ;;  %v1259_v34 = vld [vmem:[%s1333_s30 + $0x64] ss:$8 sps:$4 sm:$0xff]   ;;  %v1263_v36 = vld [vmem:[%s1333_s30 + $0x60] ss:$8 sps:$4 sm:$0xff]   ;;  %v1265_v38 = vld [vmem:[%s1333_s30 + $0x74] ss:$8 sps:$4 sm:$0xff]  }
  0x19   : > { %v1261_v35 = vld [vmem:[%s1338_s8 + $0x64] ss:$8 sps:$4 sm:$0xff]   ;;  %v1264_v37 = vld [vmem:[%s1338_s8 + $0x60] ss:$8 sps:$4 sm:$0xff]   ;;  %v1267_v39 = vld [vmem:[%s1338_s8 + $0x74] ss:$8 sps:$4 sm:$0xff]  }
  0x1a   : > { %v1269_v40 = vld [vmem:[%s1333_s30 + $0x70] ss:$8 sps:$4 sm:$0xff]   ;;  %s1424_s30 = scalar_lea.vmem %s1526_s5, %s1076_s25 }
  0x1b   : > { %474 = vmatpush1.bf16.msra.mxu0 %v1219_v8  ;;  %683 = vmatpush1.bf16.msra.mxu1 %v1219_v8  ;;  %v1270_v41 = vld [vmem:[%s1338_s8 + $0x70] ss:$8 sps:$4 sm:$0xff]  }
  0x1c   : > { %475 = vmatprep.subr.bf16.mxu0 %v1279_v1  ;;  %684 = vmatprep.subr.bf16.mxu1 %v1279_v1 }
  0x1f   : > { %476 = vmatpush1.bf16.msra.mxu0 %v1220_v9  ;;  %685 = vmatpush1.bf16.msra.mxu1 %v1220_v9 }
  0x20   : > { %477 = vmatprep.subr.bf16.mxu0 %v1279_v1  ;;  %686 = vmatprep.subr.bf16.mxu1 %v1279_v1 }
  0x23   : > { %478 = vmatpush1.bf16.msra.mxu0 %v1221_v10  ;;  %687 = vmatpush1.bf16.msra.mxu1 %v1221_v10 }
  0x24   : > { %479 = vmatprep.subr.bf16.mxu0 %v1279_v1  ;;  %688 = vmatprep.subr.bf16.mxu1 %v1279_v1 }
  0x27   : > { %480 = vmatpush1.bf16.msra.mxu0 %v1222_v11  ;;  %689 = vmatpush1.bf16.msra.mxu1 %v1222_v11 }
  0x2a   : > { %496 = vmatmul.mubr.bf16.vlgmr.msra.gmra.mrb[0].mxu0 %v1223_v12  ;;  %705 = vmatmul.mubr.bf16.vlgmr.msra.gmra.mrb[0].mxu1 %v1226_v13 }
  0x2b   : > { %1106 = vmatprep.mubr.msk.bf16.mxu0 %vm438_vm0, %v1229_v14  ;;  %1130 = vmatprep.mubr.msk.bf16.mxu1 %vm438_vm0, %v1231_v15 }
  0x32   : > { %504 = vmatmul.mubr.bf16.gmra.mrb[4].mxu0 %v1233_v16  ;;  %713 = vmatmul.mubr.bf16.gmra.mrb[4].mxu1 %v1234_v17 }
  0x33   : > { %1107 = vmatprep.mubr.msk.bf16.mxu0 %vm438_vm0, %v1235_v18  ;;  %1131 = vmatprep.mubr.msk.bf16.mxu1 %vm438_vm0, %v1237_v19 }
  0x3a   : > { %512 = vmatmul.mubr.bf16.gmra.mrb[8].mxu0 %v1239_v20  ;;  %721 = vmatmul.mubr.bf16.gmra.mrb[8].mxu1 %v1240_v21 }
  0x3b   : > { %1108 = vmatprep.mubr.msk.bf16.mxu0 %vm438_vm0, %v1241_v22  ;;  %1132 = vmatprep.mubr.msk.bf16.mxu1 %vm438_vm0, %v1243_v23 }
  0x42   : > { %520 = vmatmul.mubr.bf16.gmra.mrb[12].mxu0 %v1245_v24  ;;  %729 = vmatmul.mubr.bf16.gmra.mrb[12].mxu1 %v1246_v25 }
  0x43   : > { %1109 = vmatprep.mubr.msk.bf16.mxu0 %vm438_vm0, %v1247_v26  ;;  %1133 = vmatprep.mubr.msk.bf16.mxu1 %vm438_vm0, %v1249_v27 }
  0x4a   : > { %528 = vmatmul.mubr.bf16.gmra.mrb[16].mxu0 %v1251_v28  ;;  %737 = vmatmul.mubr.bf16.gmra.mrb[16].mxu1 %v1252_v29 }
  0x4b   : > { %1110 = vmatprep.mubr.msk.bf16.mxu0 %vm438_vm0, %v1253_v30  ;;  %1134 = vmatprep.mubr.msk.bf16.mxu1 %vm438_vm0, %v1255_v31 }
  0x52   : > { %536 = vmatmul.mubr.bf16.gmra.mrb[20].mxu0 %v1257_v32  ;;  %745 = vmatmul.mubr.bf16.gmra.mrb[20].mxu1 %v1258_v33 }
  0x53   : > { %1111 = vmatprep.mubr.msk.bf16.mxu0 %vm438_vm0, %v1259_v34  ;;  %1135 = vmatprep.mubr.msk.bf16.mxu1 %vm438_vm0, %v1261_v35 }
  0x5a   : > { %544 = vmatmul.mubr.bf16.gmra.mrb[24].mxu0 %v1263_v36  ;;  %753 = vmatmul.mubr.bf16.gmra.mrb[24].mxu1 %v1264_v37 }
  0x5b   : > { %1112 = vmatprep.mubr.msk.bf16.mxu0 %vm438_vm0, %v1265_v38  ;;  %1136 = vmatprep.mubr.msk.bf16.mxu1 %vm438_vm0, %v1267_v39 }
  0x62   : > { %552 = vmatmul.mubr.bf16.gmra.mrb[28].mxu0 %v1269_v40  ;;  %761 = vmatmul.mubr.bf16.gmra.mrb[28].mxu1 %v1270_v41 }
  0xfd   : > { %v497_v43 = vpop.f32.mrb[0].mxu0  ;;  %v706_v44 = vpop.f32.mrb[0].mxu1 }
  0xfe   : > { %v498_v45 = vadd.f32 %v1409_v42, %v497_v43  ;;  %v707_v46 = vadd.f32 %v1409_v42, %v706_v44  ;;  %v499_v47 = vpop.f32.mrb[1].mxu0  ;;  %v708_v48 = vpop.f32.mrb[1].mxu1 }
  0xff   : > { %v500_v49 = vpop.f32.mrb[2].mxu0  ;;  %v709_v50 = vpop.f32.mrb[2].mxu1 }
 0x100   : > { %v769_v51 = vmax.f32 %v498_v45, 0.0  ;;  %v785_v52 = vmax.f32 %v707_v46, 0.0  ;;  %v501_v53 = vadd.f32 %v1409_v42, %v500_v49  ;;  %v710_v54 = vadd.f32 %v1409_v42, %v709_v50  ;;  %v502_v55 = vpop.f32.mrb[3].mxu0  ;;  %v711_v56 = vpop.f32.mrb[3].mxu1 }
 0x102   : > { %v1173_v57 = vpack.c.bf16 %v769_v51, %v769_v51  ;;  %v1189_v58 = vpack.c.bf16 %v785_v52, %v785_v52  ;;  %v770_v59 = vmax.f32 %v501_v53, 0.0  ;;  %v786_v60 = vmax.f32 %v710_v54, 0.0 }
 0x104   : > { %866 = vst.msk [vmem:[%s1419_s22] sm:$0xf] %vm865_vm1, %v1173_v57  ;;  %946 = vst.msk [vmem:[%s1424_s30] sm:$0xf] %vm865_vm1, %v1189_v58  ;;  %v1174_v61 = vpack.c.bf16 %v770_v59, %v770_v59  ;;  %v1190_v62 = vpack.c.bf16 %v786_v60, %v786_v60 }
 0x105   : > { %v505_v63 = vpop.f32.mrb[4].mxu0  ;;  %v714_v0 = vpop.f32.mrb[4].mxu1 }
 0x106   : > { %867 = vst.msk [vmem:[%s1419_s22 + $0x4] sm:$0xf] %vm865_vm1, %v1174_v61  ;;  %947 = vst.msk [vmem:[%s1424_s30 + $0x4] sm:$0xf] %vm865_vm1, %v1190_v62  ;;  %v506_v1 = vadd.f32 %v1409_v42, %v505_v63  ;;  %v715_v2 = vadd.f32 %v1409_v42, %v714_v0  ;;  %v507_v3 = vpop.f32.mrb[5].mxu0  ;;  %v716_v4 = vpop.f32.mrb[5].mxu1 }
 0x107   : > { %v508_v5 = vpop.f32.mrb[6].mxu0  ;;  %v717_v6 = vpop.f32.mrb[6].mxu1 }
 0x108   : > { %v771_v7 = vmax.f32 %v506_v1, 0.0  ;;  %v787_v8 = vmax.f32 %v715_v2, 0.0  ;;  %v509_v9 = vadd.f32 %v1409_v42, %v508_v5  ;;  %v718_v10 = vadd.f32 %v1409_v42, %v717_v6  ;;  %v510_v11 = vpop.f32.mrb[7].mxu0  ;;  %v719_v12 = vpop.f32.mrb[7].mxu1 }
 0x10a   : > { %v1175_v13 = vpack.c.bf16 %v771_v7, %v771_v7  ;;  %v1191_v14 = vpack.c.bf16 %v787_v8, %v787_v8  ;;  %v772_v15 = vmax.f32 %v509_v9, 0.0  ;;  %v788_v16 = vmax.f32 %v718_v10, 0.0 }
 0x10c   : > { %868 = vst.msk [vmem:[%s1419_s22 + $0x8] sm:$0xf] %vm865_vm1, %v1175_v13  ;;  %948 = vst.msk [vmem:[%s1424_s30 + $0x8] sm:$0xf] %vm865_vm1, %v1191_v14  ;;  %v1176_v17 = vpack.c.bf16 %v772_v15, %v772_v15  ;;  %v1192_v18 = vpack.c.bf16 %v788_v16, %v788_v16 }
 0x10d   : > { %v513_v19 = vpop.f32.mrb[8].mxu0  ;;  %v722_v20 = vpop.f32.mrb[8].mxu1 }
 0x10e   : > { %869 = vst.msk [vmem:[%s1419_s22 + $0xc] sm:$0xf] %vm865_vm1, %v1176_v17  ;;  %949 = vst.msk [vmem:[%s1424_s30 + $0xc] sm:$0xf] %vm865_vm1, %v1192_v18  ;;  %v514_v21 = vadd.f32 %v1409_v42, %v513_v19  ;;  %v723_v22 = vadd.f32 %v1409_v42, %v722_v20  ;;  %v515_v23 = vpop.f32.mrb[9].mxu0  ;;  %v724_v24 = vpop.f32.mrb[9].mxu1 }
 0x10f   : > { %v516_v25 = vpop.f32.mrb[10].mxu0  ;;  %v725_v26 = vpop.f32.mrb[10].mxu1 }
 0x110   : > { %v773_v27 = vmax.f32 %v514_v21, 0.0  ;;  %v789_v28 = vmax.f32 %v723_v22, 0.0  ;;  %v517_v29 = vadd.f32 %v1409_v42, %v516_v25  ;;  %v726_v30 = vadd.f32 %v1409_v42, %v725_v26  ;;  %v518_v31 = vpop.f32.mrb[11].mxu0  ;;  %v727_v32 = vpop.f32.mrb[11].mxu1 }
 0x112   : > { %v1177_v33 = vpack.c.bf16 %v773_v27, %v773_v27  ;;  %v1193_v34 = vpack.c.bf16 %v789_v28, %v789_v28  ;;  %v774_v35 = vmax.f32 %v517_v29, 0.0  ;;  %v790_v36 = vmax.f32 %v726_v30, 0.0 }
 0x114   : > { %870 = vst.msk [vmem:[%s1419_s22 + $0x10] sm:$0xf] %vm865_vm1, %v1177_v33  ;;  %950 = vst.msk [vmem:[%s1424_s30 + $0x10] sm:$0xf] %vm865_vm1, %v1193_v34  ;;  %v1178_v37 = vpack.c.bf16 %v774_v35, %v774_v35  ;;  %v1194_v38 = vpack.c.bf16 %v790_v36, %v790_v36 }
 0x115   : > { %v521_v39 = vpop.f32.mrb[12].mxu0  ;;  %v730_v40 = vpop.f32.mrb[12].mxu1 }
 0x116   : > { %871 = vst.msk [vmem:[%s1419_s22 + $0x14] sm:$0xf] %vm865_vm1, %v1178_v37  ;;  %951 = vst.msk [vmem:[%s1424_s30 + $0x14] sm:$0xf] %vm865_vm1, %v1194_v38  ;;  %v522_v41 = vadd.f32 %v1409_v42, %v521_v39  ;;  %v731_v43 = vadd.f32 %v1409_v42, %v730_v40  ;;  %v523_v44 = vpop.f32.mrb[13].mxu0  ;;  %v732_v45 = vpop.f32.mrb[13].mxu1 }
 0x117   : > { %v524_v46 = vpop.f32.mrb[14].mxu0  ;;  %v733_v47 = vpop.f32.mrb[14].mxu1 }
 0x118   : > { %v775_v48 = vmax.f32 %v522_v41, 0.0  ;;  %v791_v49 = vmax.f32 %v731_v43, 0.0  ;;  %v525_v50 = vadd.f32 %v1409_v42, %v524_v46  ;;  %v734_v51 = vadd.f32 %v1409_v42, %v733_v47  ;;  %v526_v52 = vpop.f32.mrb[15].mxu0  ;;  %v735_v53 = vpop.f32.mrb[15].mxu1 }
 0x11a   : > { %v1179_v54 = vpack.c.bf16 %v775_v48, %v775_v48  ;;  %v1195_v55 = vpack.c.bf16 %v791_v49, %v791_v49  ;;  %v776_v56 = vmax.f32 %v525_v50, 0.0  ;;  %v792_v57 = vmax.f32 %v734_v51, 0.0 }
 0x11c   : > { %872 = vst.msk [vmem:[%s1419_s22 + $0x18] sm:$0xf] %vm865_vm1, %v1179_v54  ;;  %952 = vst.msk [vmem:[%s1424_s30 + $0x18] sm:$0xf] %vm865_vm1, %v1195_v55  ;;  %v1180_v58 = vpack.c.bf16 %v776_v56, %v776_v56  ;;  %v1196_v59 = vpack.c.bf16 %v792_v57, %v792_v57 }
 0x11d   : > { %v529_v60 = vpop.f32.mrb[16].mxu0  ;;  %v738_v61 = vpop.f32.mrb[16].mxu1 }
 0x11e   : > { %873 = vst.msk [vmem:[%s1419_s22 + $0x1c] sm:$0xf] %vm865_vm1, %v1180_v58  ;;  %953 = vst.msk [vmem:[%s1424_s30 + $0x1c] sm:$0xf] %vm865_vm1, %v1196_v59  ;;  %v530_v62 = vadd.f32 %v1409_v42, %v529_v60  ;;  %v739_v63 = vadd.f32 %v1409_v42, %v738_v61  ;;  %v531_v0 = vpop.f32.mrb[17].mxu0  ;;  %v740_v1 = vpop.f32.mrb[17].mxu1 }
 0x11f   : > { %v532_v2 = vpop.f32.mrb[18].mxu0  ;;  %v741_v3 = vpop.f32.mrb[18].mxu1 }
 0x120   : > { %v777_v4 = vmax.f32 %v530_v62, 0.0  ;;  %v793_v5 = vmax.f32 %v739_v63, 0.0  ;;  %v533_v6 = vadd.f32 %v1409_v42, %v532_v2  ;;  %v742_v7 = vadd.f32 %v1409_v42, %v741_v3  ;;  %v534_v8 = vpop.f32.mrb[19].mxu0  ;;  %v743_v9 = vpop.f32.mrb[19].mxu1 }
 0x122   : > { %v1181_v10 = vpack.c.bf16 %v777_v4, %v777_v4  ;;  %v1197_v11 = vpack.c.bf16 %v793_v5, %v793_v5  ;;  %v778_v12 = vmax.f32 %v533_v6, 0.0  ;;  %v794_v13 = vmax.f32 %v742_v7, 0.0 }
 0x124   : > { %874 = vst.msk [vmem:[%s1419_s22 + $0x20] sm:$0xf] %vm865_vm1, %v1181_v10  ;;  %954 = vst.msk [vmem:[%s1424_s30 + $0x20] sm:$0xf] %vm865_vm1, %v1197_v11  ;;  %v1182_v14 = vpack.c.bf16 %v778_v12, %v778_v12  ;;  %v1198_v15 = vpack.c.bf16 %v794_v13, %v794_v13 }
 0x125   : > { %v537_v16 = vpop.f32.mrb[20].mxu0  ;;  %v746_v17 = vpop.f32.mrb[20].mxu1 }
 0x126   : > { %875 = vst.msk [vmem:[%s1419_s22 + $0x24] sm:$0xf] %vm865_vm1, %v1182_v14  ;;  %955 = vst.msk [vmem:[%s1424_s30 + $0x24] sm:$0xf] %vm865_vm1, %v1198_v15  ;;  %v538_v18 = vadd.f32 %v1409_v42, %v537_v16  ;;  %v747_v19 = vadd.f32 %v1409_v42, %v746_v17  ;;  %v539_v20 = vpop.f32.mrb[21].mxu0  ;;  %v748_v21 = vpop.f32.mrb[21].mxu1 }
 0x127   : > { %v540_v22 = vpop.f32.mrb[22].mxu0  ;;  %v749_v23 = vpop.f32.mrb[22].mxu1 }
 0x128   : > { %v779_v24 = vmax.f32 %v538_v18, 0.0  ;;  %v795_v25 = vmax.f32 %v747_v19, 0.0  ;;  %v541_v26 = vadd.f32 %v1409_v42, %v540_v22  ;;  %v750_v27 = vadd.f32 %v1409_v42, %v749_v23  ;;  %v542_v28 = vpop.f32.mrb[23].mxu0  ;;  %v751_v29 = vpop.f32.mrb[23].mxu1 }
 0x12a   : > { %v1183_v30 = vpack.c.bf16 %v779_v24, %v779_v24  ;;  %v1199_v31 = vpack.c.bf16 %v795_v25, %v795_v25  ;;  %v780_v32 = vmax.f32 %v541_v26, 0.0  ;;  %v796_v33 = vmax.f32 %v750_v27, 0.0 }
 0x12c   : > { %876 = vst.msk [vmem:[%s1419_s22 + $0x28] sm:$0xf] %vm865_vm1, %v1183_v30  ;;  %956 = vst.msk [vmem:[%s1424_s30 + $0x28] sm:$0xf] %vm865_vm1, %v1199_v31  ;;  %v1184_v34 = vpack.c.bf16 %v780_v32, %v780_v32  ;;  %v1200_v35 = vpack.c.bf16 %v796_v33, %v796_v33 }
 0x12d   : > { %v545_v36 = vpop.f32.mrb[24].mxu0  ;;  %v754_v37 = vpop.f32.mrb[24].mxu1 }
 0x12e   : > { %877 = vst.msk [vmem:[%s1419_s22 + $0x2c] sm:$0xf] %vm865_vm1, %v1184_v34  ;;  %957 = vst.msk [vmem:[%s1424_s30 + $0x2c] sm:$0xf] %vm865_vm1, %v1200_v35  ;;  %v546_v38 = vadd.f32 %v1409_v42, %v545_v36  ;;  %v755_v39 = vadd.f32 %v1409_v42, %v754_v37  ;;  %v547_v40 = vpop.f32.mrb[25].mxu0  ;;  %v756_v41 = vpop.f32.mrb[25].mxu1 }
 0x12f   : > { %v548_v43 = vpop.f32.mrb[26].mxu0  ;;  %v757_v44 = vpop.f32.mrb[26].mxu1 }
 0x130   : > { %v781_v45 = vmax.f32 %v546_v38, 0.0  ;;  %v797_v46 = vmax.f32 %v755_v39, 0.0  ;;  %v549_v47 = vadd.f32 %v1409_v42, %v548_v43  ;;  %v758_v48 = vadd.f32 %v1409_v42, %v757_v44  ;;  %v550_v49 = vpop.f32.mrb[27].mxu0  ;;  %v759_v50 = vpop.f32.mrb[27].mxu1 }
 0x132   : > { %v1185_v51 = vpack.c.bf16 %v781_v45, %v781_v45  ;;  %v1201_v52 = vpack.c.bf16 %v797_v46, %v797_v46  ;;  %v782_v53 = vmax.f32 %v549_v47, 0.0  ;;  %v798_v54 = vmax.f32 %v758_v48, 0.0 }
 0x134   : > { %878 = vst.msk [vmem:[%s1419_s22 + $0x30] sm:$0xf] %vm865_vm1, %v1185_v51  ;;  %958 = vst.msk [vmem:[%s1424_s30 + $0x30] sm:$0xf] %vm865_vm1, %v1201_v52  ;;  %v1186_v55 = vpack.c.bf16 %v782_v53, %v782_v53  ;;  %v1202_v56 = vpack.c.bf16 %v798_v54, %v798_v54 }
 0x135   : > { %v553_v57 = vpop.f32.mrb[28].mxu0  ;;  %v762_v58 = vpop.f32.mrb[28].mxu1 }
 0x136   : > { %879 = vst.msk [vmem:[%s1419_s22 + $0x34] sm:$0xf] %vm865_vm1, %v1186_v55  ;;  %959 = vst.msk [vmem:[%s1424_s30 + $0x34] sm:$0xf] %vm865_vm1, %v1202_v56  ;;  %v554_v59 = vadd.f32 %v1409_v42, %v553_v57  ;;  %v763_v60 = vadd.f32 %v1409_v42, %v762_v58  ;;  %v555_v61 = vpop.f32.mrb[29].mxu0  ;;  %v764_v62 = vpop.f32.mrb[29].mxu1 }
 0x137   : > { %v556_v63 = vpop.f32.mrb[30].mxu0  ;;  %v765_v0 = vpop.f32.mrb[30].mxu1 }
 0x138   : > { %v783_v1 = vmax.f32 %v554_v59, 0.0  ;;  %v799_v2 = vmax.f32 %v763_v60, 0.0  ;;  %v557_v3 = vadd.f32 %v1409_v42, %v556_v63  ;;  %v766_v4 = vadd.f32 %v1409_v42, %v765_v0  ;;  %v558_v5 = vpop.f32.mrb[31].mxu0  ;;  %v767_v6 = vpop.f32.mrb[31].mxu1 }
 0x13a   : > { %v1187_v7 = vpack.c.bf16 %v783_v1, %v783_v1  ;;  %v1203_v8 = vpack.c.bf16 %v799_v2, %v799_v2  ;;  %v784_v9 = vmax.f32 %v557_v3, 0.0  ;;  %v800_v10 = vmax.f32 %v766_v4, 0.0 }
 0x13c   : > { %880 = vst.msk [vmem:[%s1419_s22 + $0x38] sm:$0xf] %vm865_vm1, %v1187_v7  ;;  %960 = vst.msk [vmem:[%s1424_s30 + $0x38] sm:$0xf] %vm865_vm1, %v1203_v8  ;;  %v1188_v11 = vpack.c.bf16 %v784_v9, %v784_v9  ;;  %v1204_v12 = vpack.c.bf16 %v800_v10, %v800_v10 }
 0x13e   : > { %881 = vst.msk [vmem:[%s1419_s22 + $0x3c] sm:$0xf] %vm865_vm1, %v1188_v11  ;;  %961 = vst.msk [vmem:[%s1424_s30 + $0x3c] sm:$0xf] %vm865_vm1, %v1204_v12 }
 0x13f PF: > { %s16_s18 = sadd.s32 1, %s1277_s18  }
 0x140   : > { %p13_p4 = scmp.ge.s32.totalorder %s16_s18, 6  }
 0x142   :  { %15 = sbr.rel (!%p13_p4) target bundleno = 1 (0x1), region = 81 }

// kernel: resnet_perceptual_loss.7
= control target key start
LH: loop header
LB: loop body
LE: loop exit
PB: predicated region body
PF: predicated region fallthrough
CT: control target
= control target key end

     0   :  { %s1874_s27 = smov 0   ;;  %s2321_s0 = inlined_call_operand.vmem [shape: bf16[512,144], index: 0, kind: input, shape index: {}]   ;;  %s2322_s1 = inlined_call_operand.vmem [shape: bf16[512,144], index: 1, kind: input, shape index: {}]   ;;  %s2323_s2 = inlined_call_operand.vmem [shape: bf16[144,16], index: 2, kind: input, shape index: {}]   ;;  %s2324_s3 = inlined_call_operand.vmem [shape: f32[1,16], index: 3, kind: input, shape index: {}]   ;;  %s2325_s4 = inlined_call_operand.vmem [shape: bf16[512,16], index: 4, kind: input, shape index: {}]   ;;  %s2326_s5 = inlined_call_operand.vmem [shape: bf16[512,16], index: 5, kind: input, shape index: {}]   ;;  %s2327_s6 = inlined_call_operand.vmem [shape: bf16[512,16], index: 6, kind: output, shape index: {0}]   ;;  %s2328_s7 = inlined_call_operand.vmem [shape: bf16[512,16], index: 7, kind: output, shape index: {1}]   ;;  %s2329_s8 = inlined_call_operand.vmem [shape: f32[32,128], index: 8, kind: output, shape index: {2}]  }
   0x1 LB: > { %s1880_s28 = sadd.s32 4294967295, %s1826_s27   ;;  %p1516_p0 = scmp.ge.s32.totalorder %s1826_s27, 1  ;;  %s1826_s27 = sphi %s1874_s27, %s19_s27  }
   0x2   : > { %p303_p1 = scmp.lt.s32.totalorder %s1826_s27, 5 }
   0x4   : > { %p304_p2 = pnand %p1516_p0, %p303_p1 }
   0x5   : > { %v1763_v0 = vld [vmem:[%s2323_s2] sm:$0xff] (!%p304_p2)   ;;  %v1828_v1 = vmov (!%p304_p2), 0   ;;  %s1517_s9 = sshll.u32 (!%p304_p2), %s1880_s28, 4  ;;  %v1764_v2 = vld [vmem:[%s2323_s2 + $0x8] sm:$0xff] (!%p304_p2)   ;;  %v1765_v3 = vld [vmem:[%s2323_s2 + $0x10] sm:$0xff] (!%p304_p2)   ;;  %vm573_vm0 = vcmask (!%p304_p2), 130048  }
   0x6   : > { %307 = sbr.rel (%p304_p2) target bundleno = 544 (0x220), region = 44  ;;  %598 = vmatprep.subr.bf16.mxu0 (!%p304_p2), %v1828_v1  ;;  %807 = vmatprep.subr.bf16.mxu1 (!%p304_p2), %v1828_v1  ;;  %p364_p3 = scmp.lt.s32.totalorder (!%p304_p2), %s1517_s9, 63  ;;  %v1766_v4 = vld [vmem:[%s2323_s2 + $0x18] sm:$0xff] (!%p304_p2)   ;;  %v1767_v7 = vld [vmem:[%s2323_s2 + $0x20] sm:$0xff] (!%p304_p2)   ;;  %v1768_v8 = vld [vmem:[%s2323_s2 + $0x28] sm:$0xff] (!%p304_p2)   ;;  %vm1096_vm1 = vcmask (!%p304_p2), 125952  }
   0x7   : > { %599 = vmatpush1.bf16.msra.mxu0 (!%p304_p2), %v1763_v0  ;;  %808 = vmatpush1.bf16.msra.mxu1 (!%p304_p2), %v1763_v0  ;;  %v1769_v9 = vld [vmem:[%s2323_s2 + $0x30] sm:$0xff] (!%p304_p2)   ;;  %v1770_v10 = vld [vmem:[%s2323_s2 + $0x38] sm:$0xff] (!%p304_p2)   ;;  %v1771_v11 = vld [vmem:[%s2323_s2 + $0x40] sm:$0xff] (!%p304_p2)   ;;  %p401_p4 = scmp.lt.s32.totalorder (!%p304_p2), %s1880_s28, 3 }
   0x8   : > { %600 = vmatprep.subr.bf16.mxu0 (!%p304_p2), %v1828_v1  ;;  %809 = vmatprep.subr.bf16.mxu1 (!%p304_p2), %v1828_v1  ;;  %v1996_v45 = vld [vmem:[%s2324_s3] ss:$0 sm:$0xff] (!%p304_p2) }
   0xb   : > { %601 = vmatpush1.bf16.msra.mxu0 (!%p304_p2), %v1764_v2  ;;  %810 = vmatpush1.bf16.msra.mxu1 (!%p304_p2), %v1764_v2 }
   0xc   : > { %602 = vmatprep.subr.bf16.mxu0 (!%p304_p2), %v1828_v1  ;;  %811 = vmatprep.subr.bf16.mxu1 (!%p304_p2), %v1828_v1 }
   0xd   : > { %s2351_s9 = smov (!%p364_p3, %s1517_s9), 63  ;;  %s2353_s28 = smov (!%p401_p4, %s1880_s28), 3 }
   0xe   : > { %s1640_s14 = sshll.u32 %s2351_s9, 3  ;;  %s1531_s30 = sshll.u32 %s2353_s28, 3 }
   0xf   : > { %s1900_s17 = scalar_lea.vmem %s2321_s0, %s1640_s14  ;;  %s1905_s20 = scalar_lea.vmem %s2322_s1, %s1640_s14  ;;  %603 = vmatpush1.bf16.msra.mxu0 %v1765_v3  ;;  %812 = vmatpush1.bf16.msra.mxu1 %v1765_v3 }
  0x10   : > { %v1774_v5 = vld [vmem:[%s1900_s17 + $0x4] ss:$8 sps:$4 sm:$0xff]   ;;  %604 = vmatprep.subr.bf16.mxu0 %v1828_v1  ;;  %813 = vmatprep.subr.bf16.mxu1 %v1828_v1  ;;  %v1772_v12 = vld [vmem:[%s1900_s17] ss:$8 sps:$4 sm:$0xff]   ;;  %v1778_v14 = vld [vmem:[%s1900_s17 + $0x14] ss:$8 sps:$4 sm:$0xff]   ;;  %s404_s12 = scalar_lea.vmem %s2329_s8, %s1531_s30 }
  0x11   : > { %v1777_v6 = vld [vmem:[%s1905_s20 + $0x4] ss:$8 sps:$4 sm:$0xff]   ;;  %1558 = vmatprep.mubr.msk.bf16.mxu0 %vm573_vm0, %v1774_v5  ;;  %v1775_v13 = vld [vmem:[%s1905_s20] ss:$8 sps:$4 sm:$0xff]   ;;  %v1780_v15 = vld [vmem:[%s1905_s20 + $0x14] ss:$8 sps:$4 sm:$0xff]  }
  0x12   : > { %1582 = vmatprep.mubr.msk.bf16.mxu1 %vm573_vm0, %v1777_v6  ;;  %v1782_v16 = vld [vmem:[%s1900_s17 + $0x10] ss:$8 sps:$4 sm:$0xff]   ;;  %v1784_v18 = vld [vmem:[%s1900_s17 + $0x24] ss:$8 sps:$4 sm:$0xff]   ;;  %v1788_v20 = vld [vmem:[%s1900_s17 + $0x20] ss:$8 sps:$4 sm:$0xff]  }
  0x13   : > { %605 = vmatpush1.bf16.msra.mxu0 %v1766_v4  ;;  %814 = vmatpush1.bf16.msra.mxu1 %v1766_v4  ;;  %v1783_v17 = vld [vmem:[%s1905_s20 + $0x10] ss:$8 sps:$4 sm:$0xff]   ;;  %v1786_v19 = vld [vmem:[%s1905_s20 + $0x24] ss:$8 sps:$4 sm:$0xff]   ;;  %v1789_v21 = vld [vmem:[%s1905_s20 + $0x20] ss:$8 sps:$4 sm:$0xff]  }
  0x14   : > { %606 = vmatprep.subr.bf16.mxu0 %v1828_v1  ;;  %815 = vmatprep.subr.bf16.mxu1 %v1828_v1  ;;  %v1790_v22 = vld [vmem:[%s1900_s17 + $0x34] ss:$8 sps:$4 sm:$0xff]   ;;  %v1794_v24 = vld [vmem:[%s1900_s17 + $0x30] ss:$8 sps:$4 sm:$0xff]   ;;  %v1796_v26 = vld [vmem:[%s1900_s17 + $0x44] ss:$8 sps:$4 sm:$0xff]  }
  0x15   : > { %v1792_v23 = vld [vmem:[%s1905_s20 + $0x34] ss:$8 sps:$4 sm:$0xff]   ;;  %v1795_v25 = vld [vmem:[%s1905_s20 + $0x30] ss:$8 sps:$4 sm:$0xff]   ;;  %v1798_v27 = vld [vmem:[%s1905_s20 + $0x44] ss:$8 sps:$4 sm:$0xff]  }
  0x16   : > { %v1800_v28 = vld [vmem:[%s1900_s17 + $0x40] ss:$8 sps:$4 sm:$0xff]   ;;  %v1802_v30 = vld [vmem:[%s1900_s17 + $0x54] ss:$8 sps:$4 sm:$0xff]   ;;  %v1806_v32 = vld [vmem:[%s1900_s17 + $0x50] ss:$8 sps:$4 sm:$0xff]  }
  0x17   : > { %607 = vmatpush1.bf16.msra.mxu0 %v1767_v7  ;;  %816 = vmatpush1.bf16.msra.mxu1 %v1767_v7  ;;  %v1801_v29 = vld [vmem:[%s1905_s20 + $0x40] ss:$8 sps:$4 sm:$0xff]   ;;  %v1804_v31 = vld [vmem:[%s1905_s20 + $0x54] ss:$8 sps:$4 sm:$0xff]   ;;  %v1807_v33 = vld [vmem:[%s1905_s20 + $0x50] ss:$8 sps:$4 sm:$0xff]  }
  0x18   : > { %608 = vmatprep.subr.bf16.mxu0 %v1828_v1  ;;  %817 = vmatprep.subr.bf16.mxu1 %v1828_v1  ;;  %v1808_v34 = vld [vmem:[%s1900_s17 + $0x64] ss:$8 sps:$4 sm:$0xff]   ;;  %v1812_v36 = vld [vmem:[%s1900_s17 + $0x60] ss:$8 sps:$4 sm:$0xff]   ;;  %v1814_v38 = vld [vmem:[%s1900_s17 + $0x74] ss:$8 sps:$4 sm:$0xff]  }
  0x19   : > { %v1810_v35 = vld [vmem:[%s1905_s20 + $0x64] ss:$8 sps:$4 sm:$0xff]   ;;  %v1813_v37 = vld [vmem:[%s1905_s20 + $0x60] ss:$8 sps:$4 sm:$0xff]   ;;  %v1816_v39 = vld [vmem:[%s1905_s20 + $0x74] ss:$8 sps:$4 sm:$0xff]  }
  0x1a   : > { %v1818_v40 = vld [vmem:[%s1900_s17 + $0x70] ss:$8 sps:$4 sm:$0xff]   ;;  %s1974_s14 = sshll.u32 %s2351_s9, 2 }
  0x1b   : > { %609 = vmatpush1.bf16.msra.mxu0 %v1768_v8  ;;  %818 = vmatpush1.bf16.msra.mxu1 %v1768_v8  ;;  %v1819_v41 = vld [vmem:[%s1905_s20 + $0x70] ss:$8 sps:$4 sm:$0xff]   ;;  %s1980_s18 = scalar_lea.vmem %s2325_s4, %s1974_s14  ;;  %s1986_s22 = scalar_lea.vmem %s2326_s5, %s1974_s14 }
  0x1c   : > { %610 = vmatprep.subr.bf16.mxu0 %v1828_v1  ;;  %819 = vmatprep.subr.bf16.mxu1 %v1828_v1  ;;  %v1675_v42 = vld [vmem:[%s1980_s18] sm:$0xff]   ;;  %v1991_v44 = vld [vmem:[%s1980_s18 + $0x8] sm:$0xff]   ;;  %v2002_v49 = vld [vmem:[%s1980_s18 + $0x10] sm:$0xff]   ;;  %s2044_s24 = scalar_lea.vmem %s2327_s6, %s1974_s14  ;;  %s2050_s29 = scalar_lea.vmem %s2328_s7, %s1974_s14 }
  0x1d   : > { %v1707_v43 = vld [vmem:[%s1986_s22] sm:$0xff]   ;;  %v1999_v46 = vld [vmem:[%s1986_s22 + $0x8] sm:$0xff]   ;;  %v1676_v47 = vunpack.c.l.bf16 %v1675_v42  ;;  %v2005_v50 = vld [vmem:[%s1986_s22 + $0x10] sm:$0xff]   ;;  %v1677_v53 = vunpack.c.h.bf16 %v1675_v42  ;;  %v1680_v55 = vunpack.c.l.bf16 %v1991_v44  ;;  %v1681_v61 = vunpack.c.h.bf16 %v1991_v44 }
  0x1e   : > { %v1708_v48 = vunpack.c.l.bf16 %v1707_v43  ;;  %v1709_v54 = vunpack.c.h.bf16 %v1707_v43  ;;  %v1712_v60 = vunpack.c.l.bf16 %v1999_v46  ;;  %v2013_v62 = vld [vmem:[%s1980_s18 + $0x18] sm:$0xff]   ;;  %v1713_v2 = vunpack.c.h.bf16 %v1999_v46 }
  0x1f   : > { %611 = vmatpush1.bf16.msra.mxu0 %v1769_v9  ;;  %820 = vmatpush1.bf16.msra.mxu1 %v1769_v9  ;;  %v2016_v63 = vld [vmem:[%s1986_s22 + $0x18] sm:$0xff]   ;;  %v1684_v3 = vunpack.c.l.bf16 %v2002_v49  ;;  %v1716_v4 = vunpack.c.l.bf16 %v2005_v50  ;;  %v1685_v5 = vunpack.c.h.bf16 %v2002_v49 }
  0x20   : > { %612 = vmatprep.subr.bf16.mxu0 %v1828_v1  ;;  %821 = vmatprep.subr.bf16.mxu1 %v1828_v1 }
  0x23   : > { %613 = vmatpush1.bf16.msra.mxu0 %v1770_v10  ;;  %822 = vmatpush1.bf16.msra.mxu1 %v1770_v10 }
  0x24   : > { %614 = vmatprep.subr.bf16.mxu0 %v1828_v1  ;;  %823 = vmatprep.subr.bf16.mxu1 %v1828_v1 }
  0x27   : > { %615 = vmatpush1.bf16.msra.mxu0 %v1771_v11  ;;  %824 = vmatpush1.bf16.msra.mxu1 %v1771_v11 }
  0x2a   : > { %631 = vmatmul.mubr.bf16.vlgmr.msra.gmra.mrb[0].mxu0 %v1772_v12  ;;  %840 = vmatmul.mubr.bf16.vlgmr.msra.gmra.mrb[0].mxu1 %v1775_v13  ;;  %v2025_v12 = vld [vmem:[%s1980_s18 + $0x20] sm:$0xff]  }
  0x2b   : > { %1559 = vmatprep.mubr.msk.bf16.mxu0 %vm573_vm0, %v1778_v14  ;;  %1583 = vmatprep.mubr.msk.bf16.mxu1 %vm573_vm0, %v1780_v15  ;;  %v2028_v13 = vld [vmem:[%s1986_s22 + $0x20] sm:$0xff]   ;;  %v1717_v14 = vunpack.c.h.bf16 %v2005_v50  ;;  %v1688_v15 = vunpack.c.l.bf16 %v2013_v62 }
  0x32   : > { %639 = vmatmul.mubr.bf16.gmra.mrb[4].mxu0 %v1782_v16  ;;  %848 = vmatmul.mubr.bf16.gmra.mrb[4].mxu1 %v1783_v17  ;;  %v1720_v16 = vunpack.c.l.bf16 %v2016_v63  ;;  %v1689_v17 = vunpack.c.h.bf16 %v2013_v62 }
  0x33   : > { %1560 = vmatprep.mubr.msk.bf16.mxu0 %vm573_vm0, %v1784_v18  ;;  %1584 = vmatprep.mubr.msk.bf16.mxu1 %vm573_vm0, %v1786_v19 }
  0x3a   : > { %647 = vmatmul.mubr.bf16.gmra.mrb[8].mxu0 %v1788_v20  ;;  %856 = vmatmul.mubr.bf16.gmra.mrb[8].mxu1 %v1789_v21 }
  0x3b   : > { %1561 = vmatprep.mubr.msk.bf16.mxu0 %vm573_vm0, %v1790_v22  ;;  %1585 = vmatprep.mubr.msk.bf16.mxu1 %vm573_vm0, %v1792_v23  ;;  %v2035_v22 = vld [vmem:[%s1980_s18 + $0x28] sm:$0xff]  }
  0x3c   : > { %v2038_v23 = vld [vmem:[%s1986_s22 + $0x28] sm:$0xff]  }
  0x42   : > { %655 = vmatmul.mubr.bf16.gmra.mrb[12].mxu0 %v1794_v24  ;;  %864 = vmatmul.mubr.bf16.gmra.mrb[12].mxu1 %v1795_v25  ;;  %v1721_v24 = vunpack.c.h.bf16 %v2016_v63  ;;  %v1692_v25 = vunpack.c.l.bf16 %v2025_v12 }
  0x43   : > { %1562 = vmatprep.mubr.msk.bf16.mxu0 %vm573_vm0, %v1796_v26  ;;  %1586 = vmatprep.mubr.msk.bf16.mxu1 %vm573_vm0, %v1798_v27  ;;  %v1724_v26 = vunpack.c.l.bf16 %v2028_v13  ;;  %v1693_v27 = vunpack.c.h.bf16 %v2025_v12 }
  0x4a   : > { %663 = vmatmul.mubr.bf16.gmra.mrb[16].mxu0 %v1800_v28  ;;  %872 = vmatmul.mubr.bf16.gmra.mrb[16].mxu1 %v1801_v29 }
  0x4b   : > { %1563 = vmatprep.mubr.msk.bf16.mxu0 %vm573_vm0, %v1802_v30  ;;  %1587 = vmatprep.mubr.msk.bf16.mxu1 %vm573_vm0, %v1804_v31 }
  0x52   : > { %671 = vmatmul.mubr.bf16.gmra.mrb[20].mxu0 %v1806_v32  ;;  %880 = vmatmul.mubr.bf16.gmra.mrb[20].mxu1 %v1807_v33 }
  0x53   : > { %1564 = vmatprep.mubr.msk.bf16.mxu0 %vm573_vm0, %v1808_v34  ;;  %1588 = vmatprep.mubr.msk.bf16.mxu1 %vm573_vm0, %v1810_v35  ;;  %v1725_v35 = vunpack.c.h.bf16 %v2028_v13 }
  0x5a   : > { %679 = vmatmul.mubr.bf16.gmra.mrb[24].mxu0 %v1812_v36  ;;  %888 = vmatmul.mubr.bf16.gmra.mrb[24].mxu1 %v1813_v37  ;;  %v1696_v36 = vunpack.c.l.bf16 %v2035_v22  ;;  %v1728_v37 = vunpack.c.l.bf16 %v2038_v23 }
  0x5b   : > { %1565 = vmatprep.mubr.msk.bf16.mxu0 %vm573_vm0, %v1814_v38  ;;  %1589 = vmatprep.mubr.msk.bf16.mxu1 %vm573_vm0, %v1816_v39 }
  0x62   : > { %687 = vmatmul.mubr.bf16.gmra.mrb[28].mxu0 %v1818_v40  ;;  %896 = vmatmul.mubr.bf16.gmra.mrb[28].mxu1 %v1819_v41 }
  0xfd   : > { %v632_v51 = vpop.f32.mrb[0].mxu0  ;;  %v841_v52 = vpop.f32.mrb[0].mxu1 }
  0xfe   : > { %v633_v56 = vadd.f32 %v1996_v45, %v632_v51  ;;  %v842_v57 = vadd.f32 %v1996_v45, %v841_v52  ;;  %v634_v58 = vpop.f32.mrb[1].mxu0  ;;  %v843_v59 = vpop.f32.mrb[1].mxu1 }
  0xff   : > { %v635_v0 = vpop.f32.mrb[2].mxu0  ;;  %v844_v1 = vpop.f32.mrb[2].mxu1 }
 0x100   : > { %v936_v6 = vadd.f32 %v1676_v47, %v633_v56  ;;  %v984_v7 = vadd.f32 %v1708_v48, %v842_v57  ;;  %v636_v8 = vadd.f32 %v1996_v45, %v635_v0  ;;  %v845_v9 = vadd.f32 %v1996_v45, %v844_v1  ;;  %v637_v10 = vpop.f32.mrb[3].mxu0  ;;  %v846_v11 = vpop.f32.mrb[3].mxu1 }
 0x102   : > { %v1000_v18 = vmax.f32 %v936_v6, 0.0  ;;  %v1016_v19 = vmax.f32 %v984_v7, 0.0  ;;  %v937_v20 = vadd.f32 %v1677_v53, %v636_v8  ;;  %v985_v21 = vadd.f32 %v1709_v54, %v845_v9  ;;  %v2075_v6 = vld [vmem:[%s1980_s18 + $0x30] sm:$0xff]  }
 0x103   : > { %v1697_v54 = vunpack.c.h.bf16 %v2035_v22 }
 0x104   : > { %v1642_v28 = vpack.c.bf16 %v1000_v18, %v1000_v18  ;;  %v1658_v29 = vpack.c.bf16 %v1016_v19, %v1016_v19  ;;  %v1193_v30 = vsub.f32 %v1000_v18, %v1016_v19  ;;  %v1001_v31 = vmax.f32 %v937_v20, 0.0  ;;  %v2087_v20 = vld [vmem:[%s1986_s22 + $0x30] sm:$0xff]  }
 0x105   : > { %v1017_v32 = vmax.f32 %v985_v21, 0.0  ;;  %v640_v33 = vpop.f32.mrb[4].mxu0  ;;  %v849_v34 = vpop.f32.mrb[4].mxu1 }
 0x106   : > { %1097 = vst.msk [vmem:[%s2044_s24] sm:$0xf] %vm1096_vm1, %v1642_v28  ;;  %1177 = vst.msk [vmem:[%s2050_s29] sm:$0xf] %vm1096_vm1, %v1658_v29  ;;  %v1209_v38 = vand.u32 2147483647, %v1193_v30  ;;  %v1643_v40 = vpack.c.bf16 %v1001_v31, %v1001_v31  ;;  %v641_v41 = vadd.f32 %v1996_v45, %v640_v33  ;;  %v850_v51 = vadd.f32 %v1996_v45, %v849_v34 }
 0x107   : > { %v1241_v39 = vmul.f32 0.5, %v1193_v30  ;;  %v642_v42 = vpop.f32.mrb[5].mxu0  ;;  %v851_v43 = vpop.f32.mrb[5].mxu1  ;;  %v1659_v47 = vpack.c.bf16 %v1017_v32, %v1017_v32  ;;  %v1194_v48 = vsub.f32 %v1001_v31, %v1017_v32  ;;  %v1700_v29 = vunpack.c.l.bf16 %v2075_v6 }
 0x108   : > { %v643_v52 = vpop.f32.mrb[6].mxu0  ;;  %v852_v53 = vpop.f32.mrb[6].mxu1  ;;  %vm2066_vm2 = vcmp.le.f32.partialorder %v1209_v38, 1.0  ;;  %v1622_v58 = vadd.f32 -0.5, %v1209_v38  ;;  %1098 = vst.msk [vmem:[%s2044_s24 + $0x4] sm:$0xf] %vm1096_vm1, %v1643_v40  ;;  %v938_v59 = vadd.f32 %v1680_v55, %v641_v41  ;;  %v986_v9 = vadd.f32 %v1712_v60, %v850_v51 }
 0x109   : > { %v1257_v57 = vmul.f32 %v1241_v39, %v1193_v30  ;;  %v645_v0 = vpop.f32.mrb[7].mxu0  ;;  %v854_v1 = vpop.f32.mrb[7].mxu1  ;;  %1178 = vst.msk [vmem:[%s2050_s29 + $0x4] sm:$0xf] %vm1096_vm1, %v1659_v47  ;;  %v1210_v7 = vand.u32 2147483647, %v1194_v48  ;;  %v644_v10 = vadd.f32 %v1996_v45, %v643_v52  ;;  %v853_v19 = vadd.f32 %v1996_v45, %v852_v53 }
 0x10a   : > { %v1242_v8 = vmul.f32 0.5, %v1194_v48  ;;  %v1002_v18 = vmax.f32 %v938_v59, 0.0  ;;  %v1729_v55 = vunpack.c.h.bf16 %v2038_v23  ;;  %v1018_v60 = vmax.f32 %v986_v9, 0.0 }
 0x10b   : > { %v1289_v11 = vsel %vm2066_vm2, %v1257_v57, %v1622_v58  ;;  %vm1226_vm3 = vcmp.le.f32.partialorder %v1210_v7, 1.0  ;;  %v1623_v28 = vadd.f32 -0.5, %v1210_v7  ;;  %v939_v31 = vadd.f32 %v1681_v61, %v644_v10 }
 0x10c   : > { %v1258_v21 = vmul.f32 %v1242_v8, %v1194_v48  ;;  %v1644_v30 = vpack.c.bf16 %v1002_v18, %v1002_v18  ;;  %v987_v32 = vadd.f32 %v1713_v2, %v853_v19  ;;  %v1305_v33 = vsel %vm573_vm0, %v1289_v11, 0.0 }
 0x10d   : > { %v648_v38 = vpop.f32.mrb[8].mxu0  ;;  %v857_v39 = vpop.f32.mrb[8].mxu1  ;;  %v1732_v40 = vunpack.c.l.bf16 %v2087_v20  ;;  %v1701_v41 = vunpack.c.h.bf16 %v2075_v6  ;;  %v1660_v43 = vpack.c.bf16 %v1018_v60, %v1018_v60  ;;  %v1195_v44 = vsub.f32 %v1002_v18, %v1018_v60 }
 0x10e   : > { %v1290_v34 = vsel %vm1226_vm3, %v1258_v21, %v1623_v28  ;;  %1099 = vst.msk [vmem:[%s2044_s24 + $0x8] sm:$0xf] %vm1096_vm1, %v1644_v30  ;;  %v1003_v61 = vmax.f32 %v939_v31, 0.0  ;;  %v650_v47 = vpop.f32.mrb[9].mxu0  ;;  %v859_v46 = vpop.f32.mrb[9].mxu1  ;;  %v1019_v48 = vmax.f32 %v987_v32, 0.0  ;;  %v649_v51 = vadd.f32 %v1996_v45, %v648_v38 }
 0x10f   : > { %v1306_v42 = vsel %vm573_vm0, %v1290_v34, 0.0  ;;  %v858_v52 = vadd.f32 %v1996_v45, %v857_v39  ;;  %v651_v53 = vpop.f32.mrb[10].mxu0  ;;  %v860_v56 = vpop.f32.mrb[10].mxu1  ;;  %1179 = vst.msk [vmem:[%s2050_s29 + $0x8] sm:$0xf] %vm1096_vm1, %v1660_v43  ;;  %v1243_v58 = vmul.f32 0.5, %v1195_v44 }
 0x110   : > { %v1307_v2 = vadd.f32 %v1306_v42, %v1305_v33  ;;  %v1211_v57 = vand.u32 2147483647, %v1195_v44  ;;  %v1645_v59 = vpack.c.bf16 %v1003_v61, %v1003_v61  ;;  %v652_v0 = vadd.f32 %v1996_v45, %v651_v53  ;;  %v653_v1 = vpop.f32.mrb[11].mxu0  ;;  %v862_v7 = vpop.f32.mrb[11].mxu1 }
 0x111   : > { %v1661_v8 = vpack.c.bf16 %v1019_v48, %v1019_v48  ;;  %v1196_v9 = vsub.f32 %v1003_v61, %v1019_v48  ;;  %v940_v10 = vadd.f32 %v1684_v3, %v649_v51  ;;  %v988_v11 = vadd.f32 %v1716_v4, %v858_v52 }
 0x112   : > { %vm1227_vm4 = vcmp.le.f32.partialorder %v1211_v57, 1.0  ;;  %v1259_v18 = vmul.f32 %v1243_v58, %v1195_v44  ;;  %v1624_v19 = vadd.f32 -0.5, %v1211_v57  ;;  %1100 = vst.msk [vmem:[%s2044_s24 + $0xc] sm:$0xf] %vm1096_vm1, %v1645_v59  ;;  %v941_v21 = vadd.f32 %v1685_v5, %v652_v0 }
 0x113   : > { %1180 = vst.msk [vmem:[%s2050_s29 + $0xc] sm:$0xf] %vm1096_vm1, %v1661_v8  ;;  %v1212_v28 = vand.u32 2147483647, %v1196_v9  ;;  %v1244_v30 = vmul.f32 0.5, %v1196_v9  ;;  %v1004_v60 = vmax.f32 %v940_v10, 0.0  ;;  %v861_v3 = vadd.f32 %v1996_v45, %v860_v56 }
 0x114   : > { %v1020_v31 = vmax.f32 %v988_v11, 0.0  ;;  %v1291_v32 = vsel %vm1227_vm4, %v1259_v18, %v1624_v19  ;;  %v1005_v33 = vmax.f32 %v941_v21, 0.0  ;;  %v1733_v4 = vunpack.c.h.bf16 %v2087_v20  ;;  %v2139_v11 = vld [vmem:[%s1980_s18 + $0x38] sm:$0xff]  }
 0x115   : > { %v1308_v34 = vsel %vm573_vm0, %v1291_v32, 0.0  ;;  %vm2118_vm5 = vcmp.le.f32.partialorder %v1212_v28, 1.0  ;;  %v1260_v49 = vmul.f32 %v1244_v30, %v1196_v9  ;;  %v1625_v5 = vadd.f32 -0.5, %v1212_v28  ;;  %v656_v39 = vpop.f32.mrb[12].mxu0  ;;  %v865_v42 = vpop.f32.mrb[12].mxu1 }
 0x116   : > { %v1309_v43 = vadd.f32 %v1308_v34, %v1307_v2  ;;  %v1646_v44 = vpack.c.bf16 %v1004_v60, %v1004_v60  ;;  %v1662_v61 = vpack.c.bf16 %v1020_v31, %v1020_v31  ;;  %v1197_v47 = vsub.f32 %v1004_v60, %v1020_v31  ;;  %v658_v46 = vpop.f32.mrb[13].mxu0  ;;  %v867_v48 = vpop.f32.mrb[13].mxu1 }
 0x117   : > { %v1292_v51 = vsel %vm2118_vm5, %v1260_v49, %v1625_v5  ;;  %v1647_v52 = vpack.c.bf16 %v1005_v33, %v1005_v33  ;;  %v989_v53 = vadd.f32 %v1717_v14, %v861_v3  ;;  %v657_v56 = vadd.f32 %v1996_v45, %v656_v39  ;;  %v659_v57 = vpop.f32.mrb[14].mxu0  ;;  %v868_v58 = vpop.f32.mrb[14].mxu1 }
 0x118   : > { %v1310_v2 = vsel %vm573_vm0, %v1292_v51, 0.0  ;;  %1101 = vst.msk [vmem:[%s2044_s24 + $0x10] sm:$0xf] %vm1096_vm1, %v1646_v44  ;;  %1181 = vst.msk [vmem:[%s2050_s29 + $0x10] sm:$0xf] %vm1096_vm1, %v1662_v61  ;;  %v1245_v0 = vmul.f32 0.5, %v1197_v47  ;;  %v866_v1 = vadd.f32 %v1996_v45, %v865_v42  ;;  %v660_v10 = vadd.f32 %v1996_v45, %v659_v57 }
 0x119   : > { %v1213_v59 = vand.u32 2147483647, %v1197_v47  ;;  %v661_v7 = vpop.f32.mrb[15].mxu0  ;;  %v870_v8 = vpop.f32.mrb[15].mxu1  ;;  %v1311_v9 = vadd.f32 %v1310_v2, %v1309_v43  ;;  %1102 = vst.msk [vmem:[%s2044_s24 + $0x14] sm:$0xf] %vm1096_vm1, %v1647_v52  ;;  %v942_v14 = vadd.f32 %v1688_v15, %v657_v56  ;;  %v869_v15 = vadd.f32 %v1996_v45, %v868_v58 }
 0x11a   : > { %v1021_v50 = vmax.f32 %v989_v53, 0.0  ;;  %v1261_v18 = vmul.f32 %v1245_v0, %v1197_v47  ;;  %v990_v21 = vadd.f32 %v1720_v16, %v866_v1  ;;  %v943_v31 = vadd.f32 %v1689_v17, %v660_v10 }
 0x11b   : > { %vm1229_vm6 = vcmp.le.f32.partialorder %v1213_v59, 1.0  ;;  %v1626_v19 = vadd.f32 -0.5, %v1213_v59  ;;  %v1006_v60 = vmax.f32 %v942_v14, 0.0  ;;  %v1704_v34 = vunpack.c.l.bf16 %v2139_v11 }
 0x11c   : > { %v1663_v28 = vpack.c.bf16 %v1021_v50, %v1021_v50  ;;  %v1198_v30 = vsub.f32 %v1005_v33, %v1021_v50  ;;  %v1022_v3 = vmax.f32 %v990_v21, 0.0  ;;  %v1007_v43 = vmax.f32 %v943_v31, 0.0 }
 0x11d   : > { %v1293_v32 = vsel %vm1229_vm6, %v1261_v18, %v1626_v19  ;;  %v1648_v16 = vpack.c.bf16 %v1006_v60, %v1006_v60  ;;  %v664_v33 = vpop.f32.mrb[16].mxu0  ;;  %v873_v39 = vpop.f32.mrb[16].mxu1  ;;  %v991_v51 = vadd.f32 %v1721_v24, %v869_v15 }
 0x11e   : > { %v1312_v38 = vsel %vm573_vm0, %v1293_v32, 0.0  ;;  %1182 = vst.msk [vmem:[%s2050_s29 + $0x14] sm:$0xf] %vm1096_vm1, %v1663_v28  ;;  %v1214_v49 = vand.u32 2147483647, %v1198_v30  ;;  %v1246_v5 = vmul.f32 0.5, %v1198_v30  ;;  %v1664_v62 = vpack.c.bf16 %v1022_v3, %v1022_v3 }
 0x11f   : > { %v1313_v42 = vadd.f32 %v1312_v38, %v1311_v9  ;;  %v1199_v17 = vsub.f32 %v1006_v60, %v1022_v3  ;;  %v666_v44 = vpop.f32.mrb[17].mxu0  ;;  %v875_v61 = vpop.f32.mrb[17].mxu1  ;;  %1103 = vst.msk [vmem:[%s2044_s24 + $0x18] sm:$0xf] %vm1096_vm1, %v1648_v16  ;;  %v1649_v58 = vpack.c.bf16 %v1007_v43, %v1007_v43  ;;  %v665_v2 = vadd.f32 %v1996_v45, %v664_v33 }
 0x120   : > { %vm2150_vm7 = vcmp.le.f32.partialorder %v1214_v49, 1.0  ;;  %v1262_v46 = vmul.f32 %v1246_v5, %v1198_v30  ;;  %v1627_v48 = vadd.f32 -0.5, %v1214_v49  ;;  %v667_v52 = vpop.f32.mrb[18].mxu0  ;;  %v876_v53 = vpop.f32.mrb[18].mxu1  ;;  %1183 = vst.msk [vmem:[%s2050_s29 + $0x18] sm:$0xf] %vm1096_vm1, %v1664_v62  ;;  %v874_v8 = vadd.f32 %v1996_v45, %v873_v39 }
 0x121   : > { %v1215_v56 = vand.u32 2147483647, %v1199_v17  ;;  %v1247_v57 = vmul.f32 0.5, %v1199_v17  ;;  %v669_v59 = vpop.f32.mrb[19].mxu0  ;;  %v878_v0 = vpop.f32.mrb[19].mxu1  ;;  %v1023_v7 = vmax.f32 %v991_v51, 0.0  ;;  %v668_v63 = vadd.f32 %v1996_v45, %v667_v52 }
 0x122   : > { %v1294_v1 = vsel %vm2150_vm7, %v1262_v46, %v1627_v48  ;;  %1104 = vst.msk [vmem:[%s2044_s24 + $0x1c] sm:$0xf] %vm1096_vm1, %v1649_v58  ;;  %v944_v19 = vadd.f32 %v1692_v25, %v665_v2  ;;  %v992_v28 = vadd.f32 %v1724_v26, %v874_v8  ;;  %v877_v60 = vadd.f32 %v1996_v45, %v876_v53 }
 0x123   : > { %v1314_v24 = vsel %vm573_vm0, %v1294_v1, 0.0  ;;  %vm1231_vm8 = vcmp.le.f32.partialorder %v1215_v56, 1.0  ;;  %v1263_v9 = vmul.f32 %v1247_v57, %v1199_v17  ;;  %v1628_v50 = vadd.f32 -0.5, %v1215_v56 }
 0x124   : > { %v1315_v14 = vadd.f32 %v1314_v24, %v1313_v42  ;;  %v1665_v10 = vpack.c.bf16 %v1023_v7, %v1023_v7  ;;  %v1200_v18 = vsub.f32 %v1007_v43, %v1023_v7  ;;  %v945_v30 = vadd.f32 %v1693_v27, %v668_v63 }
 0x125   : > { %v1295_v21 = vsel %vm1231_vm8, %v1263_v9, %v1628_v50  ;;  %v1008_v15 = vmax.f32 %v944_v19, 0.0  ;;  %v672_v38 = vpop.f32.mrb[20].mxu0  ;;  %v1024_v5 = vmax.f32 %v992_v28, 0.0  ;;  %v993_v16 = vadd.f32 %v1725_v35, %v877_v60  ;;  %v881_v26 = vpop.f32.mrb[20].mxu1  ;;  %v2209_v50 = vld [vmem:[%s1986_s22 + $0x38] sm:$0xff]  }
 0x126   : > { %v1316_v31 = vsel %vm573_vm0, %v1295_v21, 0.0  ;;  %1184 = vst.msk [vmem:[%s2050_s29 + $0x1c] sm:$0xf] %vm1096_vm1, %v1665_v10  ;;  %v1216_v32 = vand.u32 2147483647, %v1200_v18  ;;  %v1248_v3 = vmul.f32 0.5, %v1200_v18  ;;  %v673_v48 = vadd.f32 %v1996_v45, %v672_v38 }
 0x127   : > { %v1317_v49 = vadd.f32 %v1316_v31, %v1315_v14  ;;  %v1009_v25 = vmax.f32 %v945_v30, 0.0  ;;  %v674_v12 = vpop.f32.mrb[21].mxu0  ;;  %v1650_v42 = vpack.c.bf16 %v1008_v15, %v1008_v15  ;;  %v883_v62 = vpop.f32.mrb[21].mxu1  ;;  %v1666_v43 = vpack.c.bf16 %v1024_v5, %v1024_v5 }
 0x128   : > { %vm2180_vm9 = vcmp.le.f32.partialorder %v1216_v32, 1.0  ;;  %v1264_v33 = vmul.f32 %v1248_v3, %v1200_v18  ;;  %v1629_v39 = vadd.f32 -0.5, %v1216_v32  ;;  %v675_v17 = vpop.f32.mrb[22].mxu0  ;;  %v1201_v44 = vsub.f32 %v1008_v15, %v1024_v5  ;;  %v884_v13 = vpop.f32.mrb[22].mxu1 }
 0x129   : > { %v1651_v61 = vpack.c.bf16 %v1009_v25, %v1009_v25  ;;  %v1025_v47 = vmax.f32 %v993_v16, 0.0  ;;  %v677_v35 = vpop.f32.mrb[23].mxu0  ;;  %1105 = vst.msk [vmem:[%s2044_s24 + $0x20] sm:$0xf] %vm1096_vm1, %v1650_v42  ;;  %v882_v51 = vadd.f32 %v1996_v45, %v881_v26  ;;  %v676_v52 = vadd.f32 %v1996_v45, %v675_v17  ;;  %v886_v53 = vpop.f32.mrb[23].mxu1 }
 0x12a   : > { %v1296_v46 = vsel %vm2180_vm9, %v1264_v33, %v1629_v39  ;;  %1185 = vst.msk [vmem:[%s2050_s29 + $0x20] sm:$0xf] %vm1096_vm1, %v1666_v43  ;;  %v1217_v57 = vand.u32 2147483647, %v1201_v44  ;;  %v1249_v58 = vmul.f32 0.5, %v1201_v44  ;;  %v946_v1 = vadd.f32 %v1696_v36, %v673_v48 }
 0x12b   : > { %v1318_v56 = vsel %vm573_vm0, %v1296_v46, 0.0  ;;  %1106 = vst.msk [vmem:[%s2044_s24 + $0x24] sm:$0xf] %vm1096_vm1, %v1651_v61  ;;  %v1667_v2 = vpack.c.bf16 %v1025_v47, %v1025_v47  ;;  %v1202_v0 = vsub.f32 %v1009_v25, %v1025_v47  ;;  %v994_v7 = vadd.f32 %v1728_v37, %v882_v51 }
 0x12c   : > { %v1319_v59 = vadd.f32 %v1318_v56, %v1317_v49  ;;  %vm2200_vm10 = vcmp.le.f32.partialorder %v1217_v57, 1.0  ;;  %v1265_v63 = vmul.f32 %v1249_v58, %v1201_v44  ;;  %v1630_v24 = vadd.f32 -0.5, %v1217_v57 }
 0x12d   : > { %1186 = vst.msk [vmem:[%s2050_s29 + $0x24] sm:$0xf] %vm1096_vm1, %v1667_v2  ;;  %v947_v9 = vadd.f32 %v1697_v54, %v676_v52  ;;  %v1218_v14 = vand.u32 2147483647, %v1202_v0  ;;  %v1250_v10 = vmul.f32 0.5, %v1202_v0  ;;  %v1010_v18 = vmax.f32 %v946_v1, 0.0 }
 0x12e   : > { %v1026_v36 = vmax.f32 %v994_v7, 0.0  ;;  %v680_v19 = vpop.f32.mrb[24].mxu0  ;;  %v1297_v37 = vsel %vm2200_vm10, %v1265_v63, %v1630_v24  ;;  %v885_v28 = vadd.f32 %v1996_v45, %v884_v13  ;;  %v889_v60 = vpop.f32.mrb[24].mxu1  ;;  %v1736_v38 = vunpack.c.l.bf16 %v2209_v50 }
 0x12f   : > { %v1011_v21 = vmax.f32 %v947_v9, 0.0  ;;  %v681_v30 = vadd.f32 %v1996_v45, %v680_v19  ;;  %v682_v31 = vpop.f32.mrb[25].mxu0  ;;  %v1320_v22 = vsel %vm573_vm0, %v1297_v37, 0.0  ;;  %v2216_v54 = vmul.f32 %v1250_v10, %v1202_v0  ;;  %v891_v3 = vpop.f32.mrb[25].mxu1 }
 0x130   : > { %v2218_v32 = vadd.f32 -0.5, %v1218_v14  ;;  %v683_v15 = vpop.f32.mrb[26].mxu0  ;;  %v1652_v49 = vpack.c.bf16 %v1010_v18, %v1010_v18  ;;  %v1668_v5 = vpack.c.bf16 %v1026_v36, %v1026_v36  ;;  %v1203_v25 = vsub.f32 %v1010_v18, %v1026_v36  ;;  %v892_v26 = vpop.f32.mrb[26].mxu1 }
 0x131   : > { %v1653_v16 = vpack.c.bf16 %v1011_v21, %v1011_v21  ;;  %v685_v12 = vpop.f32.mrb[27].mxu0  ;;  %vm2221_vm11 = vcmp.le.f32.partialorder %v1218_v14, 1.0  ;;  %v995_v33 = vadd.f32 %v1729_v55, %v885_v28  ;;  %v948_v39 = vadd.f32 %v1700_v29, %v681_v30  ;;  %v894_v62 = vpop.f32.mrb[27].mxu1 }
 0x132   : > { %v890_v42 = vadd.f32 %v1996_v45, %v889_v60  ;;  %1107 = vst.msk [vmem:[%s2044_s24 + $0x28] sm:$0xf] %vm1096_vm1, %v1652_v49  ;;  %1187 = vst.msk [vmem:[%s2050_s29 + $0x28] sm:$0xf] %vm1096_vm1, %v1668_v5  ;;  %v684_v17 = vadd.f32 %v1996_v45, %v683_v15  ;;  %v893_v43 = vadd.f32 %v1996_v45, %v892_v26  ;;  %v1705_v44 = vunpack.c.h.bf16 %v2139_v11 }
 0x133   : > { %1108 = vst.msk [vmem:[%s2044_s24 + $0x2c] sm:$0xf] %vm1096_vm1, %v1653_v16  ;;  %v1737_v23 = vunpack.c.h.bf16 %v2209_v50  ;;  %v1027_v55 = vmax.f32 %v995_v33, 0.0  ;;  %v1012_v61 = vmax.f32 %v948_v39, 0.0  ;;  %v2242_v47 = vadd.f32 %v1320_v22, %v1319_v59 }
 0x134   : > { %v996_v29 = vadd.f32 %v1732_v40, %v890_v42  ;;  %v1298_v13 = vsel %vm2221_vm11, %v2216_v54, %v2218_v32  ;;  %v1219_v35 = vand.u32 2147483647, %v1203_v25  ;;  %v1251_v46 = vmul.f32 0.5, %v1203_v25 }
 0x135   : > { %v949_v48 = vadd.f32 %v1701_v41, %v684_v17  ;;  %v1669_v51 = vpack.c.bf16 %v1027_v55, %v1027_v55  ;;  %v1204_v52 = vsub.f32 %v1011_v21, %v1027_v55  ;;  %v1654_v53 = vpack.c.bf16 %v1012_v61, %v1012_v61  ;;  %v688_v57 = vpop.f32.mrb[28].mxu0  ;;  %v897_v40 = vpop.f32.mrb[28].mxu1 }
 0x136   : > { %v1028_v56 = vmax.f32 %v996_v29, 0.0  ;;  %v997_v2 = vadd.f32 %v1733_v4, %v893_v43  ;;  %v689_v59 = vadd.f32 %v1996_v45, %v688_v57  ;;  %v898_v0 = vadd.f32 %v1996_v45, %v897_v40  ;;  %v690_v1 = vpop.f32.mrb[29].mxu0  ;;  %v899_v7 = vpop.f32.mrb[29].mxu1 }
 0x137   : > { %v1013_v58 = vmax.f32 %v949_v48, 0.0  ;;  %1188 = vst.msk [vmem:[%s2050_s29 + $0x2c] sm:$0xf] %vm1096_vm1, %v1669_v51  ;;  %v1220_v6 = vand.u32 2147483647, %v1204_v52  ;;  %v1252_v41 = vmul.f32 0.5, %v1204_v52  ;;  %v1267_v19 = vmul.f32 %v1251_v46, %v1203_v25 }
 0x138   : > { %1109 = vst.msk [vmem:[%s2044_s24 + $0x30] sm:$0xf] %vm1096_vm1, %v1654_v53  ;;  %v1670_v8 = vpack.c.bf16 %v1028_v56, %v1028_v56  ;;  %v1205_v63 = vsub.f32 %v1012_v61, %v1028_v56  ;;  %v691_v24 = vpop.f32.mrb[30].mxu0  ;;  %v900_v9 = vpop.f32.mrb[30].mxu1  ;;  %v1029_v4 = vmax.f32 %v997_v2, 0.0  ;;  %v950_v50 = vadd.f32 %v1704_v34, %v689_v59 }
 0x139   : > { %v1655_v20 = vpack.c.bf16 %v1013_v58, %v1013_v58  ;;  %v998_v14 = vadd.f32 %v1736_v38, %v898_v0  ;;  %v693_v10 = vpop.f32.mrb[31].mxu0  ;;  %v902_v18 = vpop.f32.mrb[31].mxu1  ;;  %vm2260_vm12 = vcmp.le.f32.partialorder %v1219_v35, 1.0  ;;  %v1632_v37 = vadd.f32 -0.5, %v1219_v35 }
 0x13a   : > { %1189 = vst.msk [vmem:[%s2050_s29 + $0x30] sm:$0xf] %vm1096_vm1, %v1670_v8  ;;  %v1221_v21 = vand.u32 2147483647, %v1205_v63  ;;  %v1253_v28 = vmul.f32 0.5, %v1205_v63  ;;  %v1671_v30 = vpack.c.bf16 %v1029_v4, %v1029_v4  ;;  %v1206_v60 = vsub.f32 %v1013_v58, %v1029_v4 }
 0x13b   : > { %1110 = vst.msk [vmem:[%s2044_s24 + $0x34] sm:$0xf] %vm1096_vm1, %v1655_v20  ;;  %v1014_v11 = vmax.f32 %v950_v50, 0.0  ;;  %v1268_v34 = vmul.f32 %v1252_v41, %v1204_v52  ;;  %v1030_v31 = vmax.f32 %v998_v14, 0.0  ;;  %v692_v22 = vadd.f32 %v1996_v45, %v691_v24 }
 0x13c   : > { %v901_v3 = vadd.f32 %v1996_v45, %v900_v9  ;;  %v1633_v15 = vadd.f32 -0.5, %v1220_v6  ;;  %1190 = vst.msk [vmem:[%s2050_s29 + $0x34] sm:$0xf] %vm1096_vm1, %v1671_v30  ;;  %v1222_v38 = vand.u32 2147483647, %v1206_v60  ;;  %v1254_v49 = vmul.f32 0.5, %v1206_v60 }
 0x13d   : > { %v1656_v5 = vpack.c.bf16 %v1014_v11, %v1014_v11  ;;  %v1672_v25 = vpack.c.bf16 %v1030_v31, %v1030_v31  ;;  %v1207_v16 = vsub.f32 %v1014_v11, %v1030_v31  ;;  %v951_v26 = vadd.f32 %v1705_v44, %v692_v22 }
 0x13e   : > { %v999_v12 = vadd.f32 %v1737_v23, %v901_v3  ;;  %vm2272_vm13 = vcmp.le.f32.partialorder %v1220_v6, 1.0  ;;  %v1269_v39 = vmul.f32 %v1253_v28, %v1205_v63  ;;  %v1634_v42 = vadd.f32 -0.5, %v1221_v21 }
 0x13f   : > { %1111 = vst.msk [vmem:[%s2044_s24 + $0x38] sm:$0xf] %vm1096_vm1, %v1656_v5  ;;  %vm2278_vm14 = vcmp.le.f32.partialorder %v1221_v21, 1.0  ;;  %1191 = vst.msk [vmem:[%s2050_s29 + $0x38] sm:$0xf] %vm1096_vm1, %v1672_v25  ;;  %v1255_v62 = vmul.f32 0.5, %v1207_v16  ;;  %v1270_v23 = vmul.f32 %v1254_v49, %v1206_v60  ;;  %v1299_v29 = vsel %vm2260_vm12, %v1267_v19, %v1632_v37 }
 0x140   : > { %v1015_v17 = vmax.f32 %v951_v26, 0.0  ;;  %v1031_v43 = vmax.f32 %v999_v12, 0.0  ;;  %v1223_v44 = vand.u32 2147483647, %v1207_v16  ;;  %vm2284_vm15 = vcmp.le.f32.partialorder %v1222_v38, 1.0 }
 0x141   : > { %v1635_v61 = vadd.f32 -0.5, %v1222_v38  ;;  %v1300_v51 = vsel %vm2272_vm13, %v1268_v34, %v1633_v15  ;;  %v1271_v52 = vmul.f32 %v1255_v62, %v1207_v16  ;;  %v1301_v53 = vsel %vm2278_vm14, %v1269_v39, %v1634_v42 }
 0x142   : > { %v1657_v35 = vpack.c.bf16 %v1015_v17, %v1015_v17  ;;  %v1673_v46 = vpack.c.bf16 %v1031_v43, %v1031_v43  ;;  %v1208_v48 = vsub.f32 %v1015_v17, %v1031_v43  ;;  %v1322_v56 = vsel %vm573_vm0, %v1298_v13, 0.0 }
 0x143   : > { %v1324_v57 = vsel %vm573_vm0, %v1299_v29, 0.0  ;;  %v1636_v2 = vadd.f32 -0.5, %v1223_v44  ;;  %v1323_v59 = vadd.f32 %v1322_v56, %v2242_v47  ;;  %vm1239_vm2 = vcmp.le.f32.partialorder %v1223_v44, 1.0 }
 0x144   : > { %1112 = vst.msk [vmem:[%s2044_s24 + $0x3c] sm:$0xf] %vm1096_vm1, %v1657_v35  ;;  %1192 = vst.msk [vmem:[%s2050_s29 + $0x3c] sm:$0xf] %vm1096_vm1, %v1673_v46  ;;  %v1224_v40 = vand.u32 2147483647, %v1208_v48  ;;  %v1302_v54 = vsel %vm2284_vm15, %v1270_v23, %v1635_v61  ;;  %v1345_v21 = vlaneseq }
 0x145   : > { %v1256_v58 = vmul.f32 0.5, %v1208_v48  ;;  %v1326_v0 = vsel %vm573_vm0, %v1300_v51, 0.0  ;;  %v1325_v32 = vadd.f32 %v1324_v57, %v1323_v59  ;;  %v1328_v13 = vsel %vm573_vm0, %v1301_v53, 0.0 }
 0x146   : > { %v1637_v1 = vadd.f32 -0.5, %v1224_v40  ;;  %vm1240_vm3 = vcmp.le.f32.partialorder %v1224_v40, 1.0  ;;  %v1303_v7 = vsel %vm1239_vm2, %v1271_v52, %v1636_v2  ;;  %v1330_v41 = vsel %vm573_vm0, %v1302_v54, 0.0 }
 0x147   : > { %v1272_v27 = vmul.f32 %v1256_v58, %v1208_v48  ;;  %v1327_v6 = vadd.f32 %v1326_v0, %v1325_v32  ;;  %v1332_v47 = vsel %vm573_vm0, %v1303_v7, 0.0  ;;  %v1346_v28 = vshrl.u32 %v1345_v21, 7 }
 0x148   : > { %v1348_v30 = vand.u32 127, %v1345_v21 }
 0x149   : > { %v1304_v8 = vsel %vm1240_vm3, %v1272_v27, %v1637_v1  ;;  %v1329_v63 = vadd.f32 %v1328_v13, %v1327_v6  ;;  %vm1349_vm1 = vcmp.eq.s32.totalorder %v1346_v28, 0 }
 0x14a   : > { %v1334_v9 = vsel %vm573_vm0, %v1304_v8, 0.0  ;;  %vm1350_vm4 = vcmp.eq.s32.totalorder %v1348_v30, 0 }
 0x14b   : > { %v1331_v24 = vadd.f32 %v1330_v41, %v1329_v63  ;;  %vm1351_vm0 = vmand %vm1349_vm1, %vm1350_vm4 }
 0x14d   : > { %v1333_v20 = vadd.f32 %v1332_v47, %v1331_v24 }
 0x14f   : > { %v1335_v4 = vadd.f32 %v1334_v9, %v1333_v20 }
 0x151   : > { %1336 = vadd.xlane.f32.xlu0 %v1335_v4 }
 0x1de   : > { %v1337_v50 = vpop.xlane.xlu0 %1336 }
 0x1df   : > { %v1338_v14 = vrot.slane %v1337_v50, 4 }
 0x1e1   : > { %v1339_v10 = vadd.f32 %v1338_v14, %v1337_v50 }
 0x1e3   : > { %v1340_v18 = vrot.slane %v1339_v10, 2 }
 0x1e5   : > { %v1341_v36 = vadd.f32 %v1340_v18, %v1339_v10 }
 0x1e7   : > { %v1342_v19 = vrot.slane %v1341_v36, 1 }
 0x1e9   : > { %v1343_v37 = vadd.f32 %v1342_v19, %v1341_v36 }
 0x1eb   : > { %1752 = vpush %v1343_v37 }
 0x21c   : > { %s1753_s13 = spop %1752 }
 0x21d   : > { %v1352_v60 = vstv %s1753_s13 }
 0x21e   : > { %v1353_v11 = vsel %vm1351_vm0, %v1352_v60, 0.0 }
 0x21f   : > { %1354 = vst [vmem:[%s404_s12] sm:$0xff] %v1353_v11 }
 0x220 PF: > { %s19_s27 = sadd.s32 1, %s1826_s27  }
 0x221   : > { %p16_p5 = scmp.ge.s32.totalorder %s19_s27, 6  }
 0x223   :  { %18 = sbr.rel (!%p16_p5) target bundleno = 1 (0x1), region = 107 }

// kernel: resnet_perceptual_loss.8
= control target key start
LH: loop header
LB: loop body
LE: loop exit
PB: predicated region body
PF: predicated region fallthrough
CT: control target
= control target key end

     0   :  { %v934_v0 = vmov 0   ;;  %vm187_vm0 = vcmask 130048   ;;  %v518_v42 = vlaneseq  ;;  %vm649_vm2 = vcmask 519168   ;;  %s1336_s2 = inlined_call_operand.vmem [shape: bf16[144,64], index: 2, kind: input, shape index: {}]   ;;  %s1337_s0 = inlined_call_operand.vmem [shape: bf16[128,144], index: 0, kind: input, shape index: {}]   ;;  %s1338_s1 = inlined_call_operand.vmem [shape: bf16[128,144], index: 1, kind: input, shape index: {}]   ;;  %s1339_s3 = inlined_call_operand.vmem [shape: f32[1,64], index: 3, kind: input, shape index: {}]   ;;  %s1340_s4 = inlined_call_operand.vmem [shape: bf16[128,64], index: 4, kind: output, shape index: {0}]   ;;  %s1341_s5 = inlined_call_operand.vmem [shape: bf16[128,64], index: 5, kind: output, shape index: {1}]  }
   0x1   :  { %212 = vmatprep.subr.bf16.mxu0 %v934_v0  ;;  %421 = vmatprep.subr.bf16.mxu1 %v934_v0  ;;  %v877_v1 = vld [vmem:[%s1336_s2] sm:$0xff]   ;;  %v878_v2 = vld [vmem:[%s1336_s2 + $0x8] sm:$0xff]   ;;  %v879_v3 = vld [vmem:[%s1336_s2 + $0x10] sm:$0xff]  }
   0x2   :  { %213 = vmatpush1.bf16.msra.mxu0 %v877_v1  ;;  %422 = vmatpush1.bf16.msra.mxu1 %v877_v1  ;;  %v880_v4 = vld [vmem:[%s1336_s2 + $0x18] sm:$0xff]   ;;  %v888_v5 = vld [vmem:[%s1337_s0 + $0x4] ss:$8 sps:$4 sm:$0xff]   ;;  %v883_v9 = vld [vmem:[%s1336_s2 + $0x30] sm:$0xff]   ;;  %v1109_v44 = vand.u32 127, %v518_v42 }
   0x3   :  { %214 = vmatprep.subr.bf16.mxu0 %v934_v0  ;;  %423 = vmatprep.subr.bf16.mxu1 %v934_v0  ;;  %v891_v6 = vld [vmem:[%s1338_s1 + $0x4] ss:$8 sps:$4 sm:$0xff]   ;;  %v884_v10 = vld [vmem:[%s1336_s2 + $0x38] sm:$0xff]   ;;  %v886_v12 = vld [vmem:[%s1337_s0] ss:$8 sps:$4 sm:$0xff]  }
   0x4   :  { %780 = vmatprep.mubr.msk.bf16.mxu0 %vm187_vm0, %v888_v5  ;;  %804 = vmatprep.mubr.msk.bf16.mxu1 %vm187_vm0, %v891_v6  ;;  %v881_v7 = vld [vmem:[%s1336_s2 + $0x20] sm:$0xff]   ;;  %v882_v8 = vld [vmem:[%s1336_s2 + $0x28] sm:$0xff]   ;;  %v892_v14 = vld [vmem:[%s1337_s0 + $0x14] ss:$8 sps:$4 sm:$0xff]   ;;  %vm520_vm1 = vcmp.lt.s32.totalorder %v1109_v44, 32 }
   0x5   :  { %v885_v11 = vld [vmem:[%s1336_s2 + $0x40] sm:$0xff]   ;;  %v894_v15 = vld [vmem:[%s1338_s1 + $0x14] ss:$8 sps:$4 sm:$0xff]   ;;  %v896_v16 = vld [vmem:[%s1337_s0 + $0x10] ss:$8 sps:$4 sm:$0xff]  }
   0x6   :  { %215 = vmatpush1.bf16.msra.mxu0 %v878_v2  ;;  %424 = vmatpush1.bf16.msra.mxu1 %v878_v2  ;;  %v889_v13 = vld [vmem:[%s1338_s1] ss:$8 sps:$4 sm:$0xff]   ;;  %v897_v17 = vld [vmem:[%s1338_s1 + $0x10] ss:$8 sps:$4 sm:$0xff]   ;;  %v898_v18 = vld [vmem:[%s1337_s0 + $0x24] ss:$8 sps:$4 sm:$0xff]  }
   0x7   :  { %216 = vmatprep.subr.bf16.mxu0 %v934_v0  ;;  %425 = vmatprep.subr.bf16.mxu1 %v934_v0  ;;  %v900_v19 = vld [vmem:[%s1338_s1 + $0x24] ss:$8 sps:$4 sm:$0xff]   ;;  %v902_v20 = vld [vmem:[%s1337_s0 + $0x20] ss:$8 sps:$4 sm:$0xff]   ;;  %v904_v22 = vld [vmem:[%s1337_s0 + $0x34] ss:$8 sps:$4 sm:$0xff]  }
   0x8   :  { %v903_v21 = vld [vmem:[%s1338_s1 + $0x20] ss:$8 sps:$4 sm:$0xff]   ;;  %v906_v23 = vld [vmem:[%s1338_s1 + $0x34] ss:$8 sps:$4 sm:$0xff]   ;;  %v908_v24 = vld [vmem:[%s1337_s0 + $0x30] ss:$8 sps:$4 sm:$0xff]  }
   0x9   :  { %v909_v25 = vld [vmem:[%s1338_s1 + $0x30] ss:$8 sps:$4 sm:$0xff]   ;;  %v910_v26 = vld [vmem:[%s1337_s0 + $0x44] ss:$8 sps:$4 sm:$0xff]   ;;  %v914_v28 = vld [vmem:[%s1337_s0 + $0x40] ss:$8 sps:$4 sm:$0xff]  }
   0xa   :  { %217 = vmatpush1.bf16.msra.mxu0 %v879_v3  ;;  %426 = vmatpush1.bf16.msra.mxu1 %v879_v3  ;;  %v912_v27 = vld [vmem:[%s1338_s1 + $0x44] ss:$8 sps:$4 sm:$0xff]   ;;  %v915_v29 = vld [vmem:[%s1338_s1 + $0x40] ss:$8 sps:$4 sm:$0xff]   ;;  %v916_v30 = vld [vmem:[%s1337_s0 + $0x54] ss:$8 sps:$4 sm:$0xff]  }
   0xb   :  { %218 = vmatprep.subr.bf16.mxu0 %v934_v0  ;;  %427 = vmatprep.subr.bf16.mxu1 %v934_v0  ;;  %v918_v31 = vld [vmem:[%s1338_s1 + $0x54] ss:$8 sps:$4 sm:$0xff]   ;;  %v920_v32 = vld [vmem:[%s1337_s0 + $0x50] ss:$8 sps:$4 sm:$0xff]   ;;  %v922_v34 = vld [vmem:[%s1337_s0 + $0x64] ss:$8 sps:$4 sm:$0xff]  }
   0xc   :  { %v921_v33 = vld [vmem:[%s1338_s1 + $0x50] ss:$8 sps:$4 sm:$0xff]   ;;  %v924_v35 = vld [vmem:[%s1338_s1 + $0x64] ss:$8 sps:$4 sm:$0xff]   ;;  %v926_v36 = vld [vmem:[%s1337_s0 + $0x60] ss:$8 sps:$4 sm:$0xff]  }
   0xd   :  { %v927_v37 = vld [vmem:[%s1338_s1 + $0x60] ss:$8 sps:$4 sm:$0xff]   ;;  %v928_v38 = vld [vmem:[%s1337_s0 + $0x74] ss:$8 sps:$4 sm:$0xff]   ;;  %v932_v40 = vld [vmem:[%s1337_s0 + $0x70] ss:$8 sps:$4 sm:$0xff]  }
   0xe   :  { %219 = vmatpush1.bf16.msra.mxu0 %v880_v4  ;;  %428 = vmatpush1.bf16.msra.mxu1 %v880_v4  ;;  %v930_v39 = vld [vmem:[%s1338_s1 + $0x74] ss:$8 sps:$4 sm:$0xff]   ;;  %v933_v41 = vld [vmem:[%s1338_s1 + $0x70] ss:$8 sps:$4 sm:$0xff]   ;;  %v1107_v43 = vld [vmem:[%s1339_s3] ss:$0 sm:$0xff] }
   0xf   :  { %220 = vmatprep.subr.bf16.mxu0 %v934_v0  ;;  %429 = vmatprep.subr.bf16.mxu1 %v934_v0 }
  0x12   :  { %221 = vmatpush1.bf16.msra.mxu0 %v881_v7  ;;  %430 = vmatpush1.bf16.msra.mxu1 %v881_v7 }
  0x13   :  { %222 = vmatprep.subr.bf16.mxu0 %v934_v0  ;;  %431 = vmatprep.subr.bf16.mxu1 %v934_v0 }
  0x16   :  { %223 = vmatpush1.bf16.msra.mxu0 %v882_v8  ;;  %432 = vmatpush1.bf16.msra.mxu1 %v882_v8 }
  0x17   :  { %224 = vmatprep.subr.bf16.mxu0 %v934_v0  ;;  %433 = vmatprep.subr.bf16.mxu1 %v934_v0 }
  0x1a   :  { %225 = vmatpush1.bf16.msra.mxu0 %v883_v9  ;;  %434 = vmatpush1.bf16.msra.mxu1 %v883_v9 }
  0x1b   :  { %226 = vmatprep.subr.bf16.mxu0 %v934_v0  ;;  %435 = vmatprep.subr.bf16.mxu1 %v934_v0 }
  0x1e   :  { %227 = vmatpush1.bf16.msra.mxu0 %v884_v10  ;;  %436 = vmatpush1.bf16.msra.mxu1 %v884_v10 }
  0x1f   :  { %228 = vmatprep.subr.bf16.mxu0 %v934_v0  ;;  %437 = vmatprep.subr.bf16.mxu1 %v934_v0 }
  0x22   :  { %229 = vmatpush1.bf16.msra.mxu0 %v885_v11  ;;  %438 = vmatpush1.bf16.msra.mxu1 %v885_v11 }
  0x25   :  { %245 = vmatmul.mubr.bf16.vlgmr.msra.gmra.mrb[0].mxu0 %v886_v12  ;;  %454 = vmatmul.mubr.bf16.vlgmr.msra.gmra.mrb[0].mxu1 %v889_v13 }
  0x26   :  { %781 = vmatprep.mubr.msk.bf16.mxu0 %vm187_vm0, %v892_v14  ;;  %805 = vmatprep.mubr.msk.bf16.mxu1 %vm187_vm0, %v894_v15 }
  0x2d   :  { %253 = vmatmul.mubr.bf16.gmra.mrb[4].mxu0 %v896_v16  ;;  %462 = vmatmul.mubr.bf16.gmra.mrb[4].mxu1 %v897_v17 }
  0x2e   :  { %782 = vmatprep.mubr.msk.bf16.mxu0 %vm187_vm0, %v898_v18  ;;  %806 = vmatprep.mubr.msk.bf16.mxu1 %vm187_vm0, %v900_v19 }
  0x35   :  { %261 = vmatmul.mubr.bf16.gmra.mrb[8].mxu0 %v902_v20  ;;  %470 = vmatmul.mubr.bf16.gmra.mrb[8].mxu1 %v903_v21 }
  0x36   :  { %783 = vmatprep.mubr.msk.bf16.mxu0 %vm187_vm0, %v904_v22  ;;  %807 = vmatprep.mubr.msk.bf16.mxu1 %vm187_vm0, %v906_v23 }
  0x3d   :  { %269 = vmatmul.mubr.bf16.gmra.mrb[12].mxu0 %v908_v24  ;;  %478 = vmatmul.mubr.bf16.gmra.mrb[12].mxu1 %v909_v25 }
  0x3e   :  { %784 = vmatprep.mubr.msk.bf16.mxu0 %vm187_vm0, %v910_v26  ;;  %808 = vmatprep.mubr.msk.bf16.mxu1 %vm187_vm0, %v912_v27 }
  0x45   :  { %277 = vmatmul.mubr.bf16.gmra.mrb[16].mxu0 %v914_v28  ;;  %486 = vmatmul.mubr.bf16.gmra.mrb[16].mxu1 %v915_v29 }
  0x46   :  { %785 = vmatprep.mubr.msk.bf16.mxu0 %vm187_vm0, %v916_v30  ;;  %809 = vmatprep.mubr.msk.bf16.mxu1 %vm187_vm0, %v918_v31 }
  0x4d   :  { %285 = vmatmul.mubr.bf16.gmra.mrb[20].mxu0 %v920_v32  ;;  %494 = vmatmul.mubr.bf16.gmra.mrb[20].mxu1 %v921_v33 }
  0x4e   :  { %786 = vmatprep.mubr.msk.bf16.mxu0 %vm187_vm0, %v922_v34  ;;  %810 = vmatprep.mubr.msk.bf16.mxu1 %vm187_vm0, %v924_v35 }
  0x55   :  { %293 = vmatmul.mubr.bf16.gmra.mrb[24].mxu0 %v926_v36  ;;  %502 = vmatmul.mubr.bf16.gmra.mrb[24].mxu1 %v927_v37 }
  0x56   :  { %787 = vmatprep.mubr.msk.bf16.mxu0 %vm187_vm0, %v928_v38  ;;  %811 = vmatprep.mubr.msk.bf16.mxu1 %vm187_vm0, %v930_v39 }
  0x5d   :  { %301 = vmatmul.mubr.bf16.gmra.mrb[28].mxu0 %v932_v40  ;;  %510 = vmatmul.mubr.bf16.gmra.mrb[28].mxu1 %v933_v41 }
  0xf8   :  { %v246_v45 = vpop.f32.mrb[0].mxu0  ;;  %v455_v46 = vpop.f32.mrb[0].mxu1 }
  0xf9   :  { %v247_v47 = vadd.f32 %v1107_v43, %v246_v45  ;;  %v456_v48 = vadd.f32 %v1107_v43, %v455_v46  ;;  %v248_v49 = vpop.f32.mrb[1].mxu0  ;;  %v457_v50 = vpop.f32.mrb[1].mxu1 }
  0xfa   :  { %v249_v51 = vpop.f32.mrb[2].mxu0  ;;  %v458_v52 = vpop.f32.mrb[2].mxu1 }
  0xfb   :  { %v521_v53 = vmax.f32 %v247_v47, 0.0  ;;  %v553_v54 = vmax.f32 %v456_v48, 0.0  ;;  %v250_v55 = vadd.f32 %v1107_v43, %v249_v51  ;;  %v459_v56 = vadd.f32 %v1107_v43, %v458_v52  ;;  %v251_v57 = vpop.f32.mrb[3].mxu0  ;;  %v460_v58 = vpop.f32.mrb[3].mxu1 }
  0xfd   :  { %v537_v59 = vsel %vm520_vm1, %v521_v53, %v247_v47  ;;  %v569_v60 = vsel %vm520_vm1, %v553_v54, %v456_v48  ;;  %v522_v61 = vmax.f32 %v250_v55, 0.0  ;;  %v554_v62 = vmax.f32 %v459_v56, 0.0 }
  0xfe   :  { %v844_v63 = vpack.c.bf16 %v537_v59, %v537_v59  ;;  %v860_v0 = vpack.c.bf16 %v569_v60, %v569_v60 }
  0xff   :  { %v538_v1 = vsel %vm520_vm1, %v522_v61, %v250_v55  ;;  %v570_v2 = vsel %vm520_vm1, %v554_v62, %v459_v56 }
 0x100   :  { %650 = vst.msk [vmem:[%s1340_s4] sm:$0xf] %vm649_vm2, %v844_v63  ;;  %730 = vst.msk [vmem:[%s1341_s5] sm:$0xf] %vm649_vm2, %v860_v0  ;;  %v845_v3 = vpack.c.bf16 %v538_v1, %v538_v1  ;;  %v861_v4 = vpack.c.bf16 %v570_v2, %v570_v2  ;;  %v254_v5 = vpop.f32.mrb[4].mxu0  ;;  %v463_v6 = vpop.f32.mrb[4].mxu1 }
 0x101   :  { %v255_v7 = vadd.f32 %v1107_v43, %v254_v5  ;;  %v464_v8 = vadd.f32 %v1107_v43, %v463_v6  ;;  %v256_v9 = vpop.f32.mrb[5].mxu0  ;;  %v465_v10 = vpop.f32.mrb[5].mxu1 }
 0x102   :  { %651 = vst.msk [vmem:[%s1340_s4 + $0x4] sm:$0xf] %vm649_vm2, %v845_v3  ;;  %731 = vst.msk [vmem:[%s1341_s5 + $0x4] sm:$0xf] %vm649_vm2, %v861_v4  ;;  %v257_v11 = vpop.f32.mrb[6].mxu0  ;;  %v466_v12 = vpop.f32.mrb[6].mxu1 }
 0x103   :  { %v523_v13 = vmax.f32 %v255_v7, 0.0  ;;  %v555_v14 = vmax.f32 %v464_v8, 0.0  ;;  %v258_v15 = vadd.f32 %v1107_v43, %v257_v11  ;;  %v467_v16 = vadd.f32 %v1107_v43, %v466_v12  ;;  %v259_v17 = vpop.f32.mrb[7].mxu0  ;;  %v468_v18 = vpop.f32.mrb[7].mxu1 }
 0x105   :  { %v539_v19 = vsel %vm520_vm1, %v523_v13, %v255_v7  ;;  %v571_v20 = vsel %vm520_vm1, %v555_v14, %v464_v8  ;;  %v524_v21 = vmax.f32 %v258_v15, 0.0  ;;  %v556_v22 = vmax.f32 %v467_v16, 0.0 }
 0x106   :  { %v846_v23 = vpack.c.bf16 %v539_v19, %v539_v19  ;;  %v862_v24 = vpack.c.bf16 %v571_v20, %v571_v20 }
 0x107   :  { %v540_v25 = vsel %vm520_vm1, %v524_v21, %v258_v15  ;;  %v572_v26 = vsel %vm520_vm1, %v556_v22, %v467_v16 }
 0x108   :  { %652 = vst.msk [vmem:[%s1340_s4 + $0x8] sm:$0xf] %vm649_vm2, %v846_v23  ;;  %732 = vst.msk [vmem:[%s1341_s5 + $0x8] sm:$0xf] %vm649_vm2, %v862_v24  ;;  %v847_v27 = vpack.c.bf16 %v540_v25, %v540_v25  ;;  %v863_v28 = vpack.c.bf16 %v572_v26, %v572_v26  ;;  %v262_v29 = vpop.f32.mrb[8].mxu0  ;;  %v471_v30 = vpop.f32.mrb[8].mxu1 }
 0x109   :  { %v263_v31 = vadd.f32 %v1107_v43, %v262_v29  ;;  %v472_v32 = vadd.f32 %v1107_v43, %v471_v30  ;;  %v264_v33 = vpop.f32.mrb[9].mxu0  ;;  %v473_v34 = vpop.f32.mrb[9].mxu1 }
 0x10a   :  { %653 = vst.msk [vmem:[%s1340_s4 + $0xc] sm:$0xf] %vm649_vm2, %v847_v27  ;;  %733 = vst.msk [vmem:[%s1341_s5 + $0xc] sm:$0xf] %vm649_vm2, %v863_v28  ;;  %v265_v35 = vpop.f32.mrb[10].mxu0  ;;  %v474_v36 = vpop.f32.mrb[10].mxu1 }
 0x10b   :  { %v525_v37 = vmax.f32 %v263_v31, 0.0  ;;  %v557_v38 = vmax.f32 %v472_v32, 0.0  ;;  %v266_v39 = vadd.f32 %v1107_v43, %v265_v35  ;;  %v475_v40 = vadd.f32 %v1107_v43, %v474_v36  ;;  %v267_v41 = vpop.f32.mrb[11].mxu0  ;;  %v476_v42 = vpop.f32.mrb[11].mxu1 }
 0x10d   :  { %v541_v45 = vsel %vm520_vm1, %v525_v37, %v263_v31  ;;  %v573_v46 = vsel %vm520_vm1, %v557_v38, %v472_v32  ;;  %v526_v47 = vmax.f32 %v266_v39, 0.0  ;;  %v558_v48 = vmax.f32 %v475_v40, 0.0 }
 0x10e   :  { %v848_v49 = vpack.c.bf16 %v541_v45, %v541_v45  ;;  %v864_v50 = vpack.c.bf16 %v573_v46, %v573_v46 }
 0x10f   :  { %v542_v51 = vsel %vm520_vm1, %v526_v47, %v266_v39  ;;  %v574_v52 = vsel %vm520_vm1, %v558_v48, %v475_v40 }
 0x110   :  { %654 = vst.msk [vmem:[%s1340_s4 + $0x10] sm:$0xf] %vm649_vm2, %v848_v49  ;;  %734 = vst.msk [vmem:[%s1341_s5 + $0x10] sm:$0xf] %vm649_vm2, %v864_v50  ;;  %v849_v53 = vpack.c.bf16 %v542_v51, %v542_v51  ;;  %v865_v54 = vpack.c.bf16 %v574_v52, %v574_v52  ;;  %v270_v55 = vpop.f32.mrb[12].mxu0  ;;  %v479_v56 = vpop.f32.mrb[12].mxu1 }
 0x111   :  { %v271_v57 = vadd.f32 %v1107_v43, %v270_v55  ;;  %v480_v58 = vadd.f32 %v1107_v43, %v479_v56  ;;  %v272_v59 = vpop.f32.mrb[13].mxu0  ;;  %v481_v60 = vpop.f32.mrb[13].mxu1 }
 0x112   :  { %655 = vst.msk [vmem:[%s1340_s4 + $0x14] sm:$0xf] %vm649_vm2, %v849_v53  ;;  %735 = vst.msk [vmem:[%s1341_s5 + $0x14] sm:$0xf] %vm649_vm2, %v865_v54  ;;  %v273_v61 = vpop.f32.mrb[14].mxu0  ;;  %v482_v62 = vpop.f32.mrb[14].mxu1 }
 0x113   :  { %v527_v63 = vmax.f32 %v271_v57, 0.0  ;;  %v559_v0 = vmax.f32 %v480_v58, 0.0  ;;  %v274_v1 = vadd.f32 %v1107_v43, %v273_v61  ;;  %v483_v2 = vadd.f32 %v1107_v43, %v482_v62  ;;  %v275_v3 = vpop.f32.mrb[15].mxu0  ;;  %v484_v4 = vpop.f32.mrb[15].mxu1 }
 0x115   :  { %v543_v5 = vsel %vm520_vm1, %v527_v63, %v271_v57  ;;  %v575_v6 = vsel %vm520_vm1, %v559_v0, %v480_v58  ;;  %v528_v7 = vmax.f32 %v274_v1, 0.0  ;;  %v560_v8 = vmax.f32 %v483_v2, 0.0 }
 0x116   :  { %v850_v9 = vpack.c.bf16 %v543_v5, %v543_v5  ;;  %v866_v10 = vpack.c.bf16 %v575_v6, %v575_v6 }
 0x117   :  { %v544_v11 = vsel %vm520_vm1, %v528_v7, %v274_v1  ;;  %v576_v12 = vsel %vm520_vm1, %v560_v8, %v483_v2 }
 0x118   :  { %656 = vst.msk [vmem:[%s1340_s4 + $0x18] sm:$0xf] %vm649_vm2, %v850_v9  ;;  %736 = vst.msk [vmem:[%s1341_s5 + $0x18] sm:$0xf] %vm649_vm2, %v866_v10  ;;  %v851_v13 = vpack.c.bf16 %v544_v11, %v544_v11  ;;  %v867_v14 = vpack.c.bf16 %v576_v12, %v576_v12  ;;  %v278_v15 = vpop.f32.mrb[16].mxu0  ;;  %v487_v16 = vpop.f32.mrb[16].mxu1 }
 0x119   :  { %v279_v17 = vadd.f32 %v1107_v43, %v278_v15  ;;  %v488_v18 = vadd.f32 %v1107_v43, %v487_v16  ;;  %v280_v19 = vpop.f32.mrb[17].mxu0  ;;  %v489_v20 = vpop.f32.mrb[17].mxu1 }
 0x11a   :  { %657 = vst.msk [vmem:[%s1340_s4 + $0x1c] sm:$0xf] %vm649_vm2, %v851_v13  ;;  %737 = vst.msk [vmem:[%s1341_s5 + $0x1c] sm:$0xf] %vm649_vm2, %v867_v14  ;;  %v281_v21 = vpop.f32.mrb[18].mxu0  ;;  %v490_v22 = vpop.f32.mrb[18].mxu1 }
 0x11b   :  { %v529_v23 = vmax.f32 %v279_v17, 0.0  ;;  %v561_v24 = vmax.f32 %v488_v18, 0.0  ;;  %v282_v25 = vadd.f32 %v1107_v43, %v281_v21  ;;  %v491_v26 = vadd.f32 %v1107_v43, %v490_v22  ;;  %v283_v27 = vpop.f32.mrb[19].mxu0  ;;  %v492_v28 = vpop.f32.mrb[19].mxu1 }
 0x11d   :  { %v545_v29 = vsel %vm520_vm1, %v529_v23, %v279_v17  ;;  %v577_v30 = vsel %vm520_vm1, %v561_v24, %v488_v18  ;;  %v530_v31 = vmax.f32 %v282_v25, 0.0  ;;  %v562_v32 = vmax.f32 %v491_v26, 0.0 }
 0x11e   :  { %v852_v33 = vpack.c.bf16 %v545_v29, %v545_v29  ;;  %v868_v34 = vpack.c.bf16 %v577_v30, %v577_v30 }
 0x11f   :  { %v546_v35 = vsel %vm520_vm1, %v530_v31, %v282_v25  ;;  %v578_v36 = vsel %vm520_vm1, %v562_v32, %v491_v26 }
 0x120   :  { %658 = vst.msk [vmem:[%s1340_s4 + $0x20] sm:$0xf] %vm649_vm2, %v852_v33  ;;  %738 = vst.msk [vmem:[%s1341_s5 + $0x20] sm:$0xf] %vm649_vm2, %v868_v34  ;;  %v853_v37 = vpack.c.bf16 %v546_v35, %v546_v35  ;;  %v869_v38 = vpack.c.bf16 %v578_v36, %v578_v36  ;;  %v286_v39 = vpop.f32.mrb[20].mxu0  ;;  %v495_v40 = vpop.f32.mrb[20].mxu1 }
 0x121   :  { %v287_v41 = vadd.f32 %v1107_v43, %v286_v39  ;;  %v496_v42 = vadd.f32 %v1107_v43, %v495_v40  ;;  %v288_v45 = vpop.f32.mrb[21].mxu0  ;;  %v497_v46 = vpop.f32.mrb[21].mxu1 }
 0x122   :  { %659 = vst.msk [vmem:[%s1340_s4 + $0x24] sm:$0xf] %vm649_vm2, %v853_v37  ;;  %739 = vst.msk [vmem:[%s1341_s5 + $0x24] sm:$0xf] %vm649_vm2, %v869_v38  ;;  %v289_v47 = vpop.f32.mrb[22].mxu0  ;;  %v498_v48 = vpop.f32.mrb[22].mxu1 }
 0x123   :  { %v531_v49 = vmax.f32 %v287_v41, 0.0  ;;  %v563_v50 = vmax.f32 %v496_v42, 0.0  ;;  %v290_v51 = vadd.f32 %v1107_v43, %v289_v47  ;;  %v499_v52 = vadd.f32 %v1107_v43, %v498_v48  ;;  %v291_v53 = vpop.f32.mrb[23].mxu0  ;;  %v500_v54 = vpop.f32.mrb[23].mxu1 }
 0x125   :  { %v547_v55 = vsel %vm520_vm1, %v531_v49, %v287_v41  ;;  %v579_v56 = vsel %vm520_vm1, %v563_v50, %v496_v42  ;;  %v532_v57 = vmax.f32 %v290_v51, 0.0  ;;  %v564_v58 = vmax.f32 %v499_v52, 0.0 }
 0x126   :  { %v854_v59 = vpack.c.bf16 %v547_v55, %v547_v55  ;;  %v870_v60 = vpack.c.bf16 %v579_v56, %v579_v56 }
 0x127   :  { %v548_v61 = vsel %vm520_vm1, %v532_v57, %v290_v51  ;;  %v580_v62 = vsel %vm520_vm1, %v564_v58, %v499_v52 }
 0x128   :  { %660 = vst.msk [vmem:[%s1340_s4 + $0x28] sm:$0xf] %vm649_vm2, %v854_v59  ;;  %740 = vst.msk [vmem:[%s1341_s5 + $0x28] sm:$0xf] %vm649_vm2, %v870_v60  ;;  %v855_v63 = vpack.c.bf16 %v548_v61, %v548_v61  ;;  %v871_v0 = vpack.c.bf16 %v580_v62, %v580_v62  ;;  %v294_v1 = vpop.f32.mrb[24].mxu0  ;;  %v503_v2 = vpop.f32.mrb[24].mxu1 }
 0x129   :  { %v295_v3 = vadd.f32 %v1107_v43, %v294_v1  ;;  %v504_v4 = vadd.f32 %v1107_v43, %v503_v2  ;;  %v296_v5 = vpop.f32.mrb[25].mxu0  ;;  %v505_v6 = vpop.f32.mrb[25].mxu1 }
 0x12a   :  { %661 = vst.msk [vmem:[%s1340_s4 + $0x2c] sm:$0xf] %vm649_vm2, %v855_v63  ;;  %741 = vst.msk [vmem:[%s1341_s5 + $0x2c] sm:$0xf] %vm649_vm2, %v871_v0  ;;  %v297_v7 = vpop.f32.mrb[26].mxu0  ;;  %v506_v8 = vpop.f32.mrb[26].mxu1 }
 0x12b   :  { %v533_v9 = vmax.f32 %v295_v3, 0.0  ;;  %v565_v10 = vmax.f32 %v504_v4, 0.0  ;;  %v298_v11 = vadd.f32 %v1107_v43, %v297_v7  ;;  %v507_v12 = vadd.f32 %v1107_v43, %v506_v8  ;;  %v299_v13 = vpop.f32.mrb[27].mxu0  ;;  %v508_v14 = vpop.f32.mrb[27].mxu1 }
 0x12d   :  { %v549_v15 = vsel %vm520_vm1, %v533_v9, %v295_v3  ;;  %v581_v16 = vsel %vm520_vm1, %v565_v10, %v504_v4  ;;  %v534_v17 = vmax.f32 %v298_v11, 0.0  ;;  %v566_v18 = vmax.f32 %v507_v12, 0.0 }
 0x12e   :  { %v856_v19 = vpack.c.bf16 %v549_v15, %v549_v15  ;;  %v872_v20 = vpack.c.bf16 %v581_v16, %v581_v16 }
 0x12f   :  { %v550_v21 = vsel %vm520_vm1, %v534_v17, %v298_v11  ;;  %v582_v22 = vsel %vm520_vm1, %v566_v18, %v507_v12 }
 0x130   :  { %662 = vst.msk [vmem:[%s1340_s4 + $0x30] sm:$0xf] %vm649_vm2, %v856_v19  ;;  %742 = vst.msk [vmem:[%s1341_s5 + $0x30] sm:$0xf] %vm649_vm2, %v872_v20  ;;  %v857_v23 = vpack.c.bf16 %v550_v21, %v550_v21  ;;  %v873_v24 = vpack.c.bf16 %v582_v22, %v582_v22  ;;  %v302_v25 = vpop.f32.mrb[28].mxu0  ;;  %v511_v26 = vpop.f32.mrb[28].mxu1 }
 0x131   :  { %v303_v27 = vadd.f32 %v1107_v43, %v302_v25  ;;  %v512_v28 = vadd.f32 %v1107_v43, %v511_v26  ;;  %v304_v29 = vpop.f32.mrb[29].mxu0  ;;  %v513_v30 = vpop.f32.mrb[29].mxu1 }
 0x132   :  { %663 = vst.msk [vmem:[%s1340_s4 + $0x34] sm:$0xf] %vm649_vm2, %v857_v23  ;;  %743 = vst.msk [vmem:[%s1341_s5 + $0x34] sm:$0xf] %vm649_vm2, %v873_v24  ;;  %v305_v31 = vpop.f32.mrb[30].mxu0  ;;  %v514_v32 = vpop.f32.mrb[30].mxu1 }
 0x133   :  { %v535_v33 = vmax.f32 %v303_v27, 0.0  ;;  %v567_v34 = vmax.f32 %v512_v28, 0.0  ;;  %v306_v35 = vadd.f32 %v1107_v43, %v305_v31  ;;  %v515_v36 = vadd.f32 %v1107_v43, %v514_v32  ;;  %v307_v37 = vpop.f32.mrb[31].mxu0  ;;  %v516_v38 = vpop.f32.mrb[31].mxu1 }
 0x135   :  { %v551_v39 = vsel %vm520_vm1, %v535_v33, %v303_v27  ;;  %v583_v40 = vsel %vm520_vm1, %v567_v34, %v512_v28  ;;  %v536_v41 = vmax.f32 %v306_v35, 0.0  ;;  %v568_v42 = vmax.f32 %v515_v36, 0.0 }
 0x136   :  { %v858_v45 = vpack.c.bf16 %v551_v39, %v551_v39  ;;  %v874_v46 = vpack.c.bf16 %v583_v40, %v583_v40 }
 0x137   :  { %v552_v47 = vsel %vm520_vm1, %v536_v41, %v306_v35  ;;  %v584_v48 = vsel %vm520_vm1, %v568_v42, %v515_v36 }
 0x138   :  { %664 = vst.msk [vmem:[%s1340_s4 + $0x38] sm:$0xf] %vm649_vm2, %v858_v45  ;;  %744 = vst.msk [vmem:[%s1341_s5 + $0x38] sm:$0xf] %vm649_vm2, %v874_v46  ;;  %v859_v43 = vpack.c.bf16 %v552_v47, %v552_v47  ;;  %v875_v49 = vpack.c.bf16 %v584_v48, %v584_v48 }
 0x13a   :  { %665 = vst.msk [vmem:[%s1340_s4 + $0x3c] sm:$0xf] %vm649_vm2, %v859_v43  ;;  %745 = vst.msk [vmem:[%s1341_s5 + $0x3c] sm:$0xf] %vm649_vm2, %v875_v49 }

// kernel: resnet_perceptual_loss.9
= control target key start
LH: loop header
LB: loop body
LE: loop exit
PB: predicated region body
PF: predicated region fallthrough
CT: control target
= control target key end

     0   :  { %vm327_vm0 = vcmask 261120   ;;  %s2409_s2 = inlined_call_operand.vmem [shape: bf16[288,32], index: 2, kind: input, shape index: {}]   ;;  %s2410_s0 = inlined_call_operand.vmem [shape: bf16[128,288], index: 0, kind: input, shape index: {}]   ;;  %s2411_s1 = inlined_call_operand.vmem [shape: bf16[128,288], index: 1, kind: input, shape index: {}]   ;;  %s2412_s3 = inlined_call_operand.vmem [shape: f32[1,32], index: 3, kind: input, shape index: {}]   ;;  %s2413_s4 = inlined_call_operand.vmem [shape: bf16[128,32], index: 4, kind: input, shape index: {}]   ;;  %s2414_s5 = inlined_call_operand.vmem [shape: bf16[128,32], index: 5, kind: input, shape index: {}]   ;;  %s2415_s6 = inlined_call_operand.vmem [shape: f32[8,128], index: 6, kind: output, shape index: {}]  }
   0x1   :  { %v1581_v0 = vld [vmem:[%s2409_s2 + $0x40] sm:$0xff]   ;;  %v1584_v3 = vld [vmem:[%s2409_s2 + $0x48] sm:$0xff]   ;;  %v1588_v7 = vld [vmem:[%s2409_s2 + $0x50] sm:$0xff]  }
   0x2   :  { %v1704_v1 = vld [vmem:[%s2409_s2 + $0x80] sm:$0xff]   ;;  %1387 = vmatprep.subr.bf16.mxu0 %v1581_v0  ;;  %v1717_v4 = vld [vmem:[%s2409_s2 + $0x88] sm:$0xff]   ;;  %v1590_v9 = vld [vmem:[%s2409_s2 + $0x10] sm:$0xff]  }
   0x3   :  { %v1583_v2 = vld [vmem:[%s2409_s2] sm:$0xff]   ;;  %1535 = vmatprep.subr.bf16.mxu1 %v1704_v1  ;;  %v1586_v5 = vld [vmem:[%s2409_s2 + $0x8] sm:$0xff]   ;;  %v1591_v10 = vld [vmem:[%s2409_s2 + $0x58] sm:$0xff]  }
   0x4   :  { %1388 = vmatpush3.bf16.msra.mxu0 %v1583_v2  ;;  %1536 = vmatpush3.bf16.msra.mxu1 %v1704_v1  ;;  %v1587_v6 = vld [vmem:[%s2410_s0 + $0x8] ss:$12 sps:$4 sm:$0xff]   ;;  %v1589_v8 = vld [vmem:[%s2410_s0 + $0x20] ss:$12 sps:$4 sm:$0xff]   ;;  %v1592_v11 = vld [vmem:[%s2409_s2 + $0x18] sm:$0xff]  }
   0x5   :  { %1389 = vmatprep.subr.bf16.mxu0 %v1584_v3  ;;  %1537 = vmatprep.subr.bf16.mxu1 %v1717_v4  ;;  %v1593_v12 = vld [vmem:[%s2410_s0 + $0x38] ss:$12 sps:$4 sm:$0xff]   ;;  %v1595_v14 = vld [vmem:[%s2410_s0 + $0x50] ss:$12 sps:$4 sm:$0xff]   ;;  %v1597_v16 = vld [vmem:[%s2409_s2 + $0x68] sm:$0xff]  }
   0x6   :  { %1539 = vmatprep.mubr.msk.bf16.mxu1 %vm327_vm0, %v1587_v6  ;;  %v1594_v13 = vld [vmem:[%s2409_s2 + $0x60] sm:$0xff]   ;;  %v1599_v17 = vld [vmem:[%s2410_s0 + $0x68] ss:$12 sps:$4 sm:$0xff]   ;;  %v1603_v22 = vld [vmem:[%s2409_s2 + $0x78] sm:$0xff]  }
   0x7   :  { %v1596_v15 = vld [vmem:[%s2409_s2 + $0x20] sm:$0xff]   ;;  %v1598_v18 = vld [vmem:[%s2409_s2 + $0x28] sm:$0xff]   ;;  %v1600_v19 = vld [vmem:[%s2409_s2 + $0x70] sm:$0xff]  }
   0x8   :  { %1390 = vmatpush3.bf16.msra.mxu0 %v1586_v5  ;;  %1538 = vmatpush3.bf16.msra.mxu1 %v1717_v4  ;;  %v1601_v20 = vld [vmem:[%s2410_s0 + $0x80] ss:$12 sps:$4 sm:$0xff]   ;;  %v1602_v21 = vld [vmem:[%s2409_s2 + $0x30] sm:$0xff]   ;;  %v1608_v24 = vld [vmem:[%s2410_s0 + $0x98] ss:$12 sps:$4 sm:$0xff]  }
   0x9   :  { %1391 = vmatprep.subr.bf16.mxu0 %v1588_v7  ;;  %1461 = vmatprep.subr.bf16.mxu1 %v1581_v0  ;;  %v1607_v23 = vld [vmem:[%s2410_s0 + $0x4] ss:$12 sps:$4 sm:$0xff]   ;;  %v1604_v25 = vld [vmem:[%s2409_s2 + $0x38] sm:$0xff]   ;;  %v1605_v26 = vld [vmem:[%s2410_s0] ss:$12 sps:$4 sm:$0xff]  }
   0xa   :  { %384 = vmatprep.mubr.bf16.mxu0 %v1607_v23  ;;  %v1609_v27 = vld [vmem:[%s2410_s0 + $0xb0] ss:$12 sps:$4 sm:$0xff]   ;;  %v1612_v30 = vld [vmem:[%s2411_s1] ss:$12 sps:$4 sm:$0xff]   ;;  %v1615_v31 = vld [vmem:[%s2410_s0 + $0x18] ss:$12 sps:$4 sm:$0xff]  }
   0xb   :  { %1540 = vmatmul.mubr.msk.bf16.vlgmr.msra.gmra.mrb[0].mxu1 %vm327_vm0, %v1589_v8  ;;  %v1610_v28 = vld [vmem:[%s2410_s0 + $0x1c] ss:$12 sps:$4 sm:$0xff]   ;;  %v1614_v29 = vld [vmem:[%s2411_s1 + $0x4] ss:$12 sps:$4 sm:$0xff]   ;;  %v1616_v32 = vld [vmem:[%s2410_s0 + $0x34] ss:$12 sps:$4 sm:$0xff]  }
   0xc   :  { %1392 = vmatpush3.bf16.msra.mxu0 %v1590_v9  ;;  %1462 = vmatpush3.bf16.msra.mxu1 %v1583_v2  ;;  %v1618_v33 = vld [vmem:[%s2411_s1 + $0x1c] ss:$12 sps:$4 sm:$0xff]   ;;  %v1621_v35 = vld [vmem:[%s2411_s1 + $0x18] ss:$12 sps:$4 sm:$0xff]   ;;  %v1624_v37 = vld [vmem:[%s2411_s1 + $0x34] ss:$12 sps:$4 sm:$0xff]  }
   0xd   :  { %1393 = vmatprep.subr.bf16.mxu0 %v1591_v10  ;;  %1463 = vmatprep.subr.bf16.mxu1 %v1584_v3  ;;  %v1620_v34 = vld [vmem:[%s2410_s0 + $0x30] ss:$12 sps:$4 sm:$0xff]   ;;  %v1622_v36 = vld [vmem:[%s2410_s0 + $0x4c] ss:$12 sps:$4 sm:$0xff]   ;;  %v1626_v38 = vld [vmem:[%s2410_s0 + $0x48] ss:$12 sps:$4 sm:$0xff]  }
   0xe   :  { %1543 = vmatprep.mubr.msk.bf16.mxu1 %vm327_vm0, %v1593_v12  ;;  %v1627_v39 = vld [vmem:[%s2411_s1 + $0x30] ss:$12 sps:$4 sm:$0xff]   ;;  %v1630_v41 = vld [vmem:[%s2411_s1 + $0x4c] ss:$12 sps:$4 sm:$0xff]   ;;  %v1633_v43 = vld [vmem:[%s2411_s1 + $0x48] ss:$12 sps:$4 sm:$0xff]  }
   0xf   :  { %v1628_v40 = vld [vmem:[%s2410_s0 + $0x64] ss:$12 sps:$4 sm:$0xff]   ;;  %v1632_v42 = vld [vmem:[%s2410_s0 + $0x60] ss:$12 sps:$4 sm:$0xff]   ;;  %v1634_v44 = vld [vmem:[%s2410_s0 + $0x7c] ss:$12 sps:$4 sm:$0xff]  }
  0x10   :  { %1394 = vmatpush3.bf16.msra.mxu0 %v1592_v11  ;;  %1464 = vmatpush3.bf16.msra.mxu1 %v1586_v5  ;;  %v1636_v45 = vld [vmem:[%s2411_s1 + $0x64] ss:$12 sps:$4 sm:$0xff]   ;;  %v1639_v47 = vld [vmem:[%s2411_s1 + $0x60] ss:$12 sps:$4 sm:$0xff]   ;;  %v1642_v49 = vld [vmem:[%s2411_s1 + $0x7c] ss:$12 sps:$4 sm:$0xff]  }
  0x11   :  { %1395 = vmatprep.subr.bf16.mxu0 %v1594_v13  ;;  %1465 = vmatprep.subr.bf16.mxu1 %v1588_v7  ;;  %v1638_v46 = vld [vmem:[%s2410_s0 + $0x78] ss:$12 sps:$4 sm:$0xff]   ;;  %v1640_v48 = vld [vmem:[%s2410_s0 + $0x94] ss:$12 sps:$4 sm:$0xff]   ;;  %v1644_v50 = vld [vmem:[%s2410_s0 + $0x90] ss:$12 sps:$4 sm:$0xff]  }
  0x12   :  { %v1645_v51 = vld [vmem:[%s2411_s1 + $0x78] ss:$12 sps:$4 sm:$0xff]   ;;  %v1648_v53 = vld [vmem:[%s2411_s1 + $0x94] ss:$12 sps:$4 sm:$0xff]   ;;  %v1651_v55 = vld [vmem:[%s2411_s1 + $0x90] ss:$12 sps:$4 sm:$0xff]  }
  0x13   :  { %1544 = vmatmul.mubr.msk.bf16.gmra.mrb[4].mxu1 %vm327_vm0, %v1595_v14  ;;  %v1646_v52 = vld [vmem:[%s2410_s0 + $0xac] ss:$12 sps:$4 sm:$0xff]   ;;  %v1650_v54 = vld [vmem:[%s2410_s0 + $0xa8] ss:$12 sps:$4 sm:$0xff]   ;;  %v1659_v62 = vld [vmem:[%s2411_s1 + $0x50] ss:$12 sps:$4 sm:$0xff]  }
  0x14   :  { %1396 = vmatpush3.bf16.msra.mxu0 %v1596_v15  ;;  %1466 = vmatpush3.bf16.msra.mxu1 %v1590_v9  ;;  %v1652_v56 = vld [vmem:[%s2411_s1 + $0xac] ss:$12 sps:$4 sm:$0xff]   ;;  %v1654_v57 = vld [vmem:[%s2411_s1 + $0x8] ss:$12 sps:$4 sm:$0xff]   ;;  %v1660_v63 = vld [vmem:[%s2411_s1 + $0xb0] ss:$12 sps:$4 sm:$0xff]  }
  0x15   :  { %1397 = vmatprep.subr.bf16.mxu0 %v1597_v16  ;;  %1467 = vmatprep.subr.bf16.mxu1 %v1591_v10  ;;  %v1655_v58 = vld [vmem:[%s2411_s1 + $0xa8] ss:$12 sps:$4 sm:$0xff]   ;;  %v1656_v59 = vld [vmem:[%s2411_s1 + $0x20] ss:$12 sps:$4 sm:$0xff]   ;;  %v1657_v60 = vld [vmem:[%s2411_s1 + $0x38] ss:$12 sps:$4 sm:$0xff]  }
  0x16   :  { %1547 = vmatprep.mubr.msk.bf16.mxu1 %vm327_vm0, %v1599_v17  ;;  %v1658_v61 = vld [vmem:[%s2411_s1 + $0x98] ss:$12 sps:$4 sm:$0xff]   ;;  %v1661_v0 = vld [vmem:[%s2411_s1 + $0x68] ss:$12 sps:$4 sm:$0xff]  }
  0x18   :  { %1398 = vmatpush3.bf16.msra.mxu0 %v1598_v18  ;;  %1468 = vmatpush3.bf16.msra.mxu1 %v1592_v11 }
  0x19   :  { %1399 = vmatprep.subr.bf16.mxu0 %v1600_v19  ;;  %1469 = vmatprep.subr.bf16.mxu1 %v1594_v13 }
  0x1b   :  { %1548 = vmatmul.mubr.msk.bf16.gmra.mrb[8].mxu1 %vm327_vm0, %v1601_v20 }
  0x1c   :  { %1400 = vmatpush3.bf16.msra.mxu0 %v1602_v21  ;;  %1470 = vmatpush3.bf16.msra.mxu1 %v1596_v15 }
  0x1d   :  { %1401 = vmatprep.subr.bf16.mxu0 %v1603_v22  ;;  %1471 = vmatprep.subr.bf16.mxu1 %v1597_v16  ;;  %v1945_v16 = vld [vmem:[%s2412_s3] ss:$0 sm:$0xff] }
  0x1e   :  { %1551 = vmatprep.mubr.msk.bf16.mxu1 %vm327_vm0, %v1608_v24 }
  0x20   :  { %1402 = vmatpush3.bf16.msra.mxu0 %v1604_v25  ;;  %1472 = vmatpush3.bf16.msra.mxu1 %v1598_v18 }
  0x21   :  { %1473 = vmatprep.subr.bf16.mxu1 %v1600_v19  ;;  %1555 = vmatprep.subr.bf16.mxu0 %v1704_v1 }
  0x23   :  { %385 = vmatmul.mubr.bf16.vlgmr.msra.gmra.mrb[0].mxu0 %v1605_v26  ;;  %1552 = vmatmul.mubr.msk.bf16.gmra.mrb[12].mxu1 %vm327_vm0, %v1609_v27 }
  0x24   :  { %1474 = vmatpush3.bf16.msra.mxu1 %v1602_v21  ;;  %1556 = vmatpush3.bf16.msra.mxu0 %v1704_v1 }
  0x25   :  { %1475 = vmatprep.subr.bf16.mxu1 %v1603_v22  ;;  %392 = vmatprep.mubr.bf16.mxu0 %v1610_v28 }
  0x26   :  { %754 = vmatprep.mubr.bf16.mxu1 %v1614_v29  ;;  %1557 = vmatprep.subr.bf16.mxu0 %v1717_v4 }
  0x28   :  { %1476 = vmatpush3.bf16.msra.mxu1 %v1604_v25  ;;  %1558 = vmatpush3.bf16.msra.mxu0 %v1717_v4 }
  0x29   :  { %1575 = vmatprep.subr.bf16.mxu1 %v1704_v1 }
  0x2b   :  { %393 = vmatmul.mubr.bf16.gmra.mrb[4].mxu0 %v1615_v31  ;;  %755 = vmatmul.mubr.bf16.vlgmr.msra.gmra.mrb[16].mxu1 %v1612_v30 }
  0x2c   :  { %400 = vmatprep.mubr.bf16.mxu0 %v1616_v32  ;;  %762 = vmatprep.mubr.bf16.mxu1 %v1618_v33 }
  0x2d   :  { %1577 = vmatpush3.bf16.msra.mxu1 %v1704_v1  ;;  %v1662_v1 = vld [vmem:[%s2411_s1 + $0x80] ss:$12 sps:$4 sm:$0xff]  }
  0x2e   :  { %1576 = vmatprep.subr.bf16.mxu1 %v1717_v4 }
  0x31   :  { %1578 = vmatpush3.bf16.msra.mxu1 %v1717_v4 }
  0x33   :  { %401 = vmatmul.mubr.bf16.gmra.mrb[8].mxu0 %v1620_v34  ;;  %763 = vmatmul.mubr.bf16.gmra.mrb[20].mxu1 %v1621_v35 }
  0x34   :  { %408 = vmatprep.mubr.bf16.mxu0 %v1622_v36  ;;  %770 = vmatprep.mubr.bf16.mxu1 %v1624_v37 }
  0x3b   :  { %409 = vmatmul.mubr.bf16.gmra.mrb[12].mxu0 %v1626_v38  ;;  %771 = vmatmul.mubr.bf16.gmra.mrb[24].mxu1 %v1627_v39 }
  0x3c   :  { %416 = vmatprep.mubr.bf16.mxu0 %v1628_v40  ;;  %778 = vmatprep.mubr.bf16.mxu1 %v1630_v41 }
  0x43   :  { %417 = vmatmul.mubr.bf16.gmra.mrb[16].mxu0 %v1632_v42  ;;  %779 = vmatmul.mubr.bf16.gmra.mrb[28].mxu1 %v1633_v43 }
  0x44   :  { %424 = vmatprep.mubr.bf16.mxu0 %v1634_v44  ;;  %786 = vmatprep.mubr.bf16.mxu1 %v1636_v45 }
  0x4b   :  { %425 = vmatmul.mubr.bf16.gmra.mrb[20].mxu0 %v1638_v46  ;;  %787 = vmatmul.mubr.bf16.gmra.mrb[32].mxu1 %v1639_v47 }
  0x4c   :  { %432 = vmatprep.mubr.bf16.mxu0 %v1640_v48  ;;  %794 = vmatprep.mubr.bf16.mxu1 %v1642_v49 }
  0x53   :  { %433 = vmatmul.mubr.bf16.gmra.mrb[24].mxu0 %v1644_v50  ;;  %795 = vmatmul.mubr.bf16.gmra.mrb[36].mxu1 %v1645_v51 }
  0x54   :  { %440 = vmatprep.mubr.bf16.mxu0 %v1646_v52  ;;  %802 = vmatprep.mubr.bf16.mxu1 %v1648_v53 }
  0x5b   :  { %441 = vmatmul.mubr.bf16.gmra.mrb[28].mxu0 %v1650_v54  ;;  %803 = vmatmul.mubr.bf16.gmra.mrb[40].mxu1 %v1651_v55 }
  0x5c   :  { %810 = vmatprep.mubr.bf16.mxu1 %v1652_v56  ;;  %1559 = vmatprep.mubr.msk.bf16.mxu0 %vm327_vm0, %v1654_v57 }
  0x63   :  { %811 = vmatmul.mubr.bf16.gmra.mrb[44].mxu1 %v1655_v58  ;;  %1560 = vmatmul.mubr.msk.bf16.vlgmr.msra.gmra.mrb[32].mxu0 %vm327_vm0, %v1656_v59 }
  0x64   :  { %1563 = vmatprep.mubr.msk.bf16.mxu0 %vm327_vm0, %v1657_v60  ;;  %1571 = vmatprep.mubr.msk.bf16.mxu1 %vm327_vm0, %v1658_v61 }
  0x6b   :  { %1564 = vmatmul.mubr.msk.bf16.gmra.mrb[36].mxu0 %vm327_vm0, %v1659_v62  ;;  %1572 = vmatmul.mubr.msk.bf16.vlgmr.msra.gmra.mrb[48].mxu1 %vm327_vm0, %v1660_v63 }
  0x6c   :  { %1567 = vmatprep.mubr.msk.bf16.mxu0 %vm327_vm0, %v1661_v0 }
  0x73   :  { %1568 = vmatmul.mubr.msk.bf16.gmra.mrb[40].mxu0 %vm327_vm0, %v1662_v1 }
  0xde   :  { %v1541_v2 = vpop.f32.mrb[0].mxu1 }
  0xdf   :  { %v483_v3 = vpop.f32.mrb[1].mxu1 }
  0xe0   :  { %v1542_v4 = vpop.f32.mrb[2].mxu1 }
  0xe1   :  { %v486_v5 = vpop.f32.mrb[3].mxu1 }
  0xe6   :  { %v1928_v6 = vpop.f32.mrb[4].mxu1 }
  0xe7   :  { %v499_v7 = vpop.f32.mrb[5].mxu1 }
  0xe8   :  { %v1930_v8 = vpop.f32.mrb[6].mxu1 }
  0xe9   :  { %v502_v9 = vpop.f32.mrb[7].mxu1 }
  0xee   :  { %v1932_v10 = vpop.f32.mrb[8].mxu1 }
  0xef   :  { %v1934_v11 = vpop.f32.mrb[9].mxu1 }
  0xf0   :  { %v1936_v12 = vpop.f32.mrb[10].mxu1 }
  0xf1   :  { %v1938_v13 = vpop.f32.mrb[11].mxu1 }
  0xf6   :  { %v1403_v14 = vpop.f32.mrb[0].mxu0  ;;  %v1940_v15 = vpop.f32.mrb[12].mxu1 }
  0xf7   :  { %v1404_v17 = vpop.f32.mrb[1].mxu0  ;;  %v1947_v18 = vpop.f32.mrb[13].mxu1 }
  0xf8   :  { %v1405_v19 = vadd.f32 %v1404_v17, %v1403_v14  ;;  %v1406_v20 = vpop.f32.mrb[2].mxu0  ;;  %v1949_v21 = vpop.f32.mrb[14].mxu1 }
  0xf9   :  { %v1407_v22 = vpop.f32.mrb[3].mxu0  ;;  %v1951_v23 = vpop.f32.mrb[15].mxu1 }
  0xfa   :  { %v387_v24 = vadd.f32 %v1405_v19, %v1945_v16  ;;  %v1408_v25 = vadd.f32 %v1407_v22, %v1406_v20 }
  0xfc   :  { %v1954_v26 = vadd.f32 %v483_v3, %v387_v24  ;;  %v390_v27 = vadd.f32 %v1408_v25, %v1945_v16 }
  0xfe   :  { %v1957_v28 = vadd.f32 %v486_v5, %v390_v27  ;;  %v1409_v29 = vpop.f32.mrb[4].mxu0  ;;  %v1477_v30 = vpop.f32.mrb[16].mxu1 }
  0xff   :  { %v1410_v31 = vpop.f32.mrb[5].mxu0  ;;  %v1478_v32 = vpop.f32.mrb[17].mxu1 }
 0x100   :  { %v1411_v33 = vadd.f32 %v1410_v31, %v1409_v29  ;;  %v1412_v34 = vpop.f32.mrb[6].mxu0  ;;  %v1959_v35 = vadd.f32 %v1478_v32, %v1477_v30  ;;  %v1480_v36 = vpop.f32.mrb[18].mxu1 }
 0x101   :  { %v1413_v37 = vpop.f32.mrb[7].mxu0  ;;  %v1481_v38 = vpop.f32.mrb[19].mxu1 }
 0x102   :  { %v395_v39 = vadd.f32 %v1411_v33, %v1945_v16  ;;  %v1414_v40 = vadd.f32 %v1413_v37, %v1412_v34  ;;  %v1962_v41 = vadd.f32 %v1481_v38, %v1480_v36 }
 0x104   :  { %v1964_v42 = vadd.f32 %v1541_v2, %v395_v39  ;;  %v398_v43 = vadd.f32 %v1414_v40, %v1945_v16 }
 0x106   :  { %v1967_v44 = vadd.f32 %v1542_v4, %v398_v43  ;;  %v1415_v45 = vpop.f32.mrb[8].mxu0  ;;  %v1483_v46 = vpop.f32.mrb[20].mxu1 }
 0x107   :  { %v1416_v47 = vpop.f32.mrb[9].mxu0  ;;  %v1484_v48 = vpop.f32.mrb[21].mxu1 }
 0x108   :  { %v1417_v49 = vadd.f32 %v1416_v47, %v1415_v45  ;;  %v1418_v50 = vpop.f32.mrb[10].mxu0  ;;  %v1969_v51 = vadd.f32 %v1484_v48, %v1483_v46  ;;  %v1486_v52 = vpop.f32.mrb[22].mxu1 }
 0x109   :  { %v1419_v53 = vpop.f32.mrb[11].mxu0  ;;  %v1487_v54 = vpop.f32.mrb[23].mxu1 }
 0x10a   :  { %v403_v55 = vadd.f32 %v1417_v49, %v1945_v16  ;;  %v1420_v56 = vadd.f32 %v1419_v53, %v1418_v50  ;;  %v1972_v57 = vadd.f32 %v1487_v54, %v1486_v52 }
 0x10c   :  { %v1974_v58 = vadd.f32 %v499_v7, %v403_v55  ;;  %v406_v59 = vadd.f32 %v1420_v56, %v1945_v16 }
 0x10e   :  { %v1977_v60 = vadd.f32 %v502_v9, %v406_v59  ;;  %v1421_v61 = vpop.f32.mrb[12].mxu0  ;;  %v1489_v62 = vpop.f32.mrb[24].mxu1 }
 0x10f   :  { %v1422_v63 = vpop.f32.mrb[13].mxu0  ;;  %v1490_v0 = vpop.f32.mrb[25].mxu1 }
 0x110   :  { %v1423_v1 = vadd.f32 %v1422_v63, %v1421_v61  ;;  %v1424_v2 = vpop.f32.mrb[14].mxu0  ;;  %v1979_v3 = vadd.f32 %v1490_v0, %v1489_v62  ;;  %v1492_v4 = vpop.f32.mrb[26].mxu1  ;;  %v2020_v62 = vld [vmem:[%s2413_s4 + $0x8] sm:$0xff]   ;;  %v2025_v63 = vld [vmem:[%s2413_s4 + $0x10] sm:$0xff]   ;;  %v2030_v0 = vld [vmem:[%s2413_s4 + $0x18] sm:$0xff]  }
 0x111   :  { %v1425_v5 = vpop.f32.mrb[15].mxu0  ;;  %v1493_v14 = vpop.f32.mrb[27].mxu1 }
 0x112   :  { %v411_v17 = vadd.f32 %v1423_v1, %v1945_v16  ;;  %v1426_v19 = vadd.f32 %v1425_v5, %v1424_v2  ;;  %v1982_v7 = vadd.f32 %v1493_v14, %v1492_v4 }
 0x114   :  { %v1985_v20 = vadd.f32 %v1928_v6, %v411_v17  ;;  %v414_v9 = vadd.f32 %v1426_v19, %v1945_v16  ;;  %v1315_v19 = vunpack.c.l.bf16 %v2020_v62 }
 0x116   :  { %v1989_v22 = vadd.f32 %v1930_v8, %v414_v9  ;;  %v1427_v24 = vpop.f32.mrb[16].mxu0  ;;  %v1495_v25 = vpop.f32.mrb[28].mxu1  ;;  %v2041_v9 = vld [vmem:[%s2413_s4 + $0x20] sm:$0xff]  }
 0x117   :  { %v1428_v27 = vpop.f32.mrb[17].mxu0  ;;  %v1496_v29 = vpop.f32.mrb[29].mxu1 }
 0x118   :  { %v1429_v30 = vadd.f32 %v1428_v27, %v1427_v24  ;;  %v1430_v31 = vpop.f32.mrb[18].mxu0  ;;  %v1991_v32 = vadd.f32 %v1496_v29, %v1495_v25  ;;  %v1498_v33 = vpop.f32.mrb[30].mxu1 }
 0x119   :  { %v1431_v34 = vpop.f32.mrb[19].mxu0  ;;  %v1499_v36 = vpop.f32.mrb[31].mxu1 }
 0x11a   :  { %v419_v37 = vadd.f32 %v1429_v30, %v1945_v16  ;;  %v1432_v6 = vadd.f32 %v1431_v34, %v1430_v31  ;;  %v1994_v38 = vadd.f32 %v1499_v36, %v1498_v33  ;;  %v1316_v30 = vunpack.c.h.bf16 %v2020_v62  ;;  %v2057_v36 = vld [vmem:[%s2413_s4 + $0x30] sm:$0xff]  }
 0x11b   :  { %v1319_v31 = vunpack.c.l.bf16 %v2025_v63  ;;  %v1320_v33 = vunpack.c.h.bf16 %v2025_v63  ;;  %v1323_v34 = vunpack.c.l.bf16 %v2030_v0 }
 0x11c   :  { %v1997_v39 = vadd.f32 %v1934_v11, %v419_v37  ;;  %v422_v8 = vadd.f32 %v1432_v6, %v1945_v16 }
 0x11e   :  { %v2001_v40 = vadd.f32 %v1938_v13, %v422_v8  ;;  %v1433_v43 = vpop.f32.mrb[20].mxu0  ;;  %v1501_v45 = vpop.f32.mrb[32].mxu1  ;;  %v2011_v13 = vld [vmem:[%s2413_s4] sm:$0xff]  }
 0x11f   :  { %v1434_v46 = vpop.f32.mrb[21].mxu0  ;;  %v1502_v47 = vpop.f32.mrb[33].mxu1  ;;  %v1311_v4 = vunpack.c.l.bf16 %v2011_v13  ;;  %v1312_v17 = vunpack.c.h.bf16 %v2011_v13  ;;  %v2134_v8 = vld [vmem:[%s2414_s5 + $0x20] sm:$0xff]  }
 0x120   :  { %v1435_v48 = vadd.f32 %v1434_v46, %v1433_v43  ;;  %v1436_v49 = vpop.f32.mrb[22].mxu0  ;;  %v2003_v50 = vadd.f32 %v1502_v47, %v1501_v45  ;;  %v1504_v52 = vpop.f32.mrb[34].mxu1  ;;  %v2064_v46 = vld [vmem:[%s2413_s4 + $0x38] sm:$0xff]  }
 0x121   :  { %v1437_v53 = vpop.f32.mrb[23].mxu0  ;;  %v1505_v54 = vpop.f32.mrb[35].mxu1 }
 0x122   :  { %v427_v55 = vadd.f32 %v1435_v48, %v1945_v16  ;;  %v1438_v11 = vadd.f32 %v1437_v53, %v1436_v49  ;;  %v2006_v56 = vadd.f32 %v1505_v54, %v1504_v52  ;;  %v2071_v48 = vld [vmem:[%s2414_s5 + $0x8] sm:$0xff]   ;;  %v2076_v49 = vld [vmem:[%s2414_s5] sm:$0xff]  }
 0x123   :  { %v2121_v54 = vld [vmem:[%s2414_s5 + $0x28] sm:$0xff]  }
 0x124   :  { %v2014_v59 = vadd.f32 %v1932_v10, %v427_v55  ;;  %v430_v61 = vadd.f32 %v1438_v11, %v1945_v16  ;;  %v2085_v11 = vld [vmem:[%s2414_s5 + $0x18] sm:$0xff]  }
 0x126   :  { %v2033_v10 = vadd.f32 %v1936_v12, %v430_v61  ;;  %v1439_v1 = vpop.f32.mrb[24].mxu0  ;;  %v1507_v2 = vpop.f32.mrb[36].mxu1  ;;  %v2046_v12 = vld [vmem:[%s2413_s4 + $0x28] sm:$0xff]  }
 0x127   :  { %v1440_v5 = vpop.f32.mrb[25].mxu0  ;;  %v1508_v14 = vpop.f32.mrb[37].mxu1 }
 0x128   :  { %v1441_v24 = vadd.f32 %v1440_v5, %v1439_v1  ;;  %v1442_v25 = vpop.f32.mrb[26].mxu0  ;;  %v2048_v27 = vadd.f32 %v1508_v14, %v1507_v2  ;;  %v1510_v29 = vpop.f32.mrb[38].mxu1  ;;  %v2096_v2 = vld [vmem:[%s2414_s5 + $0x38] sm:$0xff]   ;;  %v2101_v5 = vld [vmem:[%s2414_s5 + $0x10] sm:$0xff]  }
 0x129   :  { %v1443_v37 = vpop.f32.mrb[27].mxu0  ;;  %v1511_v6 = vpop.f32.mrb[39].mxu1 }
 0x12a   :  { %v435_v43 = vadd.f32 %v1441_v24, %v1945_v16  ;;  %v1444_v45 = vadd.f32 %v1443_v37, %v1442_v25  ;;  %v2066_v47 = vadd.f32 %v1511_v6, %v1510_v29  ;;  %v950_v25 = vadd.f32 %v1315_v19, %v1964_v42 }
 0x12c   :  { %v2088_v13 = vadd.f32 %v1947_v18, %v435_v43  ;;  %v438_v63 = vadd.f32 %v1444_v45, %v1945_v16  ;;  %v2106_v18 = vld [vmem:[%s2414_s5 + $0x30] sm:$0xff]  }
 0x12e   :  { %v2113_v37 = vadd.f32 %v1951_v23, %v438_v63  ;;  %v1445_v6 = vpop.f32.mrb[28].mxu0  ;;  %v1513_v43 = vpop.f32.mrb[40].mxu1  ;;  %v2137_v23 = vadd.f32 %v1311_v4, %v1954_v26  ;;  %v2140_v63 = vadd.f32 %v1312_v17, %v1957_v28  ;;  %v951_v26 = vadd.f32 %v1316_v30, %v1967_v44 }
 0x12f   :  { %v1446_v53 = vpop.f32.mrb[29].mxu0  ;;  %v1514_v24 = vpop.f32.mrb[41].mxu1  ;;  %v2152_v28 = vadd.f32 %v1319_v31, %v1974_v58  ;;  %v757_v44 = vadd.f32 %v1959_v35, %v1945_v16  ;;  %v768_v35 = vadd.f32 %v1972_v57, %v1945_v16  ;;  %v2417_v57 = vunpack.c.l.bf16 %v2071_v48 }
 0x130   :  { %v1447_v52 = vadd.f32 %v1446_v53, %v1445_v6  ;;  %v1448_v45 = vpop.f32.mrb[30].mxu0  ;;  %v2127_v1 = vadd.f32 %v1514_v24, %v1513_v43  ;;  %v1516_v55 = vpop.f32.mrb[42].mxu1  ;;  %v2157_v43 = vadd.f32 %v1320_v33, %v1977_v60  ;;  %v1012_v58 = vmax.f32 %v2137_v23, 0.0 }
 0x131   :  { %v1449_v53 = vpop.f32.mrb[31].mxu0  ;;  %v1517_v6 = vpop.f32.mrb[43].mxu1  ;;  %v1013_v30 = vmax.f32 %v2140_v63, 0.0  ;;  %v2171_v60 = vadd.f32 %v1323_v34, %v1985_v20  ;;  %v1014_v33 = vmax.f32 %v950_v25, 0.0 }
 0x132   :  { %v443_v29 = vadd.f32 %v1447_v52, %v1945_v16  ;;  %v1450_v61 = vadd.f32 %v1449_v53, %v1448_v45  ;;  %v2148_v14 = vadd.f32 %v1517_v6, %v1516_v55  ;;  %v765_v52 = vadd.f32 %v1969_v51, %v1945_v16 }
 0x133   :  { %v760_v51 = vadd.f32 %v1962_v41, %v1945_v16  ;;  %v1015_v45 = vmax.f32 %v951_v26, 0.0  ;;  %v2416_v41 = vunpack.c.h.bf16 %v2030_v0  ;;  %v1018_v19 = vmax.f32 %v2171_v60, 0.0 }
 0x134   :  { %v540_v62 = vadd.f32 %v1940_v15, %v443_v29  ;;  %v446_v42 = vadd.f32 %v1450_v61, %v1945_v16 }
 0x136   :  { %v543_v15 = vadd.f32 %v1949_v21, %v446_v42  ;;  %v1561_v31 = vpop.f32.mrb[32].mxu0  ;;  %v1519_v55 = vpop.f32.mrb[44].mxu1  ;;  %v2181_v21 = vadd.f32 %v1979_v3, %v1945_v16  ;;  %v2187_v42 = vadd.f32 %v2416_v41, %v1989_v22  ;;  %v2418_v3 = vunpack.c.l.bf16 %v2076_v49 }
 0x137   :  { %v862_v61 = vadd.f32 %v1561_v31, %v765_v52  ;;  %v853_v29 = vpop.f32.mrb[33].mxu0  ;;  %v1520_v23 = vpop.f32.mrb[45].mxu1  ;;  %v2419_v22 = vunpack.c.h.bf16 %v2071_v48  ;;  %v2422_v48 = vunpack.c.l.bf16 %v2057_v36 }
 0x138   :  { %v854_v53 = vadd.f32 %v853_v29, %v757_v44  ;;  %v1562_v20 = vpop.f32.mrb[34].mxu0  ;;  %v1521_v34 = vadd.f32 %v1520_v23, %v1519_v55  ;;  %v1522_v6 = vpop.f32.mrb[46].mxu1  ;;  %v2193_v55 = vadd.f32 %v1982_v7, %v1945_v16  ;;  %v2420_v7 = vunpack.c.l.bf16 %v2041_v9 }
 0x139   :  { %v998_v26 = vadd.f32 %v2417_v57, %v862_v61  ;;  %v865_v52 = vadd.f32 %v1562_v20, %v768_v35  ;;  %v856_v31 = vpop.f32.mrb[35].mxu0  ;;  %v1523_v44 = vpop.f32.mrb[47].mxu1  ;;  %v781_v61 = vadd.f32 %v1991_v32, %v1945_v16  ;;  %v784_v35 = vadd.f32 %v1994_v38, %v1945_v16 }
 0x13a   :  { %v996_v29 = vadd.f32 %v2418_v3, %v854_v53  ;;  %v857_v23 = vadd.f32 %v856_v31, %v760_v51  ;;  %v1524_v25 = vadd.f32 %v1523_v44, %v1522_v6  ;;  %v2207_v20 = vadd.f32 %v2420_v7, %v1997_v39 }
 0x13b   :  { %v1030_v0 = vmax.f32 %v998_v26, 0.0  ;;  %v999_v41 = vadd.f32 %v2419_v22, %v865_v52  ;;  %v2421_v51 = vunpack.c.h.bf16 %v2076_v49  ;;  %v813_v57 = vadd.f32 %v1521_v34, %v1945_v16 }
 0x13c   :  { %v1028_v53 = vmax.f32 %v996_v29, 0.0  ;;  %v2215_v26 = vadd.f32 %v2422_v48, %v2088_v13  ;;  %v805_v38 = vadd.f32 %v2127_v1, %v1945_v16  ;;  %v2423_v31 = vunpack.c.l.bf16 %v2064_v46 }
 0x13d   :  { %v997_v6 = vadd.f32 %v2421_v51, %v857_v23  ;;  %v1046_v32 = vsub.f32 %v1014_v33, %v1030_v0  ;;  %v1031_v52 = vmax.f32 %v999_v41, 0.0  ;;  %v2424_v44 = vunpack.c.h.bf16 %v2064_v46 }
 0x13e   :  { %v962_v39 = vadd.f32 %v2423_v31, %v540_v62  ;;  %v1044_v49 = vsub.f32 %v1012_v58, %v1028_v53  ;;  %v1565_v34 = vpop.f32.mrb[36].mxu0  ;;  %v1573_v23 = vpop.f32.mrb[48].mxu1  ;;  %v1024_v60 = vmax.f32 %v2215_v26, 0.0 }
 0x13f   :  { %v2223_v3 = vadd.f32 %v2424_v44, %v543_v15  ;;  %v1029_v29 = vmax.f32 %v997_v6, 0.0  ;;  %v1062_v22 = vand.u32 2147483647, %v1046_v32  ;;  %v1094_v7 = vmul.f32 0.5, %v1046_v32  ;;  %v869_v33 = vpop.f32.mrb[37].mxu0  ;;  %v901_v0 = vpop.f32.mrb[49].mxu1 }
 0x140   :  { %v1047_v13 = vsub.f32 %v1015_v45, %v1031_v52  ;;  %v878_v51 = vadd.f32 %v1565_v34, %v781_v61  ;;  %v1060_v41 = vand.u32 2147483647, %v1044_v49  ;;  %v1092_v48 = vmul.f32 0.5, %v1044_v49  ;;  %v1566_v4 = vpop.f32.mrb[38].mxu0  ;;  %v1574_v62 = vpop.f32.mrb[50].mxu1 }
 0x141   :  { %v1045_v1 = vsub.f32 %v1013_v30, %v1029_v29  ;;  %v910_v17 = vadd.f32 %v1573_v23, %v813_v57  ;;  %vm2225_vm1 = vcmp.le.f32.partialorder %v1062_v22, 1.0  ;;  %v1110_v58 = vmul.f32 %v1094_v7, %v1046_v32  ;;  %v2229_v6 = vpop.f32.mrb[39].mxu0  ;;  %v2231_v31 = vpop.f32.mrb[51].mxu1 }
 0x142   :  { %v1295_v15 = vadd.f32 -0.5, %v1062_v22  ;;  %v1063_v53 = vand.u32 2147483647, %v1047_v13  ;;  %vm2233_vm2 = vcmp.le.f32.partialorder %v1060_v41, 1.0  ;;  %v1108_v61 = vmul.f32 %v1092_v48, %v1044_v49 }
 0x143   :  { %v1293_v30 = vadd.f32 -0.5, %v1060_v41  ;;  %v1095_v57 = vmul.f32 0.5, %v1047_v13  ;;  %v1061_v44 = vand.u32 2147483647, %v1045_v1  ;;  %v1026_v29 = vmax.f32 %v962_v39, 0.0 }
 0x144   :  { %v1296_v52 = vadd.f32 -0.5, %v1063_v53  ;;  %v816_v34 = vadd.f32 %v1524_v25, %v1945_v16  ;;  %vm2240_vm3 = vcmp.le.f32.partialorder %v1063_v53, 1.0  ;;  %v1093_v7 = vmul.f32 0.5, %v1045_v1 }
 0x145   :  { %v1140_v32 = vsel %vm2233_vm2, %v1108_v61, %v1293_v30  ;;  %v1111_v22 = vmul.f32 %v1095_v57, %v1047_v13  ;;  %v1142_v24 = vsel %vm2225_vm1, %v1110_v58, %v1295_v15  ;;  %vm2246_vm4 = vcmp.le.f32.partialorder %v1061_v44, 1.0 }
 0x146   :  { %v1294_v41 = vadd.f32 -0.5, %v1061_v44  ;;  %v2433_v39 = vunpack.c.l.bf16 %v2085_v11  ;;  %v1156_v48 = vsel %vm327_vm0, %v1140_v32, 0.0  ;;  %v1109_v45 = vmul.f32 %v1093_v7, %v1045_v1  ;;  %v1569_v30 = vpop.f32.mrb[40].mxu0 }
 0x147   :  { %v2434_v53 = vunpack.c.l.bf16 %v2096_v2  ;;  %v870_v13 = vadd.f32 %v869_v33, %v2181_v21  ;;  %v1143_v46 = vsel %vm2240_vm3, %v1111_v22, %v1296_v52  ;;  %v902_v15 = vadd.f32 %v901_v0, %v805_v38  ;;  %v885_v63 = vpop.f32.mrb[41].mxu0 }
 0x148   :  { %v1002_v25 = vadd.f32 %v2433_v39, %v878_v51  ;;  %v881_v57 = vadd.f32 %v1566_v4, %v784_v35  ;;  %v1141_v44 = vsel %vm2246_vm4, %v1109_v45, %v1294_v41  ;;  %v2435_v32 = vunpack.c.l.bf16 %v2101_v5  ;;  %v1570_v39 = vpop.f32.mrb[42].mxu0 }
 0x149   :  { %v1010_v61 = vadd.f32 %v2434_v53, %v910_v17  ;;  %v913_v7 = vadd.f32 %v1574_v62, %v816_v34  ;;  %v1157_v17 = vsel %vm327_vm0, %v1141_v44, 0.0  ;;  %v2436_v33 = vunpack.c.l.bf16 %v2106_v18  ;;  %v888_v0 = vpop.f32.mrb[43].mxu0 }
 0x14a   :  { %v1034_v58 = vmax.f32 %v1002_v25, 0.0  ;;  %v1000_v1 = vadd.f32 %v2435_v32, %v870_v13  ;;  %v2437_v4 = vunpack.c.h.bf16 %v2085_v11  ;;  %v1158_v52 = vadd.f32 %v1157_v17, %v1156_v48 }
 0x14b   :  { %v1042_v51 = vmax.f32 %v1010_v61, 0.0  ;;  %v1008_v38 = vadd.f32 %v2436_v33, %v902_v15  ;;  %v2438_v62 = vunpack.c.h.bf16 %v2096_v2  ;;  %v1159_v49 = vsel %vm327_vm0, %v1142_v24, 0.0 }
 0x14c   :  { %v2265_v21 = vsub.f32 %v1018_v19, %v1034_v58  ;;  %v1003_v35 = vadd.f32 %v2437_v4, %v881_v57  ;;  %v1032_v22 = vmax.f32 %v1000_v1, 0.0  ;;  %v1160_v25 = vadd.f32 %v1159_v49, %v1158_v52 }
 0x14d   :  { %v2271_v23 = vsub.f32 %v1026_v29, %v1042_v51  ;;  %v1011_v34 = vadd.f32 %v2438_v62, %v913_v7  ;;  %v1040_v19 = vmax.f32 %v1008_v38, 0.0  ;;  %v2439_v45 = vmax.f32 %v2152_v28, 0.0 }
 0x14e   :  { %v1035_v41 = vmax.f32 %v1003_v35, 0.0  ;;  %v1019_v11 = vmax.f32 %v2187_v42, 0.0  ;;  %v1161_v29 = vsel %vm327_vm0, %v1143_v46, 0.0  ;;  %v1027_v2 = vmax.f32 %v2223_v3, 0.0 }
 0x14f   :  { %v1048_v53 = vsub.f32 %v2439_v45, %v1032_v22  ;;  %v1043_v61 = vmax.f32 %v1011_v34, 0.0  ;;  %v2281_v48 = vsub.f32 %v1024_v60, %v1040_v19  ;;  %v808_v24 = vadd.f32 %v2148_v14, %v1945_v16 }
 0x150   :  { %v1162_v58 = vadd.f32 %v1161_v29, %v1160_v25  ;;  %v1051_v15 = vsub.f32 %v1019_v11, %v1035_v41  ;;  %v2440_v28 = vunpack.c.h.bf16 %v2041_v9  ;;  %v2441_v42 = vunpack.c.l.bf16 %v2046_v12 }
 0x151   :  { %v1064_v13 = vand.u32 2147483647, %v1048_v53  ;;  %v1096_v26 = vmul.f32 0.5, %v1048_v53  ;;  %v2294_v44 = vsub.f32 %v1027_v2, %v1043_v61  ;;  %v1020_v3 = vmax.f32 %v2207_v20, 0.0 }
 0x152   :  { %v2289_v57 = vadd.f32 %v2440_v28, %v2001_v40  ;;  %v958_v46 = vadd.f32 %v2441_v42, %v2014_v59  ;;  %v797_v32 = vadd.f32 %v2048_v27, %v1945_v16  ;;  %v2442_v1 = vunpack.c.h.bf16 %v2046_v12 }
 0x153   :  { %vm1080_vm5 = vcmp.le.f32.partialorder %v1064_v13, 1.0  ;;  %v1112_v51 = vmul.f32 %v1096_v26, %v1048_v53  ;;  %v1297_v14 = vadd.f32 -0.5, %v1064_v13  ;;  %v2443_v40 = vunpack.c.h.bf16 %v2057_v36 }
 0x154   :  { %v959_v9 = vadd.f32 %v2442_v1, %v2033_v10  ;;  %v789_v59 = vadd.f32 %v2003_v50, %v1945_v16  ;;  %v792_v20 = vadd.f32 %v2006_v56, %v1945_v16  ;;  %v873_v33 = vadd.f32 %v2229_v6, %v2193_v55 }
 0x155   :  { %v961_v7 = vadd.f32 %v2443_v40, %v2113_v37  ;;  %v1144_v17 = vsel %vm1080_vm5, %v1112_v51, %v1297_v14  ;;  %v905_v27 = vadd.f32 %v2231_v31, %v808_v24  ;;  %v894_v38 = vadd.f32 %v1569_v30, %v797_v32 }
 0x156   :  { %v1066_v12 = vand.u32 2147483647, %v2265_v21  ;;  %v1163_v10 = vsel %vm327_vm0, %v1144_v17, 0.0  ;;  %v1022_v4 = vmax.f32 %v958_v46, 0.0  ;;  %v800_v36 = vadd.f32 %v2066_v47, %v1945_v16 }
 0x157   :  { %v1164_v37 = vadd.f32 %v1163_v10, %v1162_v58  ;;  %v2444_v50 = vunpack.c.h.bf16 %v2101_v5  ;;  %v2445_v56 = vunpack.c.h.bf16 %v2106_v18  ;;  %v2446_v55 = vunpack.c.l.bf16 %v2121_v54 }
 0x158   :  { %v1098_v31 = vmul.f32 0.5, %v2265_v21  ;;  %v886_v30 = vadd.f32 %v885_v63, %v789_v59  ;;  %v897_v22 = vadd.f32 %v1570_v39, %v800_v36  ;;  %v889_v62 = vadd.f32 %v888_v0, %v792_v20 }
 0x159   :  { %v1001_v35 = vadd.f32 %v2444_v50, %v873_v33  ;;  %v1009_v52 = vadd.f32 %v2445_v56, %v905_v27  ;;  %v1006_v6 = vadd.f32 %v2446_v55, %v894_v38  ;;  %v1025_v49 = vmax.f32 %v961_v7, 0.0 }
 0x15a   :  { %v2447_v16 = vunpack.c.l.bf16 %v2134_v8  ;;  %v2448_v5 = vunpack.c.h.bf16 %v2121_v54  ;;  %v1023_v18 = vmax.f32 %v959_v9, 0.0  ;;  %v2449_v25 = vunpack.c.h.bf16 %v2134_v8 }
 0x15b   :  { %v1033_v34 = vmax.f32 %v1001_v35, 0.0  ;;  %v1041_v60 = vmax.f32 %v1009_v52, 0.0  ;;  %v1038_v19 = vmax.f32 %v1006_v6, 0.0  ;;  %vm2329_vm6 = vcmp.le.f32.partialorder %v1066_v12, 1.0 }
 0x15c   :  { %v1004_v47 = vadd.f32 %v2447_v16, %v886_v30  ;;  %v1007_v41 = vadd.f32 %v2448_v5, %v897_v22  ;;  %v1005_v45 = vadd.f32 %v2449_v25, %v889_v62  ;;  %v2452_v63 = vmax.f32 %v2157_v43, 0.0 }
 0x15d   :  { %v2335_v0 = vsub.f32 %v1025_v49, %v1041_v60  ;;  %v1054_v11 = vsub.f32 %v1022_v4, %v1038_v19  ;;  %v1114_v61 = vmul.f32 %v1098_v31, %v2265_v21  ;;  %v1299_v29 = vadd.f32 -0.5, %v1066_v12 }
 0x15e   :  { %v1049_v39 = vsub.f32 %v2452_v63, %v1033_v34  ;;  %v1036_v2 = vmax.f32 %v1004_v47, 0.0  ;;  %v1039_v54 = vmax.f32 %v1007_v41, 0.0  ;;  %v1067_v24 = vand.u32 2147483647, %v1051_v15 }
 0x15f   :  { %v1099_v13 = vmul.f32 0.5, %v1051_v15  ;;  %v1037_v42 = vmax.f32 %v1005_v45, 0.0  ;;  %v1146_v43 = vsel %vm2329_vm6, %v1114_v61, %v1299_v29  ;;  %v1021_v32 = vmax.f32 %v2289_v57, 0.0 }
 0x160   :  { %v1065_v26 = vand.u32 2147483647, %v1049_v39  ;;  %v1097_v8 = vmul.f32 0.5, %v1049_v39  ;;  %v1052_v58 = vsub.f32 %v1020_v3, %v1036_v2  ;;  %v1055_v28 = vsub.f32 %v1023_v18, %v1039_v54 }
 0x161   :  { %v1115_v21 = vmul.f32 %v1099_v13, %v1051_v15  ;;  %v1300_v1 = vadd.f32 -0.5, %v1067_v24  ;;  %vm2341_vm8 = vcmp.le.f32.partialorder %v1067_v24, 1.0  ;;  %v1053_v20 = vsub.f32 %v1021_v32, %v1037_v42 }
 0x162   :  { %vm1081_vm7 = vcmp.le.f32.partialorder %v1065_v26, 1.0  ;;  %v1113_v46 = vmul.f32 %v1097_v8, %v1049_v39  ;;  %v1298_v51 = vadd.f32 -0.5, %v1065_v26  ;;  %v1068_v14 = vand.u32 2147483647, %v1052_v58 }
 0x163   :  { %v1100_v40 = vmul.f32 0.5, %v1052_v58  ;;  %v1167_v17 = vsel %vm327_vm0, %v1146_v43, 0.0  ;;  %v1070_v15 = vand.u32 2147483647, %v1054_v11  ;;  %v1102_v38 = vmul.f32 0.5, %v1054_v11 }
 0x164   :  { %v1145_v9 = vsel %vm1081_vm7, %v1113_v46, %v1298_v51  ;;  %v1301_v59 = vadd.f32 -0.5, %v1068_v14  ;;  %vm2347_vm9 = vcmp.le.f32.partialorder %v1068_v14, 1.0  ;;  %v1069_v12 = vand.u32 2147483647, %v1053_v20 }
 0x165   :  { %v1165_v3 = vsel %vm327_vm0, %v1145_v9, 0.0  ;;  %v1116_v57 = vmul.f32 %v1100_v40, %v1052_v58  ;;  %v1101_v10 = vmul.f32 0.5, %v1053_v20  ;;  %v1147_v4 = vsel %vm2341_vm8, %v1115_v21, %v1300_v1 }
 0x166   :  { %v1166_v33 = vadd.f32 %v1165_v3, %v1164_v37  ;;  %v1071_v50 = vand.u32 2147483647, %v1055_v28  ;;  %v1103_v35 = vmul.f32 0.5, %v1055_v28  ;;  %vm2355_vm10 = vcmp.le.f32.partialorder %v1069_v12, 1.0 }
 0x167   :  { %v1148_v56 = vsel %vm2347_vm9, %v1116_v57, %v1301_v59  ;;  %v1117_v52 = vmul.f32 %v1101_v10, %v1053_v20  ;;  %v1302_v55 = vadd.f32 -0.5, %v1069_v12  ;;  %v1104_v6 = vmul.f32 0.5, %v2281_v48 }
 0x168   :  { %v1168_v36 = vadd.f32 %v1167_v17, %v1166_v33  ;;  %v1072_v31 = vand.u32 2147483647, %v2281_v48  ;;  %v1118_v30 = vmul.f32 %v1102_v38, %v1054_v11  ;;  %v1303_v22 = vadd.f32 -0.5, %v1070_v15 }
 0x169   :  { %v1149_v62 = vsel %vm2355_vm10, %v1117_v52, %v1302_v55  ;;  %v1169_v34 = vsel %vm327_vm0, %v1147_v4, 0.0  ;;  %v1105_v49 = vmul.f32 0.5, %v2335_v0  ;;  %vm2365_vm11 = vcmp.le.f32.partialorder %v1070_v15, 1.0 }
 0x16a   :  { %v1171_v19 = vsel %vm327_vm0, %v1148_v56, 0.0  ;;  %v1073_v16 = vand.u32 2147483647, %v2335_v0  ;;  %v1119_v47 = vmul.f32 %v1103_v35, %v1055_v28  ;;  %v1304_v5 = vadd.f32 -0.5, %v1071_v50 }
 0x16b   :  { %v1170_v41 = vadd.f32 %v1169_v34, %v1168_v36  ;;  %v1106_v18 = vmul.f32 0.5, %v2271_v23  ;;  %v1120_v25 = vmul.f32 %v1104_v6, %v2281_v48  ;;  %vm2373_vm12 = vcmp.le.f32.partialorder %v1071_v50, 1.0 }
 0x16c   :  { %v1173_v53 = vsel %vm327_vm0, %v1149_v62, 0.0  ;;  %v1305_v63 = vadd.f32 -0.5, %v1072_v31  ;;  %v1074_v39 = vand.u32 2147483647, %v2271_v23  ;;  %v1150_v11 = vsel %vm2365_vm11, %v1118_v30, %v1303_v22 }
 0x16d   :  { %v1172_v61 = vadd.f32 %v1171_v19, %v1170_v41  ;;  %v1121_v29 = vmul.f32 %v1105_v49, %v2335_v0  ;;  %v1075_v2 = vand.u32 2147483647, %v2294_v44  ;;  %vm2383_vm13 = vcmp.le.f32.partialorder %v1072_v31, 1.0 }
 0x16e   :  { %v1107_v48 = vmul.f32 0.5, %v2294_v44  ;;  %v1306_v24 = vadd.f32 -0.5, %v1073_v16  ;;  %v1151_v13 = vsel %vm2373_vm12, %v1119_v47, %v1304_v5  ;;  %vm2390_vm14 = vcmp.le.f32.partialorder %v1073_v16, 1.0 }
 0x16f   :  { %v1174_v26 = vadd.f32 %v1173_v53, %v1172_v61  ;;  %v1175_v58 = vsel %vm327_vm0, %v1150_v11, 0.0  ;;  %v1122_v0 = vmul.f32 %v1106_v18, %v2271_v23  ;;  %v1307_v28 = vadd.f32 -0.5, %v1074_v39 }
 0x170   :  { %v1152_v42 = vsel %vm2383_vm13, %v1120_v25, %v1305_v63  ;;  %vm1090_vm15 = vcmp.le.f32.partialorder %v1074_v39, 1.0  ;;  %v1177_v51 = vsel %vm327_vm0, %v1151_v13, 0.0  ;;  %v1123_v43 = vmul.f32 %v1107_v48, %v2294_v44 }
 0x171   :  { %v1176_v46 = vadd.f32 %v1175_v58, %v1174_v26  ;;  %v1308_v14 = vadd.f32 -0.5, %v1075_v2  ;;  %v1153_v32 = vsel %vm2390_vm14, %v1121_v29, %v1306_v24  ;;  %vm1091_vm1 = vcmp.le.f32.partialorder %v1075_v2, 1.0 }
 0x172   :  { %v1179_v1 = vsel %vm327_vm0, %v1152_v42, 0.0  ;;  %v1154_v9 = vsel %vm1090_vm15, %v1122_v0, %v1307_v28  ;;  %v1181_v40 = vsel %vm327_vm0, %v1153_v32, 0.0  ;;  %v1196_v4 = vlaneseq }
 0x173   :  { %v1178_v21 = vadd.f32 %v1177_v51, %v1176_v46  ;;  %v1155_v7 = vsel %vm1091_vm1, %v1123_v43, %v1308_v14  ;;  %v1183_v59 = vsel %vm327_vm0, %v1154_v9, 0.0 }
 0x174   :  { %v1185_v17 = vsel %vm327_vm0, %v1155_v7, 0.0  ;;  %v1197_v36 = vshrl.u32 %v1196_v4, 7  ;;  %v1199_v50 = vand.u32 127, %v1196_v4 }
 0x175   :  { %v1180_v23 = vadd.f32 %v1179_v1, %v1178_v21 }
 0x176   :  { %vm1200_vm2 = vcmp.eq.s32.totalorder %v1197_v36, 0  ;;  %vm1201_vm3 = vcmp.eq.s32.totalorder %v1199_v50, 0 }
 0x177   :  { %v1182_v3 = vadd.f32 %v1181_v40, %v1180_v23  ;;  %vm1202_vm4 = vmand %vm1200_vm2, %vm1201_vm3 }
 0x179   :  { %v1184_v20 = vadd.f32 %v1183_v59, %v1182_v3 }
 0x17b   :  { %v1186_v44 = vadd.f32 %v1185_v17, %v1184_v20 }
 0x17d   :  { %1187 = vadd.xlane.f32.xlu0 %v1186_v44 }
 0x20a   :  { %v1188_v33 = vpop.xlane.xlu0 %1187 }
 0x20b   :  { %v1189_v27 = vrot.slane %v1188_v33, 4 }
 0x20d   :  { %v1190_v57 = vadd.f32 %v1189_v27, %v1188_v33 }
 0x20f   :  { %v1191_v15 = vrot.slane %v1190_v57, 2 }
 0x211   :  { %v1192_v38 = vadd.f32 %v1191_v15, %v1190_v57 }
 0x213   :  { %v1193_v12 = vrot.slane %v1192_v38, 1 }
 0x215   :  { %v1194_v10 = vadd.f32 %v1193_v12, %v1192_v38 }
 0x217   :  { %1579 = vpush %v1194_v10 }
 0x248   :  { %s1580_s5 = spop %1579 }
 0x249   :  { %v1203_v35 = vstv %s1580_s5 }
 0x24a   :  { %v1204_v56 = vsel %vm1202_vm4, %v1203_v35, 0.0 }
 0x24b   :  { %1205 = vst [vmem:[%s2415_s6] sm:$0xff] %v1204_v56 }

</bundles_post_ra>
